<compile_context>
chip_gen: v7x
topology: tpu7x:2x2x1
jax: 0.10.0
libtpu: 0.0.40
codegen_flags: <defaults>
</compile_context>

<pallas_src>
import jax
import jax.numpy as jnp
from jax.experimental import pallas as pl
from jax.experimental.pallas import tpu as pltpu


# ---------------------------------------------------------------------------
# helpers
# ---------------------------------------------------------------------------

def _round_up(x, m):
    return ((x + m - 1) // m) * m


# ---------------------------------------------------------------------------
# Pallas kernels
# ---------------------------------------------------------------------------

def _conv_pool_kernel(p_ref, w_ref, b_ref, o_ref):
    """Fused conv(im2col matmul) + bias + ReLU + 2x2 maxpool.

    p_ref : (4, tile_m, K_pad)  patches, one slab per pooling-window corner
    w_ref : (K_pad, C_pad)      padded conv weight (im2col layout)
    b_ref : (1, C_pad)          padded bias
    o_ref : (tile_m, C_pad)     pooled activations (lane-dense)
    """
    w = w_ref[...]
    b = b_ref[...]
    acc = None
    for corner in range(4):           # static unroll: 4 MXU passes per tile
        y = jnp.dot(p_ref[corner], w, preferred_element_type=jnp.float32) + b
        y = jnp.maximum(y, 0.0)       # ReLU (f32 epilogue)
        acc = y if acc is None else jnp.maximum(acc, y)   # 2x2 max-pool
    o_ref[...] = acc.astype(o_ref.dtype)


def _fc_head_kernel(x_ref, w1_ref, b1_ref, w2_ref, b2_ref, w3_ref, b3_ref,
                    o_ref):
    """Fused fc1->ReLU->fc2->ReLU->fc3; all weights resident in VMEM."""
    h = jnp.dot(x_ref[...], w1_ref[...], preferred_element_type=jnp.float32)
    h = jnp.maximum(h + b1_ref[...], 0.0)
    h = jnp.dot(h, w2_ref[...], preferred_element_type=jnp.float32)
    h = jnp.maximum(h + b2_ref[...], 0.0)
    o = jnp.dot(h, w3_ref[...], preferred_element_type=jnp.float32)
    o_ref[...] = (o + b3_ref[...]).astype(o_ref.dtype)


# ---------------------------------------------------------------------------
# Wrappers around pallas_call
# ---------------------------------------------------------------------------

def conv_relu_pool(x_nhwc, w_mat, b_mat, k, *, tile_m=512):
    """Valid conv (stride 1) + ReLU + 2x2 maxpool, fused in one pallas_call.

    x_nhwc : (N, H, W, C_in) f32
    w_mat  : (K_pad, C_pad)  padded im2col weight (feature order c_in,kh,kw)
    b_mat  : (1, C_pad)      padded bias
    Returns (N, Hp, Wp, C_pad) pooled activations (padded channels are 0).
    """
    n, h, w_dim, c_in = x_nhwc.shape
    k_pad, c_pad = w_mat.shape
    ho, wo = h - k + 1, w_dim - k + 1
    hp, wp = ho // 2, wo // 2
    kk = c_in * k * k

    # --- JAX glue: im2col patches grouped by pooling-window corner ---------
    corners = []
    for pi in (0, 1):
        for pj in (0, 1):
            cols = []
            for ci in range(c_in):
                for kh in range(k):
                    for kw in range(k):
                        sl = x_nhwc[:, pi + kh: pi + kh + 2 * hp: 2,
                                       pj + kw: pj + kw + 2 * wp: 2, ci]
                        cols.append(sl)                     # (n, hp, wp)
            corner = jnp.stack(cols, axis=-1)               # (n, hp, wp, kk)
            corners.append(corner.reshape(n * hp * wp, kk))
    patches = jnp.stack(corners, axis=0)                    # (4, m, kk)
    if k_pad > kk:                                          # lane-pad K
        patches = jnp.pad(patches, ((0, 0), (0, 0), (0, k_pad - kk)))

    m = n * hp * wp
    tile_m = min(tile_m, _round_up(m, 8))                   # sublane multiple
    m_pad = _round_up(m, tile_m)
    if m_pad > m:
        patches = jnp.pad(patches, ((0, 0), (0, m_pad - m), (0, 0)))

    out = pl.pallas_call(
        _conv_pool_kernel,
        out_shape=jax.ShapeDtypeStruct((m_pad, c_pad), jnp.float32),
        grid=(m_pad // tile_m,),
        in_specs=[
            pl.BlockSpec((4, tile_m, k_pad), lambda i: (0, i, 0)),
            pl.BlockSpec((k_pad, c_pad), lambda i: (0, 0)),
            pl.BlockSpec((1, c_pad), lambda i: (0, 0)),
        ],
        out_specs=pl.BlockSpec((tile_m, c_pad), lambda i: (i, 0)),
        compiler_params=pltpu.CompilerParams(
            dimension_semantics=("parallel",)),
    )(patches, w_mat, b_mat)

    return out[:m].reshape(n, hp, wp, c_pad)


def fc_head(x_flat, w1, b1, w2, b2, w3, b3, *, tile_m=256):
    """Fused 3-layer MLP head.  x_flat: (N, 3200) -> logits (N, 10)."""
    m, k = x_flat.shape
    n_pad = w3.shape[1]                                     # 128
    tile_m = min(tile_m, _round_up(m, 8))
    m_pad = _round_up(m, tile_m)
    if m_pad > m:
        x_flat = jnp.pad(x_flat, ((0, m_pad - m), (0, 0)))

    out = pl.pallas_call(
        _fc_head_kernel,
        out_shape=jax.ShapeDtypeStruct((m_pad, n_pad), jnp.float32),
        grid=(m_pad // tile_m,),
        in_specs=[
            pl.BlockSpec((tile_m, k), lambda i: (i, 0)),
            pl.BlockSpec(w1.shape, lambda i: (0, 0)),
            pl.BlockSpec(b1.shape, lambda i: (0, 0)),
            pl.BlockSpec(w2.shape, lambda i: (0, 0)),
            pl.BlockSpec(b2.shape, lambda i: (0, 0)),
            pl.BlockSpec(w3.shape, lambda i: (0, 0)),
            pl.BlockSpec(b3.shape, lambda i: (0, 0)),
        ],
        out_specs=pl.BlockSpec((tile_m, n_pad), lambda i: (i, 0)),
        compiler_params=pltpu.CompilerParams(
            dimension_semantics=("parallel",)),
    )(x_flat, w1, b1, w2, b2, w3, b3)

    return out[:m, :10]


# ---------------------------------------------------------------------------
# Parameters (PyTorch layouts) and one-time kernel-friendly prep
# ---------------------------------------------------------------------------

def _uniform(key, shape, fan_in):
    bound = 1.0 / (fan_in ** 0.5)
    return jax.random.uniform(key, shape, jnp.float32, -bound, bound)


def init_params(key):
    ks = jax.random.split(key, 10)
    return {
        "conv1_w": _uniform(ks[0], (6, 3, 5, 5), 3 * 5 * 5),
        "conv1_b": _uniform(ks[1], (6,), 3 * 5 * 5),
        "conv2_w": _uniform(ks[2], (16, 6, 5, 5), 6 * 5 * 5),
        "conv2_b": _uniform(ks[3], (16,), 6 * 5 * 5),
        "fc1_w":   _uniform(ks[4], (120, 400), 400),
        "fc1_b":   _uniform(ks[5], (120,), 400),
        "fc2_w":   _uniform(ks[6], (84, 120), 120),
        "fc2_b":   _uniform(ks[7], (84,), 120),
        "fc3_w":   _uniform(ks[8], (10, 84), 84),
        "fc3_b":   _uniform(ks[9], (10,), 84),
    }


def _prep_conv_weight(w_torch, b, k_pad, c_pad):
    """(C_out, C_in, k, k) torch weight -> padded (K_pad, C_pad) im2col weight."""
    c_out = w_torch.shape[0]
    w_mat = w_torch.reshape(c_out, -1).T                    # (C_in*k*k, C_out)
    kk = w_mat.shape[0]
    w_mat = jnp.pad(w_mat, ((0, k_pad - kk), (0, c_pad - c_out)))
    b_mat = jnp.pad(b.reshape(1, -1), ((0, 0), (0, c_pad - c_out)))
    return w_mat.astype(jnp.float32), b_mat.astype(jnp.float32)


def prepare_params(p, c_pad=128):
    """One-time prep: pad lane/contraction dims to 128 multiples and
    pre-permute fc1 so the conv2->fc flatten is a free reshape."""
    c1w, c1b = _prep_conv_weight(p["conv1_w"], p["conv1_b"], 128, c_pad)
    c2w, c2b = _prep_conv_weight(p["conv2_w"], p["conv2_b"], 256, c_pad)

    # fc1: torch columns are (c, ph, pw); activations arrive as (ph, pw, c_pad).
    w1 = p["fc1_w"].reshape(120, 16, 5, 5)                  # (o, c, ph, pw)
    w1 = jnp.transpose(w1, (2, 3, 1, 0))                    # (ph, pw, c, o)
    w1 = jnp.pad(w1, ((0, 0), (0, 0), (0, c_pad - 16), (0, 128 - 120)))
    w1 = w1.reshape(5 * 5 * c_pad, 128)                     # (3200, 128)
    b1 = jnp.pad(p["fc1_b"].reshape(1, -1), ((0, 0), (0, 128 - 120)))

    w2 = jnp.pad(p["fc2_w"].T, ((0, 128 - 120), (0, 128 - 84)))
    b2 = jnp.pad(p["fc2_b"].reshape(1, -1), ((0, 0), (0, 128 - 84)))
    w3 = jnp.pad(p["fc3_w"].T, ((0, 128 - 84), (0, 128 - 10)))
    b3 = jnp.pad(p["fc3_b"].reshape(1, -1), ((0, 0), (0, 128 - 10)))

    return {
        "conv1_w": c1w, "conv1_b": c1b,
        "conv2_w": c2w, "conv2_b": c2b,
        "fc1_w": w1.astype(jnp.float32), "fc1_b": b1.astype(jnp.float32),
        "fc2_w": w2.astype(jnp.float32), "fc2_b": b2.astype(jnp.float32),
        "fc3_w": w3.astype(jnp.float32), "fc3_b": b3.astype(jnp.float32),
    }


# ---------------------------------------------------------------------------
# Forward pass (matches torch Net.forward semantics)
# ---------------------------------------------------------------------------

def net_forward(pp, x_nchw):
    """pp = prepare_params(init_params(...)), x_nchw: (N, 3, 32, 32)."""
    x = jnp.transpose(x_nchw, (0, 2, 3, 1)).astype(jnp.float32)   # -> NHWC
    n = x.shape[0]

    # conv1 + ReLU + pool : (N,32,32,3) -> (N,14,14,128) (chan 0..5 real)
    y = conv_relu_pool(x, pp["conv1_w"], pp["conv1_b"], 5)
    # conv2 + ReLU + pool : (N,14,14,6) -> (N,5,5,128)   (chan 0..15 real)
    y = conv_relu_pool(y[..., :6], pp["conv2_w"], pp["conv2_b"], 5)

    # Free flatten (padded channels fold into fc1's zero-padded rows).
    flat = y.reshape(n, 5 * 5 * 128)                              # (N, 3200)

    # Fused FC head.
    return fc_head(flat, pp["fc1_w"], pp["fc1_b"], pp["fc2_w"], pp["fc2_b"],
                   pp["fc3_w"], pp["fc3_b"])                      # (N, 10)


# ---------------------------------------------------------------------------
# Pure-JAX reference (PyTorch semantics) for correctness checking
# ---------------------------------------------------------------------------

def net_reference(params, x_nchw):
    hi = jax.lax.Precision.HIGHEST
    x = x_nchw.astype(jnp.float32)

    def conv(x, w, b):
        y = jax.lax.conv_general_dilated(
            x, w, (1, 1), "VALID",
            dimension_numbers=("NCHW", "OIHW", "NCHW"), precision=hi)
        return jax.nn.relu(y + b.reshape(1, -1, 1, 1))

    def pool(x):
        return jax.lax.reduce_window(x, -jnp.inf, jax.lax.max,
                                     (1, 1, 2, 2), (1, 1, 2, 2), "VALID")

    y = pool(conv(x, params["conv1_w"], params["conv1_b"]))
    y = pool(conv(y, params["conv2_w"], params["conv2_b"]))
    y = y.reshape(y.shape[0], -1)                          # torch (C,H,W) order
    y = jax.nn.relu(jnp.dot(y, params["fc1_w"].T, precision=hi) + params["fc1_b"])
    y = jax.nn.relu(jnp.dot(y, params["fc2_w"].T, precision=hi) + params["fc2_b"])
    return jnp.dot(y, params["fc3_w"].T, precision=hi) + params["fc3_b"]


if __name__ == "__main__":
    key = jax.random.PRNGKey(0)
    pkey, xkey = jax.random.split(key)
    params = init_params(pkey)
    prepped = prepare_params(params)                       # one-time weight prep
    x = jax.random.normal(xkey, (2, 3, 32, 32), jnp.float32)   # NCHW CIFAR size

    out = jax.block_until_ready(jax.jit(net_forward)(prepped, x))
    assert out.shape == (2, 10) and out.dtype == jnp.float32

    ref = jax.block_until_ready(net_reference(params, x))
    assert jnp.allclose(out, ref, rtol=1e-3, atol=1e-3), (
        f"mismatch vs reference, max abs diff {jnp.max(jnp.abs(out - ref))}")

    print("KERNEL_OK")
</pallas_src>

<mosaic_0001>
module attributes {stable_mosaic.version = 11 : i64} {
  func.func @_conv_pool_kernel(%arg0: i32, %arg1: memref<4x392x128xf32, #tpu.memory_space<vmem>>, %arg2: memref<128x128xf32, #tpu.memory_space<vmem>>, %arg3: memref<1x128xf32, #tpu.memory_space<vmem>>, %arg4: memref<392x128xf32, #tpu.memory_space<vmem>>) attributes {dimension_semantics = [#tpu.dimension_semantics<parallel>], iteration_bounds = array<i64: 1>, scalar_prefetch = 0 : i64, scratch_operands = 0 : i64, tpu.core_type = #tpu.core_type<tc>, window_params = [{transform_indices = @transform_0, window_bounds = array<i64: 4, 392, 128>}, {pipeline_mode = #tpu.pipeline_mode<synchronous>, transform_indices = @transform_1, window_bounds = array<i64: 128, 128>}, {pipeline_mode = #tpu.pipeline_mode<synchronous>, transform_indices = @transform_2, window_bounds = array<i64: 1, 128>}, {transform_indices = @transform_3, window_bounds = array<i64: 392, 128>}]} {
    %c0 = arith.constant 0 : index
    %c0_0 = arith.constant 0 : index
    %0 = vector.load %arg2[%c0, %c0_0] : memref<128x128xf32, #tpu.memory_space<vmem>>, vector<128x128xf32>
    %c0_1 = arith.constant 0 : index
    %c0_2 = arith.constant 0 : index
    %1 = vector.load %arg3[%c0_1, %c0_2] : memref<1x128xf32, #tpu.memory_space<vmem>>, vector<1x128xf32>
    %c0_3 = arith.constant 0 : index
    %c0_4 = arith.constant 0 : index
    %c0_5 = arith.constant 0 : index
    %2 = vector.load %arg1[%c0_3, %c0_4, %c0_5] : memref<4x392x128xf32, #tpu.memory_space<vmem>>, vector<1x392x128xf32>
    %3 = vector.shape_cast %2 : vector<1x392x128xf32> to vector<392x128xf32>
    %cst = arith.constant dense<0.000000e+00> : vector<392x128xf32>
    %4 = tpu.matmul %3, %0, %cst {dimension_numbers = #tpu.dot_dimension_numbers<[1], [0], [0], [1], [0, 0, 1, 1], [], []>} : vector<392x128xf32>, vector<128x128xf32>, vector<392x128xf32> -> vector<392x128xf32>
    %5 = vector.broadcast %1 : vector<1x128xf32> to vector<392x128xf32>
    %6 = arith.addf %4, %5 : vector<392x128xf32>
    %cst_6 = arith.constant 0.000000e+00 : f32
    %7 = vector.broadcast %cst_6 : f32 to vector<392x128xf32>
    %8 = arith.maximumf %6, %7 : vector<392x128xf32>
    %c1 = arith.constant 1 : index
    %c0_7 = arith.constant 0 : index
    %c0_8 = arith.constant 0 : index
    %9 = vector.load %arg1[%c1, %c0_7, %c0_8] : memref<4x392x128xf32, #tpu.memory_space<vmem>>, vector<1x392x128xf32>
    %10 = vector.shape_cast %9 : vector<1x392x128xf32> to vector<392x128xf32>
    %cst_9 = arith.constant dense<0.000000e+00> : vector<392x128xf32>
    %11 = tpu.matmul %10, %0, %cst_9 {dimension_numbers = #tpu.dot_dimension_numbers<[1], [0], [0], [1], [0, 0, 1, 1], [], []>} : vector<392x128xf32>, vector<128x128xf32>, vector<392x128xf32> -> vector<392x128xf32>
    %12 = vector.broadcast %1 : vector<1x128xf32> to vector<392x128xf32>
    %13 = arith.addf %11, %12 : vector<392x128xf32>
    %cst_10 = arith.constant 0.000000e+00 : f32
    %14 = vector.broadcast %cst_10 : f32 to vector<392x128xf32>
    %15 = arith.maximumf %13, %14 : vector<392x128xf32>
    %16 = arith.maximumf %8, %15 : vector<392x128xf32>
    %c2 = arith.constant 2 : index
    %c0_11 = arith.constant 0 : index
    %c0_12 = arith.constant 0 : index
    %17 = vector.load %arg1[%c2, %c0_11, %c0_12] : memref<4x392x128xf32, #tpu.memory_space<vmem>>, vector<1x392x128xf32>
    %18 = vector.shape_cast %17 : vector<1x392x128xf32> to vector<392x128xf32>
    %cst_13 = arith.constant dense<0.000000e+00> : vector<392x128xf32>
    %19 = tpu.matmul %18, %0, %cst_13 {dimension_numbers = #tpu.dot_dimension_numbers<[1], [0], [0], [1], [0, 0, 1, 1], [], []>} : vector<392x128xf32>, vector<128x128xf32>, vector<392x128xf32> -> vector<392x128xf32>
    %20 = vector.broadcast %1 : vector<1x128xf32> to vector<392x128xf32>
    %21 = arith.addf %19, %20 : vector<392x128xf32>
    %cst_14 = arith.constant 0.000000e+00 : f32
    %22 = vector.broadcast %cst_14 : f32 to vector<392x128xf32>
    %23 = arith.maximumf %21, %22 : vector<392x128xf32>
    %24 = arith.maximumf %16, %23 : vector<392x128xf32>
    %c3 = arith.constant 3 : index
    %c0_15 = arith.constant 0 : index
    %c0_16 = arith.constant 0 : index
    %25 = vector.load %arg1[%c3, %c0_15, %c0_16] : memref<4x392x128xf32, #tpu.memory_space<vmem>>, vector<1x392x128xf32>
    %26 = vector.shape_cast %25 : vector<1x392x128xf32> to vector<392x128xf32>
    %cst_17 = arith.constant dense<0.000000e+00> : vector<392x128xf32>
    %27 = tpu.matmul %26, %0, %cst_17 {dimension_numbers = #tpu.dot_dimension_numbers<[1], [0], [0], [1], [0, 0, 1, 1], [], []>} : vector<392x128xf32>, vector<128x128xf32>, vector<392x128xf32> -> vector<392x128xf32>
    %28 = vector.broadcast %1 : vector<1x128xf32> to vector<392x128xf32>
    %29 = arith.addf %27, %28 : vector<392x128xf32>
    %cst_18 = arith.constant 0.000000e+00 : f32
    %30 = vector.broadcast %cst_18 : f32 to vector<392x128xf32>
    %31 = arith.maximumf %29, %30 : vector<392x128xf32>
    %32 = arith.maximumf %24, %31 : vector<392x128xf32>
    %c0_19 = arith.constant 0 : index
    %c0_20 = arith.constant 0 : index
    %33 = vector.load %arg4[%c0_19, %c0_20] : memref<392x128xf32, #tpu.memory_space<vmem>>, vector<392x128xf32>
    tpu.vector_store %arg4[%c0_19, %c0_20], %32 {strides = array<i32>} : memref<392x128xf32, #tpu.memory_space<vmem>>, vector<392x128xf32>,
    return
  }
  func.func @transform_0(%arg0: i32) -> (i32, i32, i32) {
    %c0_i32 = arith.constant 0 : i32
    %c0_i32_0 = arith.constant 0 : i32
    %c0_i32_1 = arith.constant 0 : i32
    return %c0_i32, %arg0, %c0_i32_0 : i32, i32, i32
  }
  func.func @transform_1(%arg0: i32) -> (i32, i32) {
    %c0_i32 = arith.constant 0 : i32
    %c0_i32_0 = arith.constant 0 : i32
    %c0_i32_1 = arith.constant 0 : i32
    return %c0_i32, %c0_i32_0 : i32, i32
  }
  func.func @transform_2(%arg0: i32) -> (i32, i32) {
    %c0_i32 = arith.constant 0 : i32
    %c0_i32_0 = arith.constant 0 : i32
    %c0_i32_1 = arith.constant 0 : i32
    return %c0_i32, %c0_i32_0 : i32, i32
  }
  func.func @transform_3(%arg0: i32) -> (i32, i32) {
    %c0_i32 = arith.constant 0 : i32
    %c0_i32_0 = arith.constant 0 : i32
    return %arg0, %c0_i32 : i32, i32
  }
}

module attributes {stable_mosaic.version = 11 : i64} {
  func.func @_conv_pool_kernel(%arg0: i32, %arg1: memref<4x56x256xf32, #tpu.memory_space<vmem>>, %arg2: memref<256x128xf32, #tpu.memory_space<vmem>>, %arg3: memref<1x128xf32, #tpu.memory_space<vmem>>, %arg4: memref<56x128xf32, #tpu.memory_space<vmem>>) attributes {dimension_semantics = [#tpu.dimension_semantics<parallel>], iteration_bounds = array<i64: 1>, scalar_prefetch = 0 : i64, scratch_operands = 0 : i64, tpu.core_type = #tpu.core_type<tc>, window_params = [{transform_indices = @transform_0, window_bounds = array<i64: 4, 56, 256>}, {pipeline_mode = #tpu.pipeline_mode<synchronous>, transform_indices = @transform_1, window_bounds = array<i64: 256, 128>}, {pipeline_mode = #tpu.pipeline_mode<synchronous>, transform_indices = @transform_2, window_bounds = array<i64: 1, 128>}, {transform_indices = @transform_3, window_bounds = array<i64: 56, 128>}]} {
    %c0 = arith.constant 0 : index
    %c0_0 = arith.constant 0 : index
    %0 = vector.load %arg2[%c0, %c0_0] : memref<256x128xf32, #tpu.memory_space<vmem>>, vector<256x128xf32>
    %c0_1 = arith.constant 0 : index
    %c0_2 = arith.constant 0 : index
    %1 = vector.load %arg3[%c0_1, %c0_2] : memref<1x128xf32, #tpu.memory_space<vmem>>, vector<1x128xf32>
    %c0_3 = arith.constant 0 : index
    %c0_4 = arith.constant 0 : index
    %c0_5 = arith.constant 0 : index
    %2 = vector.load %arg1[%c0_3, %c0_4, %c0_5] : memref<4x56x256xf32, #tpu.memory_space<vmem>>, vector<1x56x256xf32>
    %3 = vector.shape_cast %2 : vector<1x56x256xf32> to vector<56x256xf32>
    %cst = arith.constant dense<0.000000e+00> : vector<56x128xf32>
    %4 = tpu.matmul %3, %0, %cst {dimension_numbers = #tpu.dot_dimension_numbers<[1], [0], [0], [1], [0, 0, 1, 1], [], []>} : vector<56x256xf32>, vector<256x128xf32>, vector<56x128xf32> -> vector<56x128xf32>
    %5 = vector.broadcast %1 : vector<1x128xf32> to vector<56x128xf32>
    %6 = arith.addf %4, %5 : vector<56x128xf32>
    %cst_6 = arith.constant 0.000000e+00 : f32
    %7 = vector.broadcast %cst_6 : f32 to vector<56x128xf32>
    %8 = arith.maximumf %6, %7 : vector<56x128xf32>
    %c1 = arith.constant 1 : index
    %c0_7 = arith.constant 0 : index
    %c0_8 = arith.constant 0 : index
    %9 = vector.load %arg1[%c1, %c0_7, %c0_8] : memref<4x56x256xf32, #tpu.memory_space<vmem>>, vector<1x56x256xf32>
    %10 = vector.shape_cast %9 : vector<1x56x256xf32> to vector<56x256xf32>
    %cst_9 = arith.constant dense<0.000000e+00> : vector<56x128xf32>
    %11 = tpu.matmul %10, %0, %cst_9 {dimension_numbers = #tpu.dot_dimension_numbers<[1], [0], [0], [1], [0, 0, 1, 1], [], []>} : vector<56x256xf32>, vector<256x128xf32>, vector<56x128xf32> -> vector<56x128xf32>
    %12 = vector.broadcast %1 : vector<1x128xf32> to vector<56x128xf32>
    %13 = arith.addf %11, %12 : vector<56x128xf32>
    %cst_10 = arith.constant 0.000000e+00 : f32
    %14 = vector.broadcast %cst_10 : f32 to vector<56x128xf32>
    %15 = arith.maximumf %13, %14 : vector<56x128xf32>
    %16 = arith.maximumf %8, %15 : vector<56x128xf32>
    %c2 = arith.constant 2 : index
    %c0_11 = arith.constant 0 : index
    %c0_12 = arith.constant 0 : index
    %17 = vector.load %arg1[%c2, %c0_11, %c0_12] : memref<4x56x256xf32, #tpu.memory_space<vmem>>, vector<1x56x256xf32>
    %18 = vector.shape_cast %17 : vector<1x56x256xf32> to vector<56x256xf32>
    %cst_13 = arith.constant dense<0.000000e+00> : vector<56x128xf32>
    %19 = tpu.matmul %18, %0, %cst_13 {dimension_numbers = #tpu.dot_dimension_numbers<[1], [0], [0], [1], [0, 0, 1, 1], [], []>} : vector<56x256xf32>, vector<256x128xf32>, vector<56x128xf32> -> vector<56x128xf32>
    %20 = vector.broadcast %1 : vector<1x128xf32> to vector<56x128xf32>
    %21 = arith.addf %19, %20 : vector<56x128xf32>
    %cst_14 = arith.constant 0.000000e+00 : f32
    %22 = vector.broadcast %cst_14 : f32 to vector<56x128xf32>
    %23 = arith.maximumf %21, %22 : vector<56x128xf32>
    %24 = arith.maximumf %16, %23 : vector<56x128xf32>
    %c3 = arith.constant 3 : index
    %c0_15 = arith.constant 0 : index
    %c0_16 = arith.constant 0 : index
    %25 = vector.load %arg1[%c3, %c0_15, %c0_16] : memref<4x56x256xf32, #tpu.memory_space<vmem>>, vector<1x56x256xf32>
    %26 = vector.shape_cast %25 : vector<1x56x256xf32> to vector<56x256xf32>
    %cst_17 = arith.constant dense<0.000000e+00> : vector<56x128xf32>
    %27 = tpu.matmul %26, %0, %cst_17 {dimension_numbers = #tpu.dot_dimension_numbers<[1], [0], [0], [1], [0, 0, 1, 1], [], []>} : vector<56x256xf32>, vector<256x128xf32>, vector<56x128xf32> -> vector<56x128xf32>
    %28 = vector.broadcast %1 : vector<1x128xf32> to vector<56x128xf32>
    %29 = arith.addf %27, %28 : vector<56x128xf32>
    %cst_18 = arith.constant 0.000000e+00 : f32
    %30 = vector.broadcast %cst_18 : f32 to vector<56x128xf32>
    %31 = arith.maximumf %29, %30 : vector<56x128xf32>
    %32 = arith.maximumf %24, %31 : vector<56x128xf32>
    %c0_19 = arith.constant 0 : index
    %c0_20 = arith.constant 0 : index
    %33 = vector.load %arg4[%c0_19, %c0_20] : memref<56x128xf32, #tpu.memory_space<vmem>>, vector<56x128xf32>
    tpu.vector_store %arg4[%c0_19, %c0_20], %32 {strides = array<i32>} : memref<56x128xf32, #tpu.memory_space<vmem>>, vector<56x128xf32>,
    return
  }
  func.func @transform_0(%arg0: i32) -> (i32, i32, i32) {
    %c0_i32 = arith.constant 0 : i32
    %c0_i32_0 = arith.constant 0 : i32
    %c0_i32_1 = arith.constant 0 : i32
    return %c0_i32, %arg0, %c0_i32_0 : i32, i32, i32
  }
  func.func @transform_1(%arg0: i32) -> (i32, i32) {
    %c0_i32 = arith.constant 0 : i32
    %c0_i32_0 = arith.constant 0 : i32
    %c0_i32_1 = arith.constant 0 : i32
    return %c0_i32, %c0_i32_0 : i32, i32
  }
  func.func @transform_2(%arg0: i32) -> (i32, i32) {
    %c0_i32 = arith.constant 0 : i32
    %c0_i32_0 = arith.constant 0 : i32
    %c0_i32_1 = arith.constant 0 : i32
    return %c0_i32, %c0_i32_0 : i32, i32
  }
  func.func @transform_3(%arg0: i32) -> (i32, i32) {
    %c0_i32 = arith.constant 0 : i32
    %c0_i32_0 = arith.constant 0 : i32
    return %arg0, %c0_i32 : i32, i32
  }
}

module attributes {stable_mosaic.version = 11 : i64} {
  func.func @_fc_head_kernel(%arg0: i32, %arg1: memref<8x3200xf32, #tpu.memory_space<vmem>>, %arg2: memref<3200x128xf32, #tpu.memory_space<vmem>>, %arg3: memref<1x128xf32, #tpu.memory_space<vmem>>, %arg4: memref<128x128xf32, #tpu.memory_space<vmem>>, %arg5: memref<1x128xf32, #tpu.memory_space<vmem>>, %arg6: memref<128x128xf32, #tpu.memory_space<vmem>>, %arg7: memref<1x128xf32, #tpu.memory_space<vmem>>, %arg8: memref<8x128xf32, #tpu.memory_space<vmem>>) attributes {dimension_semantics = [#tpu.dimension_semantics<parallel>], iteration_bounds = array<i64: 1>, scalar_prefetch = 0 : i64, scratch_operands = 0 : i64, tpu.core_type = #tpu.core_type<tc>, window_params = [{transform_indices = @transform_0, window_bounds = array<i64: 8, 3200>}, {pipeline_mode = #tpu.pipeline_mode<synchronous>, transform_indices = @transform_1, window_bounds = array<i64: 3200, 128>}, {pipeline_mode = #tpu.pipeline_mode<synchronous>, transform_indices = @transform_2, window_bounds = array<i64: 1, 128>}, {pipeline_mode = #tpu.pipeline_mode<synchronous>, transform_indices = @transform_3, window_bounds = array<i64: 128, 128>}, {pipeline_mode = #tpu.pipeline_mode<synchronous>, transform_indices = @transform_4, window_bounds = array<i64: 1, 128>}, {pipeline_mode = #tpu.pipeline_mode<synchronous>, transform_indices = @transform_5, window_bounds = array<i64: 128, 128>}, {pipeline_mode = #tpu.pipeline_mode<synchronous>, transform_indices = @transform_6, window_bounds = array<i64: 1, 128>}, {transform_indices = @transform_7, window_bounds = array<i64: 8, 128>}]} {
    %c0 = arith.constant 0 : index
    %c0_0 = arith.constant 0 : index
    %0 = vector.load %arg1[%c0, %c0_0] : memref<8x3200xf32, #tpu.memory_space<vmem>>, vector<8x3200xf32>
    %c0_1 = arith.constant 0 : index
    %c0_2 = arith.constant 0 : index
    %1 = vector.load %arg2[%c0_1, %c0_2] : memref<3200x128xf32, #tpu.memory_space<vmem>>, vector<3200x128xf32>
    %cst = arith.constant dense<0.000000e+00> : vector<8x128xf32>
    %2 = tpu.matmul %0, %1, %cst {dimension_numbers = #tpu.dot_dimension_numbers<[1], [0], [0], [1], [0, 0, 1, 1], [], []>} : vector<8x3200xf32>, vector<3200x128xf32>, vector<8x128xf32> -> vector<8x128xf32>
    %c0_3 = arith.constant 0 : index
    %c0_4 = arith.constant 0 : index
    %3 = vector.load %arg3[%c0_3, %c0_4] : memref<1x128xf32, #tpu.memory_space<vmem>>, vector<1x128xf32>
    %4 = vector.broadcast %3 : vector<1x128xf32> to vector<8x128xf32>
    %5 = arith.addf %2, %4 : vector<8x128xf32>
    %cst_5 = arith.constant 0.000000e+00 : f32
    %6 = vector.broadcast %cst_5 : f32 to vector<8x128xf32>
    %7 = arith.maximumf %5, %6 : vector<8x128xf32>
    %c0_6 = arith.constant 0 : index
    %c0_7 = arith.constant 0 : index
    %8 = vector.load %arg4[%c0_6, %c0_7] : memref<128x128xf32, #tpu.memory_space<vmem>>, vector<128x128xf32>
    %cst_8 = arith.constant dense<0.000000e+00> : vector<8x128xf32>
    %9 = tpu.matmul %7, %8, %cst_8 {dimension_numbers = #tpu.dot_dimension_numbers<[1], [0], [0], [1], [0, 0, 1, 1], [], []>} : vector<8x128xf32>, vector<128x128xf32>, vector<8x128xf32> -> vector<8x128xf32>
    %c0_9 = arith.constant 0 : index
    %c0_10 = arith.constant 0 : index
    %10 = vector.load %arg5[%c0_9, %c0_10] : memref<1x128xf32, #tpu.memory_space<vmem>>, vector<1x128xf32>
    %11 = vector.broadcast %10 : vector<1x128xf32> to vector<8x128xf32>
    %12 = arith.addf %9, %11 : vector<8x128xf32>
    %cst_11 = arith.constant 0.000000e+00 : f32
    %13 = vector.broadcast %cst_11 : f32 to vector<8x128xf32>
    %14 = arith.maximumf %12, %13 : vector<8x128xf32>
    %c0_12 = arith.constant 0 : index
    %c0_13 = arith.constant 0 : index
    %15 = vector.load %arg6[%c0_12, %c0_13] : memref<128x128xf32, #tpu.memory_space<vmem>>, vector<128x128xf32>
    %cst_14 = arith.constant dense<0.000000e+00> : vector<8x128xf32>
    %16 = tpu.matmul %14, %15, %cst_14 {dimension_numbers = #tpu.dot_dimension_numbers<[1], [0], [0], [1], [0, 0, 1, 1], [], []>} : vector<8x128xf32>, vector<128x128xf32>, vector<8x128xf32> -> vector<8x128xf32>
    %c0_15 = arith.constant 0 : index
    %c0_16 = arith.constant 0 : index
    %17 = vector.load %arg7[%c0_15, %c0_16] : memref<1x128xf32, #tpu.memory_space<vmem>>, vector<1x128xf32>
    %18 = vector.broadcast %17 : vector<1x128xf32> to vector<8x128xf32>
    %19 = arith.addf %16, %18 : vector<8x128xf32>
    %c0_17 = arith.constant 0 : index
    %c0_18 = arith.constant 0 : index
    %20 = vector.load %arg8[%c0_17, %c0_18] : memref<8x128xf32, #tpu.memory_space<vmem>>, vector<8x128xf32>
    tpu.vector_store %arg8[%c0_17, %c0_18], %19 {strides = array<i32>} : memref<8x128xf32, #tpu.memory_space<vmem>>, vector<8x128xf32>,
    return
  }
  func.func @transform_0(%arg0: i32) -> (i32, i32) {
    %c0_i32 = arith.constant 0 : i32
    %c0_i32_0 = arith.constant 0 : i32
    return %arg0, %c0_i32 : i32, i32
  }
  func.func @transform_1(%arg0: i32) -> (i32, i32) {
    %c0_i32 = arith.constant 0 : i32
    %c0_i32_0 = arith.constant 0 : i32
    %c0_i32_1 = arith.constant 0 : i32
    return %c0_i32, %c0_i32_0 : i32, i32
  }
  func.func @transform_2(%arg0: i32) -> (i32, i32) {
    %c0_i32 = arith.constant 0 : i32
    %c0_i32_0 = arith.constant 0 : i32
    %c0_i32_1 = arith.constant 0 : i32
    return %c0_i32, %c0_i32_0 : i32, i32
  }
  func.func @transform_3(%arg0: i32) -> (i32, i32) {
    %c0_i32 = arith.constant 0 : i32
    %c0_i32_0 = arith.constant 0 : i32
    %c0_i32_1 = arith.constant 0 : i32
    return %c0_i32, %c0_i32_0 : i32, i32
  }
  func.func @transform_4(%arg0: i32) -> (i32, i32) {
    %c0_i32 = arith.constant 0 : i32
    %c0_i32_0 = arith.constant 0 : i32
    %c0_i32_1 = arith.constant 0 : i32
    return %c0_i32, %c0_i32_0 : i32, i32
  }
  func.func @transform_5(%arg0: i32) -> (i32, i32) {
    %c0_i32 = arith.constant 0 : i32
    %c0_i32_0 = arith.constant 0 : i32
    %c0_i32_1 = arith.constant 0 : i32
    return %c0_i32, %c0_i32_0 : i32, i32
  }
  func.func @transform_6(%arg0: i32) -> (i32, i32) {
    %c0_i32 = arith.constant 0 : i32
    %c0_i32_0 = arith.constant 0 : i32
    %c0_i32_1 = arith.constant 0 : i32
    return %c0_i32, %c0_i32_0 : i32, i32
  }
  func.func @transform_7(%arg0: i32) -> (i32, i32) {
    %c0_i32 = arith.constant 0 : i32
    %c0_i32_0 = arith.constant 0 : i32
    return %arg0, %c0_i32 : i32, i32
  }
}

</mosaic_0001>

<bundles_post_ra>
// kernel: net_forward.3
= control target key start
LH: loop header
LB: loop body
LE: loop exit
PB: predicated region body
PF: predicated region fallthrough
CT: control target
= control target key end

     0   :  { %v3097_v0 = vmov 0.0|0.0   ;;  %vm3098_vm0 = vmmov 0   ;;  %v3099_v6 = vmov 0.0   ;;  %s4733_s1 = inlined_call_operand.vmem [shape: f32[128,128], index: 1, kind: input, shape index: {}]   ;;  %s4734_s0 = inlined_call_operand.vmem [shape: f32[4,392,128], index: 0, kind: input, shape index: {}]   ;;  %s4735_s2 = inlined_call_operand.vmem [shape: f32[1,128], index: 2, kind: input, shape index: {}]   ;;  %s4736_s3 = inlined_call_operand.vmem [shape: f32[392,128], index: 3, kind: output, shape index: {}]  }
   0x1   :  { %2996 = vmatprep.subr.bf16.mxu0 %v3097_v0  ;;  %v14_v1 = vld [vmem:[%s4733_s1] sm:$0xff]  ;;  %v15_v2 = vld [vmem:[%s4733_s1 + $0x8] sm:$0xff]  ;;  %3020 = vmatprep.subr.bf16.mxu1 %v3097_v0  ;;  %v16_v3 = vld [vmem:[%s4733_s1 + $0x10] sm:$0xff] }
   0x2   :  { %v3131_v4 = vpack.c.bf16 %v15_v2, %v14_v1  ;;  %v17_v5 = vld [vmem:[%s4733_s1 + $0x18] sm:$0xff]  ;;  %2312 = vmatprep.mubr.msk.f32.mxu0 %vm3098_vm0, %v3099_v6  ;;  %2491 = vmatprep.mubr.msk.f32.mxu1 %vm3098_vm0, %v3099_v6  ;;  %v18_v8 = vld [vmem:[%s4733_s1 + $0x20] sm:$0xff]  ;;  %v19_v9 = vld [vmem:[%s4733_s1 + $0x28] sm:$0xff] }
   0x3   :  { %v3142_v7 = vpack.c.bf16 %v17_v5, %v16_v3  ;;  %v3154_v10 = vpack.c.bf16 %v19_v9, %v18_v8  ;;  %v20_v11 = vld [vmem:[%s4733_s1 + $0x30] sm:$0xff]  ;;  %v21_v12 = vld [vmem:[%s4733_s1 + $0x38] sm:$0xff]  ;;  %v22_v14 = vld [vmem:[%s4733_s1 + $0x40] sm:$0xff] }
   0x4   :  { %2998 = vmatpush3.bf16.msra.mxu0 %v3131_v4  ;;  %3022 = vmatpush3.bf16.msra.mxu1 %v3131_v4  ;;  %v3166_v13 = vpack.c.bf16 %v21_v12, %v20_v11  ;;  %v23_v15 = vld [vmem:[%s4733_s1 + $0x48] sm:$0xff]  ;;  %v24_v17 = vld [vmem:[%s4733_s1 + $0x50] sm:$0xff]  ;;  %v25_v18 = vld [vmem:[%s4733_s1 + $0x58] sm:$0xff] }
   0x5   :  { %2999 = vmatprep.subr.bf16.mxu0 %v3097_v0  ;;  %3023 = vmatprep.subr.bf16.mxu1 %v3097_v0  ;;  %v3178_v16 = vpack.c.bf16 %v23_v15, %v22_v14  ;;  %v3190_v19 = vpack.c.bf16 %v25_v18, %v24_v17  ;;  %v26_v20 = vld [vmem:[%s4733_s1 + $0x60] sm:$0xff]  ;;  %v27_v21 = vld [vmem:[%s4733_s1 + $0x68] sm:$0xff]  ;;  %v28_v23 = vld [vmem:[%s4733_s1 + $0x70] sm:$0xff] }
   0x6   :  { %v3202_v22 = vpack.c.bf16 %v27_v21, %v26_v20  ;;  %v29_v24 = vld [vmem:[%s4733_s1 + $0x78] sm:$0xff]  ;;  %v31_v26 = vld [vmem:[%s4734_s0] sm:$0xff]  ;;  %v1873_v27 = vld [vmem:[%s4734_s0 + $0x188] sm:$0xff] }
   0x7   :  { %v3214_v25 = vpack.c.bf16 %v29_v24, %v28_v23  ;;  %v32_v28 = vld [vmem:[%s4734_s0 + $0x8] sm:$0xff]  ;;  %v1874_v29 = vld [vmem:[%s4734_s0 + $0x190] sm:$0xff]  ;;  %v1875_v31 = vld [vmem:[%s4734_s0 + $0x198] sm:$0xff] }
   0x8   :  { %3001 = vmatpush3.bf16.msra.mxu0 %v3142_v7  ;;  %3025 = vmatpush3.bf16.msra.mxu1 %v3142_v7  ;;  %v33_v30 = vld [vmem:[%s4734_s0 + $0x10] sm:$0xff]  ;;  %v34_v32 = vld [vmem:[%s4734_s0 + $0x18] sm:$0xff]  ;;  %v1876_v33 = vld [vmem:[%s4734_s0 + $0x1a0] sm:$0xff] }
   0x9   :  { %3002 = vmatprep.subr.bf16.mxu0 %v3097_v0  ;;  %3026 = vmatprep.subr.bf16.mxu1 %v3097_v0  ;;  %v35_v34 = vld [vmem:[%s4734_s0 + $0x20] sm:$0xff]  ;;  %v1877_v35 = vld [vmem:[%s4734_s0 + $0x1a8] sm:$0xff]  ;;  %v1878_v37 = vld [vmem:[%s4734_s0 + $0x1b0] sm:$0xff] }
   0xa   :  { %v36_v36 = vld [vmem:[%s4734_s0 + $0x28] sm:$0xff]  ;;  %v37_v38 = vld [vmem:[%s4734_s0 + $0x30] sm:$0xff]  ;;  %v1879_v39 = vld [vmem:[%s4734_s0 + $0x1b8] sm:$0xff] }
   0xb   :  { %v38_v40 = vld [vmem:[%s4734_s0 + $0x38] sm:$0xff]  ;;  %v1880_v41 = vld [vmem:[%s4734_s0 + $0x1c0] sm:$0xff]  ;;  %v1881_v43 = vld [vmem:[%s4734_s0 + $0x1c8] sm:$0xff] }
   0xc   :  { %3004 = vmatpush3.bf16.msra.mxu0 %v3154_v10  ;;  %3028 = vmatpush3.bf16.msra.mxu1 %v3154_v10  ;;  %v39_v42 = vld [vmem:[%s4734_s0 + $0x40] sm:$0xff]  ;;  %v40_v44 = vld [vmem:[%s4734_s0 + $0x48] sm:$0xff]  ;;  %v1882_v45 = vld [vmem:[%s4734_s0 + $0x1d0] sm:$0xff] }
   0xd   :  { %3005 = vmatprep.subr.bf16.mxu0 %v3097_v0  ;;  %3029 = vmatprep.subr.bf16.mxu1 %v3097_v0  ;;  %v41_v46 = vld [vmem:[%s4734_s0 + $0x50] sm:$0xff]  ;;  %v1883_v47 = vld [vmem:[%s4734_s0 + $0x1d8] sm:$0xff]  ;;  %v1884_v49 = vld [vmem:[%s4734_s0 + $0x1e0] sm:$0xff] }
   0xe   :  { %v42_v48 = vld [vmem:[%s4734_s0 + $0x58] sm:$0xff]  ;;  %v43_v50 = vld [vmem:[%s4734_s0 + $0x60] sm:$0xff]  ;;  %v1885_v51 = vld [vmem:[%s4734_s0 + $0x1e8] sm:$0xff] }
   0xf   :  { %v44_v52 = vld [vmem:[%s4734_s0 + $0x68] sm:$0xff]  ;;  %v1886_v53 = vld [vmem:[%s4734_s0 + $0x1f0] sm:$0xff]  ;;  %v1887_v55 = vld [vmem:[%s4734_s0 + $0x1f8] sm:$0xff] }
  0x10   :  { %3007 = vmatpush3.bf16.msra.mxu0 %v3166_v13  ;;  %3031 = vmatpush3.bf16.msra.mxu1 %v3166_v13  ;;  %v45_v54 = vld [vmem:[%s4734_s0 + $0x70] sm:$0xff]  ;;  %v46_v56 = vld [vmem:[%s4734_s0 + $0x78] sm:$0xff]  ;;  %v1888_v57 = vld [vmem:[%s4734_s0 + $0x200] sm:$0xff] }
  0x11   :  { %3008 = vmatprep.subr.bf16.mxu0 %v3097_v0  ;;  %3032 = vmatprep.subr.bf16.mxu1 %v3097_v0  ;;  %v47_v58 = vld [vmem:[%s4734_s0 + $0x80] sm:$0xff]  ;;  %v1889_v59 = vld [vmem:[%s4734_s0 + $0x208] sm:$0xff]  ;;  %v1890_v61 = vld [vmem:[%s4734_s0 + $0x210] sm:$0xff] }
  0x12   :  { %v48_v60 = vld [vmem:[%s4734_s0 + $0x88] sm:$0xff]  ;;  %v49_v62 = vld [vmem:[%s4734_s0 + $0x90] sm:$0xff]  ;;  %v1891_v63 = vld [vmem:[%s4734_s0 + $0x218] sm:$0xff] }
  0x13   :  { %v1892_v1 = vld [vmem:[%s4734_s0 + $0x220] sm:$0xff]  ;;  %v1893_v3 = vld [vmem:[%s4734_s0 + $0x228] sm:$0xff]  ;;  %v1894_v5 = vld [vmem:[%s4734_s0 + $0x230] sm:$0xff] }
  0x14   :  { %3010 = vmatpush3.bf16.msra.mxu0 %v3178_v16  ;;  %3034 = vmatpush3.bf16.msra.mxu1 %v3178_v16  ;;  %v51_v2 = vld [vmem:[%s4734_s0 + $0xa0] sm:$0xff]  ;;  %v1895_v8 = vld [vmem:[%s4734_s0 + $0x238] sm:$0xff]  ;;  %v1897_v12 = vld [vmem:[%s4734_s0 + $0x248] sm:$0xff] }
  0x15   :  { %3011 = vmatprep.subr.bf16.mxu0 %v3097_v0  ;;  %3035 = vmatprep.subr.bf16.mxu1 %v3097_v0  ;;  %v54_v9 = vld [vmem:[%s4734_s0 + $0xb8] sm:$0xff]  ;;  %v55_v11 = vld [vmem:[%s4734_s0 + $0xc0] sm:$0xff]  ;;  %v1898_v14 = vld [vmem:[%s4734_s0 + $0x250] sm:$0xff] }
  0x16   :  { %v57_v15 = vld [vmem:[%s4734_s0 + $0xd0] sm:$0xff]  ;;  %v58_v17 = vld [vmem:[%s4734_s0 + $0xd8] sm:$0xff]  ;;  %v1900_v18 = vld [vmem:[%s4734_s0 + $0x260] sm:$0xff] }
  0x17   :  { %v1901_v20 = vld [vmem:[%s4734_s0 + $0x268] sm:$0xff]  ;;  %v61_v23 = vld [vmem:[%s4734_s0 + $0xf0] sm:$0xff]  ;;  %v1903_v24 = vld [vmem:[%s4734_s0 + $0x278] sm:$0xff] }
  0x18   :  { %3013 = vmatpush3.bf16.msra.mxu0 %v3190_v19  ;;  %3037 = vmatpush3.bf16.msra.mxu1 %v3190_v19  ;;  %v60_v21 = vld [vmem:[%s4734_s0 + $0xe8] sm:$0xff] }
  0x19   :  { %3014 = vmatprep.subr.bf16.mxu0 %v3097_v0  ;;  %3038 = vmatprep.subr.bf16.mxu1 %v3097_v0 }
  0x1c   :  { %3016 = vmatpush3.bf16.msra.mxu0 %v3202_v22  ;;  %3040 = vmatpush3.bf16.msra.mxu1 %v3202_v22 }
  0x1d   :  { %3017 = vmatprep.subr.bf16.mxu0 %v3097_v0  ;;  %3041 = vmatprep.subr.bf16.mxu1 %v3097_v0 }
  0x20   :  { %3019 = vmatpush3.bf16.msra.mxu0 %v3214_v25  ;;  %3043 = vmatpush3.bf16.msra.mxu1 %v3214_v25 }
  0x21   :  { %3044 = vmatprep.subr.bf16.mxu0 %v3097_v0  ;;  %3068 = vmatprep.subr.bf16.mxu1 %v3097_v0 }
  0x23   :  { %2313 = vmatmul.mubr.f32.vlgmr.msra.gmra.mrb[0].mxu0 %v31_v26  ;;  %2492 = vmatmul.mubr.f32.vlgmr.msra.gmra.mrb[0].mxu1 %v1873_v27  ;;  %v1904_v26 = vld [vmem:[%s4734_s0 + $0x280] sm:$0xff] }
  0x24   :  { %3046 = vmatpush3.bf16.msra.mxu0 %v3131_v4  ;;  %2315 = vmatprep.mubr.msk.f32.mxu0 %vm3098_vm0, %v3099_v6  ;;  %v63_v27 = vld [vmem:[%s4734_s0 + $0x100] sm:$0xff] }
  0x25   :  { %3070 = vmatpush3.bf16.msra.mxu1 %v3131_v4  ;;  %2494 = vmatprep.mubr.msk.f32.mxu1 %vm3098_vm0, %v3099_v6  ;;  %v52_v4 = vld [vmem:[%s4734_s0 + $0xa8] sm:$0xff] }
  0x26   :  { %3047 = vmatprep.subr.bf16.mxu0 %v3097_v0  ;;  %3071 = vmatprep.subr.bf16.mxu1 %v3097_v0 }
  0x27   :  { %2316 = vmatmul.mubr.f32.gmra.mrb[2].mxu0 %v32_v28  ;;  %2495 = vmatmul.mubr.f32.gmra.mrb[2].mxu1 %v1874_v29  ;;  %v1905_v28 = vld [vmem:[%s4734_s0 + $0x288] sm:$0xff] }
  0x28   :  { %2318 = vmatprep.mubr.msk.f32.mxu0 %vm3098_vm0, %v3099_v6  ;;  %2497 = vmatprep.mubr.msk.f32.mxu1 %vm3098_vm0, %v3099_v6  ;;  %v64_v29 = vld [vmem:[%s4734_s0 + $0x108] sm:$0xff] }
  0x29   :  { %3049 = vmatpush3.bf16.msra.mxu0 %v3142_v7  ;;  %3073 = vmatpush3.bf16.msra.mxu1 %v3142_v7  ;;  %v53_v7 = vld [vmem:[%s4734_s0 + $0xb0] sm:$0xff] }
  0x2a   :  { %3050 = vmatprep.subr.bf16.mxu0 %v3097_v0  ;;  %3074 = vmatprep.subr.bf16.mxu1 %v3097_v0 }
  0x2b   :  { %2319 = vmatmul.mubr.f32.gmra.mrb[4].mxu0 %v33_v30  ;;  %2498 = vmatmul.mubr.f32.gmra.mrb[4].mxu1 %v1875_v31  ;;  %v1906_v30 = vld [vmem:[%s4734_s0 + $0x290] sm:$0xff] }
  0x2c   :  { %2321 = vmatprep.mubr.msk.f32.mxu0 %vm3098_vm0, %v3099_v6  ;;  %2500 = vmatprep.mubr.msk.f32.mxu1 %vm3098_vm0, %v3099_v6  ;;  %v65_v31 = vld [vmem:[%s4734_s0 + $0x110] sm:$0xff] }
  0x2d   :  { %3052 = vmatpush3.bf16.msra.mxu0 %v3154_v10  ;;  %3076 = vmatpush3.bf16.msra.mxu1 %v3154_v10  ;;  %v1896_v10 = vld [vmem:[%s4734_s0 + $0x240] sm:$0xff] }
  0x2e   :  { %3053 = vmatprep.subr.bf16.mxu0 %v3097_v0  ;;  %3077 = vmatprep.subr.bf16.mxu1 %v3097_v0 }
  0x2f   :  { %2322 = vmatmul.mubr.f32.gmra.mrb[6].mxu0 %v34_v32  ;;  %2501 = vmatmul.mubr.f32.gmra.mrb[6].mxu1 %v1876_v33  ;;  %v1907_v32 = vld [vmem:[%s4734_s0 + $0x298] sm:$0xff] }
  0x30   :  { %2324 = vmatprep.mubr.msk.f32.mxu0 %vm3098_vm0, %v3099_v6  ;;  %2503 = vmatprep.mubr.msk.f32.mxu1 %vm3098_vm0, %v3099_v6  ;;  %v66_v33 = vld [vmem:[%s4734_s0 + $0x118] sm:$0xff] }
  0x31   :  { %3055 = vmatpush3.bf16.msra.mxu0 %v3166_v13  ;;  %3079 = vmatpush3.bf16.msra.mxu1 %v3166_v13  ;;  %v56_v13 = vld [vmem:[%s4734_s0 + $0xc8] sm:$0xff] }
  0x32   :  { %3056 = vmatprep.subr.bf16.mxu0 %v3097_v0  ;;  %3080 = vmatprep.subr.bf16.mxu1 %v3097_v0 }
  0x33   :  { %2325 = vmatmul.mubr.f32.gmra.mrb[8].mxu0 %v35_v34  ;;  %2504 = vmatmul.mubr.f32.gmra.mrb[8].mxu1 %v1877_v35  ;;  %v1908_v34 = vld [vmem:[%s4734_s0 + $0x2a0] sm:$0xff] }
  0x34   :  { %2327 = vmatprep.mubr.msk.f32.mxu0 %vm3098_vm0, %v3099_v6  ;;  %2506 = vmatprep.mubr.msk.f32.mxu1 %vm3098_vm0, %v3099_v6  ;;  %v67_v35 = vld [vmem:[%s4734_s0 + $0x120] sm:$0xff] }
  0x35   :  { %3058 = vmatpush3.bf16.msra.mxu0 %v3178_v16  ;;  %3082 = vmatpush3.bf16.msra.mxu1 %v3178_v16  ;;  %v1899_v16 = vld [vmem:[%s4734_s0 + $0x258] sm:$0xff] }
  0x36   :  { %3059 = vmatprep.subr.bf16.mxu0 %v3097_v0  ;;  %3083 = vmatprep.subr.bf16.mxu1 %v3097_v0 }
  0x37   :  { %2328 = vmatmul.mubr.f32.gmra.mrb[10].mxu0 %v36_v36  ;;  %2507 = vmatmul.mubr.f32.gmra.mrb[10].mxu1 %v1878_v37  ;;  %v1909_v36 = vld [vmem:[%s4734_s0 + $0x2a8] sm:$0xff] }
  0x38   :  { %2330 = vmatprep.mubr.msk.f32.mxu0 %vm3098_vm0, %v3099_v6  ;;  %2509 = vmatprep.mubr.msk.f32.mxu1 %vm3098_vm0, %v3099_v6  ;;  %v68_v37 = vld [vmem:[%s4734_s0 + $0x128] sm:$0xff] }
  0x39   :  { %3061 = vmatpush3.bf16.msra.mxu0 %v3190_v19  ;;  %3085 = vmatpush3.bf16.msra.mxu1 %v3190_v19  ;;  %v59_v19 = vld [vmem:[%s4734_s0 + $0xe0] sm:$0xff] }
  0x3a   :  { %3062 = vmatprep.subr.bf16.mxu0 %v3097_v0  ;;  %3086 = vmatprep.subr.bf16.mxu1 %v3097_v0 }
  0x3b   :  { %2331 = vmatmul.mubr.f32.gmra.mrb[12].mxu0 %v37_v38  ;;  %2510 = vmatmul.mubr.f32.gmra.mrb[12].mxu1 %v1879_v39  ;;  %v1910_v38 = vld [vmem:[%s4734_s0 + $0x2b0] sm:$0xff] }
  0x3c   :  { %2333 = vmatprep.mubr.msk.f32.mxu0 %vm3098_vm0, %v3099_v6  ;;  %2512 = vmatprep.mubr.msk.f32.mxu1 %vm3098_vm0, %v3099_v6  ;;  %v69_v39 = vld [vmem:[%s4734_s0 + $0x130] sm:$0xff] }
  0x3d   :  { %3064 = vmatpush3.bf16.msra.mxu0 %v3202_v22  ;;  %3088 = vmatpush3.bf16.msra.mxu1 %v3202_v22  ;;  %v1902_v22 = vld [vmem:[%s4734_s0 + $0x270] sm:$0xff] }
  0x3e   :  { %3065 = vmatprep.subr.bf16.mxu0 %v3097_v0  ;;  %3089 = vmatprep.subr.bf16.mxu1 %v3097_v0  ;;  %v50_v0 = vld [vmem:[%s4734_s0 + $0x98] sm:$0xff] }
  0x3f   :  { %2334 = vmatmul.mubr.f32.gmra.mrb[14].mxu0 %v38_v40  ;;  %2513 = vmatmul.mubr.f32.gmra.mrb[14].mxu1 %v1880_v41  ;;  %v1911_v40 = vld [vmem:[%s4734_s0 + $0x2b8] sm:$0xff] }
  0x40   :  { %2336 = vmatprep.mubr.msk.f32.mxu0 %vm3098_vm0, %v3099_v6  ;;  %2515 = vmatprep.mubr.msk.f32.mxu1 %vm3098_vm0, %v3099_v6  ;;  %v70_v41 = vld [vmem:[%s4734_s0 + $0x138] sm:$0xff] }
  0x41   :  { %3067 = vmatpush3.bf16.msra.mxu0 %v3214_v25  ;;  %3091 = vmatpush3.bf16.msra.mxu1 %v3214_v25  ;;  %v62_v25 = vld [vmem:[%s4734_s0 + $0xf8] sm:$0xff] }
  0x43   :  { %2337 = vmatmul.mubr.f32.gmra.mrb[16].mxu0 %v39_v42  ;;  %2516 = vmatmul.mubr.f32.gmra.mrb[16].mxu1 %v1881_v43  ;;  %v1912_v42 = vld [vmem:[%s4734_s0 + $0x2c0] sm:$0xff] }
  0x44   :  { %2339 = vmatprep.mubr.msk.f32.mxu0 %vm3098_vm0, %v3099_v6  ;;  %2518 = vmatprep.mubr.msk.f32.mxu1 %vm3098_vm0, %v3099_v6  ;;  %v71_v43 = vld [vmem:[%s4734_s0 + $0x140] sm:$0xff] }
  0x47   :  { %2340 = vmatmul.mubr.f32.gmra.mrb[18].mxu0 %v40_v44  ;;  %2519 = vmatmul.mubr.f32.gmra.mrb[18].mxu1 %v1882_v45  ;;  %v1913_v44 = vld [vmem:[%s4734_s0 + $0x2c8] sm:$0xff] }
  0x48   :  { %2342 = vmatprep.mubr.msk.f32.mxu0 %vm3098_vm0, %v3099_v6  ;;  %2521 = vmatprep.mubr.msk.f32.mxu1 %vm3098_vm0, %v3099_v6  ;;  %v72_v45 = vld [vmem:[%s4734_s0 + $0x148] sm:$0xff] }
  0x4b   :  { %2343 = vmatmul.mubr.f32.gmra.mrb[20].mxu0 %v41_v46  ;;  %2522 = vmatmul.mubr.f32.gmra.mrb[20].mxu1 %v1883_v47  ;;  %v1914_v46 = vld [vmem:[%s4734_s0 + $0x2d0] sm:$0xff] }
  0x4c   :  { %2345 = vmatprep.mubr.msk.f32.mxu0 %vm3098_vm0, %v3099_v6  ;;  %2524 = vmatprep.mubr.msk.f32.mxu1 %vm3098_vm0, %v3099_v6  ;;  %v73_v47 = vld [vmem:[%s4734_s0 + $0x150] sm:$0xff] }
  0x4f   :  { %2346 = vmatmul.mubr.f32.gmra.mrb[22].mxu0 %v42_v48  ;;  %2525 = vmatmul.mubr.f32.gmra.mrb[22].mxu1 %v1884_v49  ;;  %v1915_v48 = vld [vmem:[%s4734_s0 + $0x2d8] sm:$0xff] }
  0x50   :  { %2348 = vmatprep.mubr.msk.f32.mxu0 %vm3098_vm0, %v3099_v6  ;;  %2527 = vmatprep.mubr.msk.f32.mxu1 %vm3098_vm0, %v3099_v6  ;;  %v74_v49 = vld [vmem:[%s4734_s0 + $0x158] sm:$0xff] }
  0x53   :  { %2349 = vmatmul.mubr.f32.gmra.mrb[24].mxu0 %v43_v50  ;;  %2528 = vmatmul.mubr.f32.gmra.mrb[24].mxu1 %v1885_v51  ;;  %v1916_v50 = vld [vmem:[%s4734_s0 + $0x2e0] sm:$0xff] }
  0x54   :  { %2351 = vmatprep.mubr.msk.f32.mxu0 %vm3098_vm0, %v3099_v6  ;;  %2530 = vmatprep.mubr.msk.f32.mxu1 %vm3098_vm0, %v3099_v6  ;;  %v75_v51 = vld [vmem:[%s4734_s0 + $0x160] sm:$0xff] }
  0x57   :  { %2352 = vmatmul.mubr.f32.gmra.mrb[26].mxu0 %v44_v52  ;;  %2531 = vmatmul.mubr.f32.gmra.mrb[26].mxu1 %v1886_v53  ;;  %v1917_v52 = vld [vmem:[%s4734_s0 + $0x2e8] sm:$0xff] }
  0x58   :  { %2354 = vmatprep.mubr.msk.f32.mxu0 %vm3098_vm0, %v3099_v6  ;;  %2533 = vmatprep.mubr.msk.f32.mxu1 %vm3098_vm0, %v3099_v6  ;;  %v76_v53 = vld [vmem:[%s4734_s0 + $0x168] sm:$0xff] }
  0x5b   :  { %2355 = vmatmul.mubr.f32.gmra.mrb[28].mxu0 %v45_v54  ;;  %2534 = vmatmul.mubr.f32.gmra.mrb[28].mxu1 %v1887_v55  ;;  %v1918_v54 = vld [vmem:[%s4734_s0 + $0x2f0] sm:$0xff] }
  0x5c   :  { %2357 = vmatprep.mubr.msk.f32.mxu0 %vm3098_vm0, %v3099_v6  ;;  %2536 = vmatprep.mubr.msk.f32.mxu1 %vm3098_vm0, %v3099_v6  ;;  %v77_v55 = vld [vmem:[%s4734_s0 + $0x170] sm:$0xff] }
  0x5f   :  { %2358 = vmatmul.mubr.f32.gmra.mrb[30].mxu0 %v46_v56  ;;  %2537 = vmatmul.mubr.f32.gmra.mrb[30].mxu1 %v1888_v57  ;;  %v1919_v56 = vld [vmem:[%s4734_s0 + $0x2f8] sm:$0xff] }
  0x60   :  { %2360 = vmatprep.mubr.msk.f32.mxu0 %vm3098_vm0, %v3099_v6  ;;  %2539 = vmatprep.mubr.msk.f32.mxu1 %vm3098_vm0, %v3099_v6  ;;  %v78_v57 = vld [vmem:[%s4734_s0 + $0x178] sm:$0xff] }
  0x63   :  { %2361 = vmatmul.mubr.f32.gmra.mrb[32].mxu0 %v47_v58  ;;  %2540 = vmatmul.mubr.f32.gmra.mrb[32].mxu1 %v1889_v59  ;;  %v1920_v58 = vld [vmem:[%s4734_s0 + $0x300] sm:$0xff] }
  0x64   :  { %2363 = vmatprep.mubr.msk.f32.mxu0 %vm3098_vm0, %v3099_v6  ;;  %2542 = vmatprep.mubr.msk.f32.mxu1 %vm3098_vm0, %v3099_v6  ;;  %v79_v59 = vld [vmem:[%s4734_s0 + $0x180] sm:$0xff] }
  0x67   :  { %2364 = vmatmul.mubr.f32.gmra.mrb[34].mxu0 %v48_v60  ;;  %2543 = vmatmul.mubr.f32.gmra.mrb[34].mxu1 %v1890_v61  ;;  %v1921_v60 = vld [vmem:[%s4734_s0 + $0x308] sm:$0xff]  ;;  %v1922_v61 = vld [vmem:[%s4734_s0 + $0x310] sm:$0xff] }
  0x68   :  { %2366 = vmatprep.mubr.msk.f32.mxu0 %vm3098_vm0, %v3099_v6  ;;  %2545 = vmatprep.mubr.msk.f32.mxu1 %vm3098_vm0, %v3099_v6 }
  0x6b   :  { %2367 = vmatmul.mubr.f32.gmra.mrb[36].mxu0 %v49_v62  ;;  %2546 = vmatmul.mubr.f32.gmra.mrb[36].mxu1 %v1891_v63  ;;  %v1971_v62 = vld [vmem:[%s4734_s0 + $0x498] sm:$0xff] }
  0x6c   :  { %2369 = vmatprep.mubr.msk.f32.mxu0 %vm3098_vm0, %v3099_v6  ;;  %2548 = vmatprep.mubr.msk.f32.mxu1 %vm3098_vm0, %v3099_v6  ;;  %v1923_v63 = vld [vmem:[%s4734_s0 + $0x318] sm:$0xff] }
  0x6f   :  { %2370 = vmatmul.mubr.f32.gmra.mrb[38].mxu0 %v50_v0  ;;  %2549 = vmatmul.mubr.f32.gmra.mrb[38].mxu1 %v1892_v1  ;;  %v1972_v0 = vld [vmem:[%s4734_s0 + $0x4a0] sm:$0xff] }
  0x70   :  { %2372 = vmatprep.mubr.msk.f32.mxu0 %vm3098_vm0, %v3099_v6  ;;  %2551 = vmatprep.mubr.msk.f32.mxu1 %vm3098_vm0, %v3099_v6  ;;  %v1924_v1 = vld [vmem:[%s4734_s0 + $0x320] sm:$0xff] }
  0x73   :  { %2373 = vmatmul.mubr.f32.gmra.mrb[40].mxu0 %v51_v2  ;;  %2552 = vmatmul.mubr.f32.gmra.mrb[40].mxu1 %v1893_v3  ;;  %v1973_v2 = vld [vmem:[%s4734_s0 + $0x4a8] sm:$0xff] }
  0x74   :  { %2375 = vmatprep.mubr.msk.f32.mxu0 %vm3098_vm0, %v3099_v6  ;;  %2554 = vmatprep.mubr.msk.f32.mxu1 %vm3098_vm0, %v3099_v6  ;;  %v1925_v3 = vld [vmem:[%s4734_s0 + $0x328] sm:$0xff] }
  0x77   :  { %2376 = vmatmul.mubr.f32.gmra.mrb[42].mxu0 %v52_v4  ;;  %2555 = vmatmul.mubr.f32.gmra.mrb[42].mxu1 %v1894_v5  ;;  %v1974_v4 = vld [vmem:[%s4734_s0 + $0x4b0] sm:$0xff]  ;;  %v3781_v5 = vld [vmem:[%s4735_s2] ss:$0 sm:$0xff] }
  0x78   :  { %2378 = vmatprep.mubr.msk.f32.mxu0 %vm3098_vm0, %v3099_v6  ;;  %2557 = vmatprep.mubr.msk.f32.mxu1 %vm3098_vm0, %v3099_v6 }
  0x7b   :  { %2379 = vmatmul.mubr.f32.gmra.mrb[44].mxu0 %v53_v7  ;;  %2558 = vmatmul.mubr.f32.gmra.mrb[44].mxu1 %v1895_v8  ;;  %v1926_v7 = vld [vmem:[%s4734_s0 + $0x330] sm:$0xff]  ;;  %v1975_v8 = vld [vmem:[%s4734_s0 + $0x4b8] sm:$0xff] }
  0x7c   :  { %2381 = vmatprep.mubr.msk.f32.mxu0 %vm3098_vm0, %v3099_v6  ;;  %2560 = vmatprep.mubr.msk.f32.mxu1 %vm3098_vm0, %v3099_v6 }
  0x7f   :  { %2382 = vmatmul.mubr.f32.gmra.mrb[46].mxu0 %v54_v9  ;;  %2561 = vmatmul.mubr.f32.gmra.mrb[46].mxu1 %v1896_v10 }
  0x80   :  { %2384 = vmatprep.mubr.msk.f32.mxu0 %vm3098_vm0, %v3099_v6  ;;  %2563 = vmatprep.mubr.msk.f32.mxu1 %vm3098_vm0, %v3099_v6 }
  0x83   :  { %2385 = vmatmul.mubr.f32.gmra.mrb[48].mxu0 %v55_v11  ;;  %2564 = vmatmul.mubr.f32.gmra.mrb[48].mxu1 %v1897_v12 }
  0x84   :  { %2387 = vmatprep.mubr.msk.f32.mxu0 %vm3098_vm0, %v3099_v6  ;;  %2566 = vmatprep.mubr.msk.f32.mxu1 %vm3098_vm0, %v3099_v6 }
  0x87   :  { %2388 = vmatmul.mubr.f32.gmra.mrb[50].mxu0 %v56_v13  ;;  %2567 = vmatmul.mubr.f32.gmra.mrb[50].mxu1 %v1898_v14 }
  0x88   :  { %2390 = vmatprep.mubr.msk.f32.mxu0 %vm3098_vm0, %v3099_v6  ;;  %2569 = vmatprep.mubr.msk.f32.mxu1 %vm3098_vm0, %v3099_v6 }
  0x8b   :  { %2391 = vmatmul.mubr.f32.gmra.mrb[52].mxu0 %v57_v15  ;;  %2570 = vmatmul.mubr.f32.gmra.mrb[52].mxu1 %v1899_v16  ;;  %v1927_v15 = vld [vmem:[%s4734_s0 + $0x338] sm:$0xff]  ;;  %v1976_v16 = vld [vmem:[%s4734_s0 + $0x4c0] sm:$0xff] }
  0x8c   :  { %2393 = vmatprep.mubr.msk.f32.mxu0 %vm3098_vm0, %v3099_v6  ;;  %2572 = vmatprep.mubr.msk.f32.mxu1 %vm3098_vm0, %v3099_v6 }
  0x8f   :  { %2394 = vmatmul.mubr.f32.gmra.mrb[54].mxu0 %v58_v17  ;;  %2573 = vmatmul.mubr.f32.gmra.mrb[54].mxu1 %v1900_v18 }
  0x90   :  { %2396 = vmatprep.mubr.msk.f32.mxu0 %vm3098_vm0, %v3099_v6  ;;  %2575 = vmatprep.mubr.msk.f32.mxu1 %vm3098_vm0, %v3099_v6 }
  0x93   :  { %2397 = vmatmul.mubr.f32.gmra.mrb[56].mxu0 %v59_v19  ;;  %2576 = vmatmul.mubr.f32.gmra.mrb[56].mxu1 %v1901_v20 }
  0x94   :  { %2399 = vmatprep.mubr.msk.f32.mxu0 %vm3098_vm0, %v3099_v6  ;;  %2578 = vmatprep.mubr.msk.f32.mxu1 %vm3098_vm0, %v3099_v6 }
  0x97   :  { %2400 = vmatmul.mubr.f32.gmra.mrb[58].mxu0 %v60_v21  ;;  %2579 = vmatmul.mubr.f32.gmra.mrb[58].mxu1 %v1902_v22 }
  0x98   :  { %2402 = vmatprep.mubr.msk.f32.mxu0 %vm3098_vm0, %v3099_v6  ;;  %2581 = vmatprep.mubr.msk.f32.mxu1 %vm3098_vm0, %v3099_v6 }
  0x9b   :  { %2403 = vmatmul.mubr.f32.gmra.mrb[60].mxu0 %v61_v23  ;;  %2582 = vmatmul.mubr.f32.gmra.mrb[60].mxu1 %v1903_v24 }
  0x9c   :  { %2405 = vmatprep.mubr.msk.f32.mxu0 %vm3098_vm0, %v3099_v6  ;;  %2584 = vmatprep.mubr.msk.f32.mxu1 %vm3098_vm0, %v3099_v6 }
  0x9f   :  { %2406 = vmatmul.mubr.f32.gmra.mrb[62].mxu0 %v62_v25  ;;  %2585 = vmatmul.mubr.f32.gmra.mrb[62].mxu1 %v1904_v26  ;;  %v1928_v26 = vld [vmem:[%s4734_s0 + $0x340] sm:$0xff] }
  0xa0   :  { %2408 = vmatprep.mubr.msk.f32.mxu0 %vm3098_vm0, %v3099_v6  ;;  %2587 = vmatprep.mubr.msk.f32.mxu1 %vm3098_vm0, %v3099_v6 }
  0xa3   :  { %2409 = vmatmul.mubr.f32.gmra.mrb[64].mxu0 %v63_v27  ;;  %2588 = vmatmul.mubr.f32.gmra.mrb[64].mxu1 %v1905_v28  ;;  %v1977_v27 = vld [vmem:[%s4734_s0 + $0x4c8] sm:$0xff] }
  0xa4   :  { %2411 = vmatprep.mubr.msk.f32.mxu0 %vm3098_vm0, %v3099_v6  ;;  %2590 = vmatprep.mubr.msk.f32.mxu1 %vm3098_vm0, %v3099_v6 }
  0xa7   :  { %2412 = vmatmul.mubr.f32.gmra.mrb[66].mxu0 %v64_v29  ;;  %2591 = vmatmul.mubr.f32.gmra.mrb[66].mxu1 %v1906_v30 }
  0xa8   :  { %2414 = vmatprep.mubr.msk.f32.mxu0 %vm3098_vm0, %v3099_v6  ;;  %2593 = vmatprep.mubr.msk.f32.mxu1 %vm3098_vm0, %v3099_v6 }
  0xab   :  { %2415 = vmatmul.mubr.f32.gmra.mrb[68].mxu0 %v65_v31  ;;  %2594 = vmatmul.mubr.f32.gmra.mrb[68].mxu1 %v1907_v32 }
  0xac   :  { %2417 = vmatprep.mubr.msk.f32.mxu0 %vm3098_vm0, %v3099_v6  ;;  %2596 = vmatprep.mubr.msk.f32.mxu1 %vm3098_vm0, %v3099_v6 }
  0xaf   :  { %2418 = vmatmul.mubr.f32.gmra.mrb[70].mxu0 %v66_v33  ;;  %2597 = vmatmul.mubr.f32.gmra.mrb[70].mxu1 %v1908_v34 }
  0xb0   :  { %2420 = vmatprep.mubr.msk.f32.mxu0 %vm3098_vm0, %v3099_v6  ;;  %2599 = vmatprep.mubr.msk.f32.mxu1 %vm3098_vm0, %v3099_v6 }
  0xb3   :  { %2421 = vmatmul.mubr.f32.gmra.mrb[72].mxu0 %v67_v35  ;;  %2600 = vmatmul.mubr.f32.gmra.mrb[72].mxu1 %v1909_v36 }
  0xb4   :  { %2423 = vmatprep.mubr.msk.f32.mxu0 %vm3098_vm0, %v3099_v6  ;;  %2602 = vmatprep.mubr.msk.f32.mxu1 %vm3098_vm0, %v3099_v6 }
  0xb7   :  { %2424 = vmatmul.mubr.f32.gmra.mrb[74].mxu0 %v68_v37  ;;  %2603 = vmatmul.mubr.f32.gmra.mrb[74].mxu1 %v1910_v38  ;;  %v1929_v37 = vld [vmem:[%s4734_s0 + $0x348] sm:$0xff]  ;;  %v1978_v38 = vld [vmem:[%s4734_s0 + $0x4d0] sm:$0xff] }
  0xb8   :  { %2426 = vmatprep.mubr.msk.f32.mxu0 %vm3098_vm0, %v3099_v6  ;;  %2605 = vmatprep.mubr.msk.f32.mxu1 %vm3098_vm0, %v3099_v6 }
  0xbb   :  { %2427 = vmatmul.mubr.f32.gmra.mrb[76].mxu0 %v69_v39  ;;  %2606 = vmatmul.mubr.f32.gmra.mrb[76].mxu1 %v1911_v40 }
  0xbc   :  { %2429 = vmatprep.mubr.msk.f32.mxu0 %vm3098_vm0, %v3099_v6  ;;  %2608 = vmatprep.mubr.msk.f32.mxu1 %vm3098_vm0, %v3099_v6 }
  0xbf   :  { %2430 = vmatmul.mubr.f32.gmra.mrb[78].mxu0 %v70_v41  ;;  %2609 = vmatmul.mubr.f32.gmra.mrb[78].mxu1 %v1912_v42 }
  0xc0   :  { %2432 = vmatprep.mubr.msk.f32.mxu0 %vm3098_vm0, %v3099_v6  ;;  %2611 = vmatprep.mubr.msk.f32.mxu1 %vm3098_vm0, %v3099_v6 }
  0xc3   :  { %2433 = vmatmul.mubr.f32.gmra.mrb[80].mxu0 %v71_v43  ;;  %2612 = vmatmul.mubr.f32.gmra.mrb[80].mxu1 %v1913_v44 }
  0xc4   :  { %2435 = vmatprep.mubr.msk.f32.mxu0 %vm3098_vm0, %v3099_v6  ;;  %2614 = vmatprep.mubr.msk.f32.mxu1 %vm3098_vm0, %v3099_v6 }
  0xc7   :  { %2436 = vmatmul.mubr.f32.gmra.mrb[82].mxu0 %v72_v45  ;;  %2615 = vmatmul.mubr.f32.gmra.mrb[82].mxu1 %v1914_v46 }
  0xc8   :  { %2438 = vmatprep.mubr.msk.f32.mxu0 %vm3098_vm0, %v3099_v6  ;;  %2617 = vmatprep.mubr.msk.f32.mxu1 %vm3098_vm0, %v3099_v6 }
  0xcb   :  { %2439 = vmatmul.mubr.f32.gmra.mrb[84].mxu0 %v73_v47  ;;  %2618 = vmatmul.mubr.f32.gmra.mrb[84].mxu1 %v1915_v48  ;;  %v1930_v48 = vld [vmem:[%s4734_s0 + $0x350] sm:$0xff] }
  0xcc   :  { %2441 = vmatprep.mubr.msk.f32.mxu0 %vm3098_vm0, %v3099_v6  ;;  %2620 = vmatprep.mubr.msk.f32.mxu1 %vm3098_vm0, %v3099_v6 }
  0xcf   :  { %2442 = vmatmul.mubr.f32.gmra.mrb[86].mxu0 %v74_v49  ;;  %2621 = vmatmul.mubr.f32.gmra.mrb[86].mxu1 %v1916_v50  ;;  %v1979_v49 = vld [vmem:[%s4734_s0 + $0x4d8] sm:$0xff] }
  0xd0   :  { %2444 = vmatprep.mubr.msk.f32.mxu0 %vm3098_vm0, %v3099_v6  ;;  %2623 = vmatprep.mubr.msk.f32.mxu1 %vm3098_vm0, %v3099_v6 }
  0xd3   :  { %2445 = vmatmul.mubr.f32.gmra.mrb[88].mxu0 %v75_v51  ;;  %2624 = vmatmul.mubr.f32.gmra.mrb[88].mxu1 %v1917_v52 }
  0xd4   :  { %2447 = vmatprep.mubr.msk.f32.mxu0 %vm3098_vm0, %v3099_v6  ;;  %2626 = vmatprep.mubr.msk.f32.mxu1 %vm3098_vm0, %v3099_v6 }
  0xd7   :  { %2448 = vmatmul.mubr.f32.gmra.mrb[90].mxu0 %v76_v53  ;;  %2627 = vmatmul.mubr.f32.gmra.mrb[90].mxu1 %v1918_v54 }
  0xd8   :  { %2450 = vmatprep.mubr.msk.f32.mxu0 %vm3098_vm0, %v3099_v6  ;;  %2629 = vmatprep.mubr.msk.f32.mxu1 %vm3098_vm0, %v3099_v6 }
  0xdb   :  { %2451 = vmatmul.mubr.f32.gmra.mrb[92].mxu0 %v77_v55  ;;  %2630 = vmatmul.mubr.f32.gmra.mrb[92].mxu1 %v1919_v56 }
  0xdc   :  { %2453 = vmatprep.mubr.msk.f32.mxu0 %vm3098_vm0, %v3099_v6  ;;  %2632 = vmatprep.mubr.msk.f32.mxu1 %vm3098_vm0, %v3099_v6 }
  0xdf   :  { %2454 = vmatmul.mubr.f32.gmra.mrb[94].mxu0 %v78_v57  ;;  %2633 = vmatmul.mubr.f32.gmra.mrb[94].mxu1 %v1920_v58 }
  0xe0   :  { %2456 = vmatprep.mubr.msk.f32.mxu0 %vm3098_vm0, %v3099_v6  ;;  %2635 = vmatprep.mubr.msk.f32.mxu1 %vm3098_vm0, %v3099_v6 }
  0xe3   :  { %2457 = vmatmul.mubr.f32.gmra.mrb[96].mxu0 %v79_v59  ;;  %2636 = vmatmul.mubr.f32.gmra.mrb[96].mxu1 %v1921_v60  ;;  %v1931_v59 = vld [vmem:[%s4734_s0 + $0x358] sm:$0xff]  ;;  %v1980_v60 = vld [vmem:[%s4734_s0 + $0x4e0] sm:$0xff] }
  0xe4   :  { %2670 = vmatprep.mubr.msk.f32.mxu0 %vm3098_vm0, %v3099_v6  ;;  %2849 = vmatprep.mubr.msk.f32.mxu1 %vm3098_vm0, %v3099_v6 }
  0xe7   :  { %2671 = vmatmul.mubr.f32.vlgmr.msra.gmra.mrb[98].mxu0 %v1922_v61  ;;  %2850 = vmatmul.mubr.f32.vlgmr.msra.gmra.mrb[98].mxu1 %v1971_v62 }
  0xe8   :  { %2673 = vmatprep.mubr.msk.f32.mxu0 %vm3098_vm0, %v3099_v6  ;;  %2852 = vmatprep.mubr.msk.f32.mxu1 %vm3098_vm0, %v3099_v6 }
  0xeb   :  { %2674 = vmatmul.mubr.f32.gmra.mrb[100].mxu0 %v1923_v63  ;;  %2853 = vmatmul.mubr.f32.gmra.mrb[100].mxu1 %v1972_v0 }
  0xec   :  { %2676 = vmatprep.mubr.msk.f32.mxu0 %vm3098_vm0, %v3099_v6  ;;  %2855 = vmatprep.mubr.msk.f32.mxu1 %vm3098_vm0, %v3099_v6 }
  0xef   :  { %2677 = vmatmul.mubr.f32.gmra.mrb[102].mxu0 %v1924_v1  ;;  %2856 = vmatmul.mubr.f32.gmra.mrb[102].mxu1 %v1973_v2 }
  0xf0   :  { %2679 = vmatprep.mubr.msk.f32.mxu0 %vm3098_vm0, %v3099_v6  ;;  %2858 = vmatprep.mubr.msk.f32.mxu1 %vm3098_vm0, %v3099_v6 }
  0xf3   :  { %2680 = vmatmul.mubr.f32.gmra.mrb[104].mxu0 %v1925_v3  ;;  %2859 = vmatmul.mubr.f32.gmra.mrb[104].mxu1 %v1974_v4 }
  0xf4   :  { %2682 = vmatprep.mubr.msk.f32.mxu0 %vm3098_vm0, %v3099_v6  ;;  %2861 = vmatprep.mubr.msk.f32.mxu1 %vm3098_vm0, %v3099_v6 }
  0xf6   :  { %v152_v9 = vpop.f32.mrb[0].mxu0  ;;  %v561_v10 = vpop.f32.mrb[0].mxu1 }
  0xf7   :  { %v153_v11 = vadd.f32 %v3781_v5, %v152_v9  ;;  %v2314_v12 = vpop.f32.mrb[1].mxu0  ;;  %v562_v13 = vadd.f32 %v3781_v5, %v561_v10  ;;  %2683 = vmatmul.mubr.f32.gmra.mrb[106].mxu0 %v1926_v7  ;;  %v2493_v14 = vpop.f32.mrb[1].mxu1  ;;  %2862 = vmatmul.mubr.f32.gmra.mrb[106].mxu1 %v1975_v8  ;;  %v1932_v8 = vld [vmem:[%s4734_s0 + $0x360] sm:$0xff]  ;;  %v1981_v9 = vld [vmem:[%s4734_s0 + $0x4e8] sm:$0xff] }
  0xf8   :  { %2685 = vmatprep.mubr.msk.f32.mxu0 %vm3098_vm0, %v3099_v6  ;;  %2864 = vmatprep.mubr.msk.f32.mxu1 %vm3098_vm0, %v3099_v6 }
  0xf9   :  { %v396_v17 = vmax.f32 %v153_v11, 0.0  ;;  %v805_v18 = vmax.f32 %v562_v13, 0.0 }
  0xfa   :  { %v157_v19 = vpop.f32.mrb[2].mxu0  ;;  %v566_v20 = vpop.f32.mrb[2].mxu1 }
  0xfb   :  { %v3805_v21 = vmax.f32 %v396_v17, %v805_v18  ;;  %v158_v22 = vadd.f32 %v3781_v5, %v157_v19  ;;  %v2317_v23 = vpop.f32.mrb[3].mxu0  ;;  %v567_v24 = vadd.f32 %v3781_v5, %v566_v20  ;;  %2686 = vmatmul.mubr.f32.gmra.mrb[108].mxu0 %v1927_v15  ;;  %v2496_v25 = vpop.f32.mrb[3].mxu1  ;;  %2865 = vmatmul.mubr.f32.gmra.mrb[108].mxu1 %v1976_v16  ;;  %v1933_v19 = vld [vmem:[%s4734_s0 + $0x368] sm:$0xff]  ;;  %v1982_v20 = vld [vmem:[%s4734_s0 + $0x4f0] sm:$0xff] }
  0xfc   :  { %2688 = vmatprep.mubr.msk.f32.mxu0 %vm3098_vm0, %v3099_v6  ;;  %2867 = vmatprep.mubr.msk.f32.mxu1 %vm3098_vm0, %v3099_v6 }
  0xfd   :  { %v397_v28 = vmax.f32 %v158_v22, 0.0  ;;  %v806_v29 = vmax.f32 %v567_v24, 0.0 }
  0xfe   :  { %v162_v30 = vpop.f32.mrb[4].mxu0  ;;  %v571_v31 = vpop.f32.mrb[4].mxu1 }
  0xff   :  { %v3819_v32 = vmax.f32 %v397_v28, %v806_v29  ;;  %v163_v33 = vadd.f32 %v3781_v5, %v162_v30  ;;  %v2320_v34 = vpop.f32.mrb[5].mxu0  ;;  %v572_v35 = vadd.f32 %v3781_v5, %v571_v31  ;;  %2689 = vmatmul.mubr.f32.gmra.mrb[110].mxu0 %v1928_v26  ;;  %v2499_v36 = vpop.f32.mrb[5].mxu1  ;;  %2868 = vmatmul.mubr.f32.gmra.mrb[110].mxu1 %v1977_v27  ;;  %v1934_v31 = vld [vmem:[%s4734_s0 + $0x370] sm:$0xff] }
 0x100   :  { %2691 = vmatprep.mubr.msk.f32.mxu0 %vm3098_vm0, %v3099_v6  ;;  %2870 = vmatprep.mubr.msk.f32.mxu1 %vm3098_vm0, %v3099_v6 }
 0x101   :  { %v398_v39 = vmax.f32 %v163_v33, 0.0  ;;  %v807_v40 = vmax.f32 %v572_v35, 0.0  ;;  %v1983_v33 = vld [vmem:[%s4734_s0 + $0x4f8] sm:$0xff] }
 0x102   :  { %v167_v41 = vpop.f32.mrb[6].mxu0  ;;  %v576_v42 = vpop.f32.mrb[6].mxu1 }
 0x103   :  { %v3833_v43 = vmax.f32 %v398_v39, %v807_v40  ;;  %v168_v44 = vadd.f32 %v3781_v5, %v167_v41  ;;  %v2323_v45 = vpop.f32.mrb[7].mxu0  ;;  %v577_v46 = vadd.f32 %v3781_v5, %v576_v42  ;;  %2692 = vmatmul.mubr.f32.gmra.mrb[112].mxu0 %v1929_v37  ;;  %v2502_v47 = vpop.f32.mrb[7].mxu1  ;;  %2871 = vmatmul.mubr.f32.gmra.mrb[112].mxu1 %v1978_v38 }
 0x104   :  { %2694 = vmatprep.mubr.msk.f32.mxu0 %vm3098_vm0, %v3099_v6  ;;  %2873 = vmatprep.mubr.msk.f32.mxu1 %vm3098_vm0, %v3099_v6  ;;  %v1984_v45 = vld [vmem:[%s4734_s0 + $0x500] sm:$0xff] }
 0x105   :  { %v399_v50 = vmax.f32 %v168_v44, 0.0  ;;  %v808_v51 = vmax.f32 %v577_v46, 0.0  ;;  %v1935_v44 = vld [vmem:[%s4734_s0 + $0x378] sm:$0xff] }
 0x106   :  { %v172_v52 = vpop.f32.mrb[8].mxu0  ;;  %v581_v53 = vpop.f32.mrb[8].mxu1 }
 0x107   :  { %v3847_v54 = vmax.f32 %v399_v50, %v808_v51  ;;  %v173_v55 = vadd.f32 %v3781_v5, %v172_v52  ;;  %v2326_v56 = vpop.f32.mrb[9].mxu0  ;;  %v582_v57 = vadd.f32 %v3781_v5, %v581_v53  ;;  %2695 = vmatmul.mubr.f32.gmra.mrb[114].mxu0 %v1930_v48  ;;  %v2505_v58 = vpop.f32.mrb[9].mxu1  ;;  %2874 = vmatmul.mubr.f32.gmra.mrb[114].mxu1 %v1979_v49 }
 0x108   :  { %2697 = vmatprep.mubr.msk.f32.mxu0 %vm3098_vm0, %v3099_v6  ;;  %2876 = vmatprep.mubr.msk.f32.mxu1 %vm3098_vm0, %v3099_v6  ;;  %v1936_v56 = vld [vmem:[%s4734_s0 + $0x380] sm:$0xff] }
 0x109   :  { %v400_v61 = vmax.f32 %v173_v55, 0.0  ;;  %v809_v62 = vmax.f32 %v582_v57, 0.0  ;;  %v1985_v57 = vld [vmem:[%s4734_s0 + $0x508] sm:$0xff] }
 0x10a   :  { %v177_v63 = vpop.f32.mrb[10].mxu0  ;;  %v586_v0 = vpop.f32.mrb[10].mxu1 }
 0x10b   :  { %v3861_v1 = vmax.f32 %v400_v61, %v809_v62  ;;  %v178_v2 = vadd.f32 %v3781_v5, %v177_v63  ;;  %v2329_v3 = vpop.f32.mrb[11].mxu0  ;;  %v587_v4 = vadd.f32 %v3781_v5, %v586_v0  ;;  %2698 = vmatmul.mubr.f32.gmra.mrb[116].mxu0 %v1931_v59  ;;  %v2508_v7 = vpop.f32.mrb[11].mxu1  ;;  %2877 = vmatmul.mubr.f32.gmra.mrb[116].mxu1 %v1980_v60 }
 0x10c   :  { %2700 = vmatprep.mubr.msk.f32.mxu0 %vm3098_vm0, %v3099_v6  ;;  %2879 = vmatprep.mubr.msk.f32.mxu1 %vm3098_vm0, %v3099_v6  ;;  %v1986_v7 = vld [vmem:[%s4734_s0 + $0x510] sm:$0xff] }
 0x10d   :  { %v401_v10 = vmax.f32 %v178_v2, 0.0  ;;  %v810_v11 = vmax.f32 %v587_v4, 0.0  ;;  %v1937_v4 = vld [vmem:[%s4734_s0 + $0x388] sm:$0xff] }
 0x10e   :  { %v182_v12 = vpop.f32.mrb[12].mxu0  ;;  %v591_v13 = vpop.f32.mrb[12].mxu1 }
 0x10f   :  { %v3875_v14 = vmax.f32 %v401_v10, %v810_v11  ;;  %v183_v15 = vadd.f32 %v3781_v5, %v182_v12  ;;  %v2332_v16 = vpop.f32.mrb[13].mxu0  ;;  %v592_v17 = vadd.f32 %v3781_v5, %v591_v13  ;;  %2701 = vmatmul.mubr.f32.gmra.mrb[118].mxu0 %v1932_v8  ;;  %v2511_v18 = vpop.f32.mrb[13].mxu1  ;;  %2880 = vmatmul.mubr.f32.gmra.mrb[118].mxu1 %v1981_v9 }
 0x110   :  { %2703 = vmatprep.mubr.msk.f32.mxu0 %vm3098_vm0, %v3099_v6  ;;  %2882 = vmatprep.mubr.msk.f32.mxu1 %vm3098_vm0, %v3099_v6  ;;  %v1938_v18 = vld [vmem:[%s4734_s0 + $0x390] sm:$0xff] }
 0x111   :  { %v402_v22 = vmax.f32 %v183_v15, 0.0  ;;  %v811_v23 = vmax.f32 %v592_v17, 0.0 }
 0x112   :  { %v187_v24 = vpop.f32.mrb[14].mxu0  ;;  %v596_v25 = vpop.f32.mrb[14].mxu1 }
 0x113   :  { %v3889_v26 = vmax.f32 %v402_v22, %v811_v23  ;;  %v188_v27 = vadd.f32 %v3781_v5, %v187_v24  ;;  %v2335_v28 = vpop.f32.mrb[15].mxu0  ;;  %v597_v29 = vadd.f32 %v3781_v5, %v596_v25  ;;  %2704 = vmatmul.mubr.f32.gmra.mrb[120].mxu0 %v1933_v19  ;;  %v2514_v30 = vpop.f32.mrb[15].mxu1  ;;  %2883 = vmatmul.mubr.f32.gmra.mrb[120].mxu1 %v1982_v20  ;;  %v1987_v19 = vld [vmem:[%s4734_s0 + $0x518] sm:$0xff] }
 0x114   :  { %2706 = vmatprep.mubr.msk.f32.mxu0 %vm3098_vm0, %v3099_v6  ;;  %2885 = vmatprep.mubr.msk.f32.mxu1 %vm3098_vm0, %v3099_v6 }
 0x115   :  { %v403_v34 = vmax.f32 %v188_v27, 0.0  ;;  %v812_v35 = vmax.f32 %v597_v29, 0.0 }
 0x116   :  { %v192_v36 = vpop.f32.mrb[16].mxu0  ;;  %v601_v37 = vpop.f32.mrb[16].mxu1 }
 0x117   :  { %v3903_v38 = vmax.f32 %v403_v34, %v812_v35  ;;  %v193_v39 = vadd.f32 %v3781_v5, %v192_v36  ;;  %v2338_v40 = vpop.f32.mrb[17].mxu0  ;;  %v602_v41 = vadd.f32 %v3781_v5, %v601_v37  ;;  %2707 = vmatmul.mubr.f32.gmra.mrb[122].mxu0 %v1934_v31  ;;  %v2517_v42 = vpop.f32.mrb[17].mxu1  ;;  %2886 = vmatmul.mubr.f32.gmra.mrb[122].mxu1 %v1983_v33  ;;  %v1939_v31 = vld [vmem:[%s4734_s0 + $0x398] sm:$0xff]  ;;  %v1988_v33 = vld [vmem:[%s4734_s0 + $0x520] sm:$0xff] }
 0x118   :  { %2709 = vmatprep.mubr.msk.f32.mxu0 %vm3098_vm0, %v3099_v6  ;;  %2888 = vmatprep.mubr.msk.f32.mxu1 %vm3098_vm0, %v3099_v6 }
 0x119   :  { %v404_v46 = vmax.f32 %v193_v39, 0.0  ;;  %v813_v47 = vmax.f32 %v602_v41, 0.0 }
 0x11a   :  { %v197_v48 = vpop.f32.mrb[18].mxu0  ;;  %v606_v49 = vpop.f32.mrb[18].mxu1 }
 0x11b   :  { %v3917_v50 = vmax.f32 %v404_v46, %v813_v47  ;;  %v198_v51 = vadd.f32 %v3781_v5, %v197_v48  ;;  %v2341_v52 = vpop.f32.mrb[19].mxu0  ;;  %v607_v53 = vadd.f32 %v3781_v5, %v606_v49  ;;  %2710 = vmatmul.mubr.f32.gmra.mrb[124].mxu0 %v1935_v44  ;;  %v2520_v55 = vpop.f32.mrb[19].mxu1  ;;  %2889 = vmatmul.mubr.f32.gmra.mrb[124].mxu1 %v1984_v45  ;;  %v1940_v45 = vld [vmem:[%s4734_s0 + $0x3a0] sm:$0xff]  ;;  %v1989_v46 = vld [vmem:[%s4734_s0 + $0x528] sm:$0xff] }
 0x11c   :  { %2712 = vmatprep.mubr.msk.f32.mxu0 %vm3098_vm0, %v3099_v6  ;;  %2891 = vmatprep.mubr.msk.f32.mxu1 %vm3098_vm0, %v3099_v6 }
 0x11d   :  { %v405_v58 = vmax.f32 %v198_v51, 0.0  ;;  %v814_v59 = vmax.f32 %v607_v53, 0.0 }
 0x11e   :  { %v202_v60 = vpop.f32.mrb[20].mxu0  ;;  %v611_v61 = vpop.f32.mrb[20].mxu1 }
 0x11f   :  { %v3931_v62 = vmax.f32 %v405_v58, %v814_v59  ;;  %v203_v63 = vadd.f32 %v3781_v5, %v202_v60  ;;  %v2344_v0 = vpop.f32.mrb[21].mxu0  ;;  %v612_v2 = vadd.f32 %v3781_v5, %v611_v61  ;;  %2713 = vmatmul.mubr.f32.gmra.mrb[126].mxu0 %v1936_v56  ;;  %v2523_v3 = vpop.f32.mrb[21].mxu1  ;;  %2892 = vmatmul.mubr.f32.gmra.mrb[126].mxu1 %v1985_v57  ;;  %v1941_v58 = vld [vmem:[%s4734_s0 + $0x3a8] sm:$0xff]  ;;  %v1990_v59 = vld [vmem:[%s4734_s0 + $0x530] sm:$0xff] }
 0x120   :  { %2715 = vmatprep.mubr.msk.f32.mxu0 %vm3098_vm0, %v3099_v6  ;;  %2894 = vmatprep.mubr.msk.f32.mxu1 %vm3098_vm0, %v3099_v6 }
 0x121   :  { %v406_v8 = vmax.f32 %v203_v63, 0.0  ;;  %v815_v9 = vmax.f32 %v612_v2, 0.0 }
 0x122   :  { %v207_v10 = vpop.f32.mrb[22].mxu0  ;;  %v616_v11 = vpop.f32.mrb[22].mxu1 }
 0x123   :  { %v3945_v12 = vmax.f32 %v406_v8, %v815_v9  ;;  %v208_v13 = vadd.f32 %v3781_v5, %v207_v10  ;;  %v2347_v15 = vpop.f32.mrb[23].mxu0  ;;  %v617_v16 = vadd.f32 %v3781_v5, %v616_v11  ;;  %2716 = vmatmul.mubr.f32.gmra.mrb[128].mxu0 %v1937_v4  ;;  %v2526_v17 = vpop.f32.mrb[23].mxu1  ;;  %2895 = vmatmul.mubr.f32.gmra.mrb[128].mxu1 %v1986_v7  ;;  %v1942_v9 = vld [vmem:[%s4734_s0 + $0x3b0] sm:$0xff]  ;;  %v1991_v10 = vld [vmem:[%s4734_s0 + $0x538] sm:$0xff] }
 0x124   :  { %2718 = vmatprep.mubr.msk.f32.mxu0 %vm3098_vm0, %v3099_v6  ;;  %2897 = vmatprep.mubr.msk.f32.mxu1 %vm3098_vm0, %v3099_v6 }
 0x125   :  { %v407_v20 = vmax.f32 %v208_v13, 0.0  ;;  %v816_v22 = vmax.f32 %v617_v16, 0.0 }
 0x126   :  { %v212_v23 = vpop.f32.mrb[24].mxu0  ;;  %v621_v24 = vpop.f32.mrb[24].mxu1 }
 0x127   :  { %v3959_v25 = vmax.f32 %v407_v20, %v816_v22  ;;  %v213_v27 = vadd.f32 %v3781_v5, %v212_v23  ;;  %v2350_v28 = vpop.f32.mrb[25].mxu0  ;;  %v622_v29 = vadd.f32 %v3781_v5, %v621_v24  ;;  %2719 = vmatmul.mubr.f32.gmra.mrb[130].mxu0 %v1938_v18  ;;  %v2529_v30 = vpop.f32.mrb[25].mxu1  ;;  %2898 = vmatmul.mubr.f32.gmra.mrb[130].mxu1 %v1987_v19  ;;  %v1943_v23 = vld [vmem:[%s4734_s0 + $0x3b8] sm:$0xff]  ;;  %v1992_v24 = vld [vmem:[%s4734_s0 + $0x540] sm:$0xff] }
 0x128   :  { %2721 = vmatprep.mubr.msk.f32.mxu0 %vm3098_vm0, %v3099_v6  ;;  %2900 = vmatprep.mubr.msk.f32.mxu1 %vm3098_vm0, %v3099_v6 }
 0x129   :  { %v408_v34 = vmax.f32 %v213_v27, 0.0  ;;  %v817_v35 = vmax.f32 %v622_v29, 0.0 }
 0x12a   :  { %v217_v36 = vpop.f32.mrb[26].mxu0  ;;  %v626_v37 = vpop.f32.mrb[26].mxu1 }
 0x12b   :  { %v3973_v39 = vmax.f32 %v408_v34, %v817_v35  ;;  %v218_v40 = vadd.f32 %v3781_v5, %v217_v36  ;;  %v2353_v41 = vpop.f32.mrb[27].mxu0  ;;  %v627_v42 = vadd.f32 %v3781_v5, %v626_v37  ;;  %2722 = vmatmul.mubr.f32.gmra.mrb[132].mxu0 %v1939_v31  ;;  %v2532_v44 = vpop.f32.mrb[27].mxu1  ;;  %2901 = vmatmul.mubr.f32.gmra.mrb[132].mxu1 %v1988_v33  ;;  %v1944_v37 = vld [vmem:[%s4734_s0 + $0x3c0] sm:$0xff] }
 0x12c   :  { %2724 = vmatprep.mubr.msk.f32.mxu0 %vm3098_vm0, %v3099_v6  ;;  %2903 = vmatprep.mubr.msk.f32.mxu1 %vm3098_vm0, %v3099_v6 }
 0x12d   :  { %v409_v47 = vmax.f32 %v218_v40, 0.0  ;;  %v818_v48 = vmax.f32 %v627_v42, 0.0  ;;  %v1993_v40 = vld [vmem:[%s4734_s0 + $0x548] sm:$0xff] }
 0x12e   :  { %v222_v49 = vpop.f32.mrb[28].mxu0  ;;  %v631_v51 = vpop.f32.mrb[28].mxu1 }
 0x12f   :  { %v3987_v52 = vmax.f32 %v409_v47, %v818_v48  ;;  %v223_v53 = vadd.f32 %v3781_v5, %v222_v49  ;;  %v2356_v55 = vpop.f32.mrb[29].mxu0  ;;  %v632_v56 = vadd.f32 %v3781_v5, %v631_v51  ;;  %2725 = vmatmul.mubr.f32.gmra.mrb[134].mxu0 %v1940_v45  ;;  %v2535_v57 = vpop.f32.mrb[29].mxu1  ;;  %2904 = vmatmul.mubr.f32.gmra.mrb[134].mxu1 %v1989_v46 }
 0x130   :  { %2727 = vmatprep.mubr.msk.f32.mxu0 %vm3098_vm0, %v3099_v6  ;;  %2906 = vmatprep.mubr.msk.f32.mxu1 %vm3098_vm0, %v3099_v6  ;;  %v1994_v55 = vld [vmem:[%s4734_s0 + $0x550] sm:$0xff] }
 0x131   :  { %v410_v60 = vmax.f32 %v223_v53, 0.0  ;;  %v819_v61 = vmax.f32 %v632_v56, 0.0  ;;  %v1945_v53 = vld [vmem:[%s4734_s0 + $0x3c8] sm:$0xff] }
 0x132   :  { %v227_v63 = vpop.f32.mrb[30].mxu0  ;;  %v636_v0 = vpop.f32.mrb[30].mxu1 }
 0x133   :  { %v4001_v2 = vmax.f32 %v410_v60, %v819_v61  ;;  %v228_v3 = vadd.f32 %v3781_v5, %v227_v63  ;;  %v2359_v4 = vpop.f32.mrb[31].mxu0  ;;  %v637_v7 = vadd.f32 %v3781_v5, %v636_v0  ;;  %2728 = vmatmul.mubr.f32.gmra.mrb[136].mxu0 %v1941_v58  ;;  %v2538_v8 = vpop.f32.mrb[31].mxu1  ;;  %2907 = vmatmul.mubr.f32.gmra.mrb[136].mxu1 %v1990_v59 }
 0x134   :  { %2730 = vmatprep.mubr.msk.f32.mxu0 %vm3098_vm0, %v3099_v6  ;;  %2909 = vmatprep.mubr.msk.f32.mxu1 %vm3098_vm0, %v3099_v6  ;;  %v1946_v4 = vld [vmem:[%s4734_s0 + $0x3d0] sm:$0xff] }
 0x135   :  { %v411_v11 = vmax.f32 %v228_v3, 0.0  ;;  %v820_v13 = vmax.f32 %v637_v7, 0.0  ;;  %v1995_v7 = vld [vmem:[%s4734_s0 + $0x558] sm:$0xff] }
 0x136   :  { %v232_v15 = vpop.f32.mrb[32].mxu0  ;;  %v641_v16 = vpop.f32.mrb[32].mxu1 }
 0x137   :  { %v4015_v17 = vmax.f32 %v411_v11, %v820_v13  ;;  %v233_v18 = vadd.f32 %v3781_v5, %v232_v15  ;;  %v2362_v19 = vpop.f32.mrb[33].mxu0  ;;  %v642_v20 = vadd.f32 %v3781_v5, %v641_v16  ;;  %2731 = vmatmul.mubr.f32.gmra.mrb[138].mxu0 %v1942_v9  ;;  %v2541_v22 = vpop.f32.mrb[33].mxu1  ;;  %2910 = vmatmul.mubr.f32.gmra.mrb[138].mxu1 %v1991_v10 }
 0x138   :  { %2733 = vmatprep.mubr.msk.f32.mxu0 %vm3098_vm0, %v3099_v6  ;;  %2912 = vmatprep.mubr.msk.f32.mxu1 %vm3098_vm0, %v3099_v6  ;;  %v1996_v22 = vld [vmem:[%s4734_s0 + $0x560] sm:$0xff] }
 0x139   :  { %v412_v27 = vmax.f32 %v233_v18, 0.0  ;;  %v821_v28 = vmax.f32 %v642_v20, 0.0  ;;  %v1947_v20 = vld [vmem:[%s4734_s0 + $0x3d8] sm:$0xff] }
 0x13a   :  { %v237_v29 = vpop.f32.mrb[34].mxu0  ;;  %v646_v30 = vpop.f32.mrb[34].mxu1 }
 0x13b   :  { %v4029_v31 = vmax.f32 %v412_v27, %v821_v28  ;;  %v238_v33 = vadd.f32 %v3781_v5, %v237_v29  ;;  %v2365_v34 = vpop.f32.mrb[35].mxu0  ;;  %v647_v35 = vadd.f32 %v3781_v5, %v646_v30  ;;  %2734 = vmatmul.mubr.f32.gmra.mrb[140].mxu0 %v1943_v23  ;;  %v2544_v36 = vpop.f32.mrb[35].mxu1  ;;  %2913 = vmatmul.mubr.f32.gmra.mrb[140].mxu1 %v1992_v24 }
 0x13c   :  { %2736 = vmatprep.mubr.msk.f32.mxu0 %vm3098_vm0, %v3099_v6  ;;  %2915 = vmatprep.mubr.msk.f32.mxu1 %vm3098_vm0, %v3099_v6  ;;  %v1948_v36 = vld [vmem:[%s4734_s0 + $0x3e0] sm:$0xff] }
 0x13d   :  { %v413_v41 = vmax.f32 %v238_v33, 0.0  ;;  %v822_v42 = vmax.f32 %v647_v35, 0.0 }
 0x13e   :  { %v242_v44 = vpop.f32.mrb[36].mxu0  ;;  %v651_v45 = vpop.f32.mrb[36].mxu1 }
 0x13f   :  { %v4043_v46 = vmax.f32 %v413_v41, %v822_v42  ;;  %v243_v47 = vadd.f32 %v3781_v5, %v242_v44  ;;  %v2368_v48 = vpop.f32.mrb[37].mxu0  ;;  %v652_v49 = vadd.f32 %v3781_v5, %v651_v45  ;;  %2737 = vmatmul.mubr.f32.gmra.mrb[142].mxu0 %v1944_v37  ;;  %v2547_v51 = vpop.f32.mrb[37].mxu1  ;;  %2916 = vmatmul.mubr.f32.gmra.mrb[142].mxu1 %v1993_v40  ;;  %v1997_v37 = vld [vmem:[%s4734_s0 + $0x568] sm:$0xff] }
 0x140   :  { %2739 = vmatprep.mubr.msk.f32.mxu0 %vm3098_vm0, %v3099_v6  ;;  %2918 = vmatprep.mubr.msk.f32.mxu1 %vm3098_vm0, %v3099_v6 }
 0x141   :  { %v414_v56 = vmax.f32 %v243_v47, 0.0  ;;  %v823_v57 = vmax.f32 %v652_v49, 0.0 }
 0x142   :  { %v247_v58 = vpop.f32.mrb[38].mxu0  ;;  %v656_v59 = vpop.f32.mrb[38].mxu1 }
 0x143   :  { %v4057_v60 = vmax.f32 %v414_v56, %v823_v57  ;;  %v248_v61 = vadd.f32 %v3781_v5, %v247_v58  ;;  %v2371_v63 = vpop.f32.mrb[39].mxu0  ;;  %v657_v0 = vadd.f32 %v3781_v5, %v656_v59  ;;  %2740 = vmatmul.mubr.f32.gmra.mrb[144].mxu0 %v1945_v53  ;;  %v2550_v3 = vpop.f32.mrb[39].mxu1  ;;  %2919 = vmatmul.mubr.f32.gmra.mrb[144].mxu1 %v1994_v55  ;;  %v1949_v53 = vld [vmem:[%s4734_s0 + $0x3e8] sm:$0xff]  ;;  %v1998_v55 = vld [vmem:[%s4734_s0 + $0x570] sm:$0xff] }
 0x144   :  { %2742 = vmatprep.mubr.msk.f32.mxu0 %vm3098_vm0, %v3099_v6  ;;  %2921 = vmatprep.mubr.msk.f32.mxu1 %vm3098_vm0, %v3099_v6 }
 0x145   :  { %v415_v8 = vmax.f32 %v248_v61, 0.0  ;;  %v824_v9 = vmax.f32 %v657_v0, 0.0 }
 0x146   :  { %v252_v10 = vpop.f32.mrb[40].mxu0  ;;  %v661_v11 = vpop.f32.mrb[40].mxu1 }
 0x147   :  { %v4071_v13 = vmax.f32 %v415_v8, %v824_v9  ;;  %v253_v15 = vadd.f32 %v3781_v5, %v252_v10  ;;  %v2374_v16 = vpop.f32.mrb[41].mxu0  ;;  %v662_v18 = vadd.f32 %v3781_v5, %v661_v11  ;;  %2743 = vmatmul.mubr.f32.gmra.mrb[146].mxu0 %v1946_v4  ;;  %v2553_v19 = vpop.f32.mrb[41].mxu1  ;;  %2922 = vmatmul.mubr.f32.gmra.mrb[146].mxu1 %v1995_v7  ;;  %v1950_v7 = vld [vmem:[%s4734_s0 + $0x3f0] sm:$0xff]  ;;  %v1999_v8 = vld [vmem:[%s4734_s0 + $0x578] sm:$0xff] }
 0x148   :  { %2745 = vmatprep.mubr.msk.f32.mxu0 %vm3098_vm0, %v3099_v6  ;;  %2924 = vmatprep.mubr.msk.f32.mxu1 %vm3098_vm0, %v3099_v6 }
 0x149   :  { %v416_v23 = vmax.f32 %v253_v15, 0.0  ;;  %v825_v24 = vmax.f32 %v662_v18, 0.0 }
 0x14a   :  { %v257_v27 = vpop.f32.mrb[42].mxu0  ;;  %v666_v28 = vpop.f32.mrb[42].mxu1 }
 0x14b   :  { %v4085_v29 = vmax.f32 %v416_v23, %v825_v24  ;;  %v258_v30 = vadd.f32 %v3781_v5, %v257_v27  ;;  %v2377_v33 = vpop.f32.mrb[43].mxu0  ;;  %v667_v34 = vadd.f32 %v3781_v5, %v666_v28  ;;  %2746 = vmatmul.mubr.f32.gmra.mrb[148].mxu0 %v1947_v20  ;;  %v2556_v35 = vpop.f32.mrb[43].mxu1  ;;  %2925 = vmatmul.mubr.f32.gmra.mrb[148].mxu1 %v1996_v22  ;;  %v1951_v23 = vld [vmem:[%s4734_s0 + $0x3f8] sm:$0xff]  ;;  %v2000_v24 = vld [vmem:[%s4734_s0 + $0x580] sm:$0xff] }
 0x14c   :  { %2748 = vmatprep.mubr.msk.f32.mxu0 %vm3098_vm0, %v3099_v6  ;;  %2927 = vmatprep.mubr.msk.f32.mxu1 %vm3098_vm0, %v3099_v6 }
 0x14d   :  { %v417_v40 = vmax.f32 %v258_v30, 0.0  ;;  %v826_v41 = vmax.f32 %v667_v34, 0.0 }
 0x14e   :  { %v262_v42 = vpop.f32.mrb[44].mxu0  ;;  %v671_v44 = vpop.f32.mrb[44].mxu1 }
 0x14f   :  { %v4099_v45 = vmax.f32 %v417_v40, %v826_v41  ;;  %v263_v47 = vadd.f32 %v3781_v5, %v262_v42  ;;  %v2380_v48 = vpop.f32.mrb[45].mxu0  ;;  %v672_v49 = vadd.f32 %v3781_v5, %v671_v44  ;;  %2749 = vmatmul.mubr.f32.gmra.mrb[150].mxu0 %v1948_v36  ;;  %v2559_v51 = vpop.f32.mrb[45].mxu1  ;;  %2928 = vmatmul.mubr.f32.gmra.mrb[150].mxu1 %v1997_v37  ;;  %v1952_v41 = vld [vmem:[%s4734_s0 + $0x400] sm:$0xff]  ;;  %v2001_v42 = vld [vmem:[%s4734_s0 + $0x588] sm:$0xff] }
 0x150   :  { %2751 = vmatprep.mubr.msk.f32.mxu0 %vm3098_vm0, %v3099_v6  ;;  %2930 = vmatprep.mubr.msk.f32.mxu1 %vm3098_vm0, %v3099_v6 }
 0x151   :  { %v418_v56 = vmax.f32 %v263_v47, 0.0  ;;  %v827_v57 = vmax.f32 %v672_v49, 0.0 }
 0x152   :  { %v267_v58 = vpop.f32.mrb[46].mxu0  ;;  %v676_v59 = vpop.f32.mrb[46].mxu1 }
 0x153   :  { %v4113_v61 = vmax.f32 %v418_v56, %v827_v57  ;;  %v268_v63 = vadd.f32 %v3781_v5, %v267_v58  ;;  %v2383_v0 = vpop.f32.mrb[47].mxu0  ;;  %v677_v3 = vadd.f32 %v3781_v5, %v676_v59  ;;  %2752 = vmatmul.mubr.f32.gmra.mrb[152].mxu0 %v1949_v53  ;;  %v2562_v4 = vpop.f32.mrb[47].mxu1  ;;  %2931 = vmatmul.mubr.f32.gmra.mrb[152].mxu1 %v1998_v55  ;;  %v1953_v58 = vld [vmem:[%s4734_s0 + $0x408] sm:$0xff]  ;;  %v2002_v59 = vld [vmem:[%s4734_s0 + $0x590] sm:$0xff] }
 0x154   :  { %2754 = vmatprep.mubr.msk.f32.mxu0 %vm3098_vm0, %v3099_v6  ;;  %2933 = vmatprep.mubr.msk.f32.mxu1 %vm3098_vm0, %v3099_v6 }
 0x155   :  { %v419_v9 = vmax.f32 %v268_v63, 0.0  ;;  %v828_v10 = vmax.f32 %v677_v3, 0.0 }
 0x156   :  { %v272_v11 = vpop.f32.mrb[48].mxu0  ;;  %v681_v15 = vpop.f32.mrb[48].mxu1 }
 0x157   :  { %v4127_v16 = vmax.f32 %v419_v9, %v828_v10  ;;  %v273_v18 = vadd.f32 %v3781_v5, %v272_v11  ;;  %v2386_v19 = vpop.f32.mrb[49].mxu0  ;;  %v682_v20 = vadd.f32 %v3781_v5, %v681_v15  ;;  %2755 = vmatmul.mubr.f32.gmra.mrb[154].mxu0 %v1950_v7  ;;  %v2565_v22 = vpop.f32.mrb[49].mxu1  ;;  %2934 = vmatmul.mubr.f32.gmra.mrb[154].mxu1 %v1999_v8  ;;  %v1954_v15 = vld [vmem:[%s4734_s0 + $0x410] sm:$0xff] }
 0x158   :  { %2757 = vmatprep.mubr.msk.f32.mxu0 %vm3098_vm0, %v3099_v6  ;;  %2936 = vmatprep.mubr.msk.f32.mxu1 %vm3098_vm0, %v3099_v6 }
 0x159   :  { %v420_v27 = vmax.f32 %v273_v18, 0.0  ;;  %v829_v28 = vmax.f32 %v682_v20, 0.0  ;;  %v2003_v18 = vld [vmem:[%s4734_s0 + $0x598] sm:$0xff] }
 0x15a   :  { %v277_v30 = vpop.f32.mrb[50].mxu0  ;;  %v686_v33 = vpop.f32.mrb[50].mxu1 }
 0x15b   :  { %v4141_v34 = vmax.f32 %v420_v27, %v829_v28  ;;  %v278_v35 = vadd.f32 %v3781_v5, %v277_v30  ;;  %v2389_v36 = vpop.f32.mrb[51].mxu0  ;;  %v687_v37 = vadd.f32 %v3781_v5, %v686_v33  ;;  %2758 = vmatmul.mubr.f32.gmra.mrb[156].mxu0 %v1951_v23  ;;  %v2568_v40 = vpop.f32.mrb[51].mxu1  ;;  %2937 = vmatmul.mubr.f32.gmra.mrb[156].mxu1 %v2000_v24 }
 0x15c   :  { %2760 = vmatprep.mubr.msk.f32.mxu0 %vm3098_vm0, %v3099_v6  ;;  %2939 = vmatprep.mubr.msk.f32.mxu1 %vm3098_vm0, %v3099_v6  ;;  %v2004_v36 = vld [vmem:[%s4734_s0 + $0x5a0] sm:$0xff] }
 0x15d   :  { %v421_v44 = vmax.f32 %v278_v35, 0.0  ;;  %v830_v47 = vmax.f32 %v687_v37, 0.0  ;;  %v1955_v35 = vld [vmem:[%s4734_s0 + $0x418] sm:$0xff] }
 0x15e   :  { %v282_v48 = vpop.f32.mrb[52].mxu0  ;;  %v691_v49 = vpop.f32.mrb[52].mxu1 }
 0x15f   :  { %v4155_v51 = vmax.f32 %v421_v44, %v830_v47  ;;  %v283_v53 = vadd.f32 %v3781_v5, %v282_v48  ;;  %v2392_v55 = vpop.f32.mrb[53].mxu0  ;;  %v692_v56 = vadd.f32 %v3781_v5, %v691_v49  ;;  %2761 = vmatmul.mubr.f32.gmra.mrb[158].mxu0 %v1952_v41  ;;  %v2571_v57 = vpop.f32.mrb[53].mxu1  ;;  %2940 = vmatmul.mubr.f32.gmra.mrb[158].mxu1 %v2001_v42 }
 0x160   :  { %2763 = vmatprep.mubr.msk.f32.mxu0 %vm3098_vm0, %v3099_v6  ;;  %2942 = vmatprep.mubr.msk.f32.mxu1 %vm3098_vm0, %v3099_v6  ;;  %v1956_v55 = vld [vmem:[%s4734_s0 + $0x420] sm:$0xff] }
 0x161   :  { %v422_v63 = vmax.f32 %v283_v53, 0.0  ;;  %v831_v0 = vmax.f32 %v692_v56, 0.0  ;;  %v2005_v56 = vld [vmem:[%s4734_s0 + $0x5a8] sm:$0xff] }
 0x162   :  { %v287_v3 = vpop.f32.mrb[54].mxu0  ;;  %v696_v4 = vpop.f32.mrb[54].mxu1 }
 0x163   :  { %v4169_v7 = vmax.f32 %v422_v63, %v831_v0  ;;  %v288_v8 = vadd.f32 %v3781_v5, %v287_v3  ;;  %v2395_v9 = vpop.f32.mrb[55].mxu0  ;;  %v697_v10 = vadd.f32 %v3781_v5, %v696_v4  ;;  %2764 = vmatmul.mubr.f32.gmra.mrb[160].mxu0 %v1953_v58  ;;  %v2574_v11 = vpop.f32.mrb[55].mxu1  ;;  %2943 = vmatmul.mubr.f32.gmra.mrb[160].mxu1 %v2002_v59 }
 0x164   :  { %2766 = vmatprep.mubr.msk.f32.mxu0 %vm3098_vm0, %v3099_v6  ;;  %2945 = vmatprep.mubr.msk.f32.mxu1 %vm3098_vm0, %v3099_v6  ;;  %v2006_v11 = vld [vmem:[%s4734_s0 + $0x5b0] sm:$0xff] }
 0x165   :  { %v423_v19 = vmax.f32 %v288_v8, 0.0  ;;  %v832_v20 = vmax.f32 %v697_v10, 0.0  ;;  %v1957_v10 = vld [vmem:[%s4734_s0 + $0x428] sm:$0xff] }
 0x166   :  { %v292_v22 = vpop.f32.mrb[56].mxu0  ;;  %v701_v23 = vpop.f32.mrb[56].mxu1 }
 0x167   :  { %v4183_v24 = vmax.f32 %v423_v19, %v832_v20  ;;  %v293_v27 = vadd.f32 %v3781_v5, %v292_v22  ;;  %v2398_v28 = vpop.f32.mrb[57].mxu0  ;;  %v702_v30 = vadd.f32 %v3781_v5, %v701_v23  ;;  %2767 = vmatmul.mubr.f32.gmra.mrb[162].mxu0 %v1954_v15  ;;  %v2577_v33 = vpop.f32.mrb[57].mxu1  ;;  %2946 = vmatmul.mubr.f32.gmra.mrb[162].mxu1 %v2003_v18 }
 0x168   :  { %2769 = vmatprep.mubr.msk.f32.mxu0 %vm3098_vm0, %v3099_v6  ;;  %2948 = vmatprep.mubr.msk.f32.mxu1 %vm3098_vm0, %v3099_v6  ;;  %v1958_v33 = vld [vmem:[%s4734_s0 + $0x430] sm:$0xff] }
 0x169   :  { %v424_v37 = vmax.f32 %v293_v27, 0.0  ;;  %v833_v40 = vmax.f32 %v702_v30, 0.0 }
 0x16a   :  { %v297_v41 = vpop.f32.mrb[58].mxu0  ;;  %v706_v42 = vpop.f32.mrb[58].mxu1 }
 0x16b   :  { %v4197_v44 = vmax.f32 %v424_v37, %v833_v40  ;;  %v298_v47 = vadd.f32 %v3781_v5, %v297_v41  ;;  %v2401_v48 = vpop.f32.mrb[59].mxu0  ;;  %v707_v49 = vadd.f32 %v3781_v5, %v706_v42  ;;  %2770 = vmatmul.mubr.f32.gmra.mrb[164].mxu0 %v1955_v35  ;;  %v2580_v53 = vpop.f32.mrb[59].mxu1  ;;  %2949 = vmatmul.mubr.f32.gmra.mrb[164].mxu1 %v2004_v36  ;;  %v2007_v35 = vld [vmem:[%s4734_s0 + $0x5b8] sm:$0xff] }
 0x16c   :  { %2772 = vmatprep.mubr.msk.f32.mxu0 %vm3098_vm0, %v3099_v6  ;;  %2951 = vmatprep.mubr.msk.f32.mxu1 %vm3098_vm0, %v3099_v6 }
 0x16d   :  { %v425_v57 = vmax.f32 %v298_v47, 0.0  ;;  %v834_v58 = vmax.f32 %v707_v49, 0.0 }
 0x16e   :  { %v302_v59 = vpop.f32.mrb[60].mxu0  ;;  %v711_v63 = vpop.f32.mrb[60].mxu1 }
 0x16f   :  { %v4211_v0 = vmax.f32 %v425_v57, %v834_v58  ;;  %v303_v3 = vadd.f32 %v3781_v5, %v302_v59  ;;  %v2404_v4 = vpop.f32.mrb[61].mxu0  ;;  %v712_v8 = vadd.f32 %v3781_v5, %v711_v63  ;;  %2773 = vmatmul.mubr.f32.gmra.mrb[166].mxu0 %v1956_v55  ;;  %v2583_v9 = vpop.f32.mrb[61].mxu1  ;;  %2952 = vmatmul.mubr.f32.gmra.mrb[166].mxu1 %v2005_v56  ;;  %v1959_v55 = vld [vmem:[%s4734_s0 + $0x438] sm:$0xff]  ;;  %v2008_v56 = vld [vmem:[%s4734_s0 + $0x5c0] sm:$0xff] }
 0x170   :  { %2775 = vmatprep.mubr.msk.f32.mxu0 %vm3098_vm0, %v3099_v6  ;;  %2954 = vmatprep.mubr.msk.f32.mxu1 %vm3098_vm0, %v3099_v6 }
 0x171   :  { %v426_v15 = vmax.f32 %v303_v3, 0.0  ;;  %v835_v18 = vmax.f32 %v712_v8, 0.0 }
 0x172   :  { %v307_v19 = vpop.f32.mrb[62].mxu0  ;;  %v716_v20 = vpop.f32.mrb[62].mxu1 }
 0x173   :  { %v4225_v22 = vmax.f32 %v426_v15, %v835_v18  ;;  %v308_v23 = vadd.f32 %v3781_v5, %v307_v19  ;;  %v2407_v27 = vpop.f32.mrb[63].mxu0  ;;  %v717_v28 = vadd.f32 %v3781_v5, %v716_v20  ;;  %2776 = vmatmul.mubr.f32.gmra.mrb[168].mxu0 %v1957_v10  ;;  %v2586_v30 = vpop.f32.mrb[63].mxu1  ;;  %2955 = vmatmul.mubr.f32.gmra.mrb[168].mxu1 %v2006_v11  ;;  %v1960_v11 = vld [vmem:[%s4734_s0 + $0x440] sm:$0xff]  ;;  %v2009_v15 = vld [vmem:[%s4734_s0 + $0x5c8] sm:$0xff] }
 0x174   :  { %2778 = vmatprep.mubr.msk.f32.mxu0 %vm3098_vm0, %v3099_v6  ;;  %2957 = vmatprep.mubr.msk.f32.mxu1 %vm3098_vm0, %v3099_v6  ;;  %v4272_v27 = vld [vmem:[%s4735_s2] ss:$0 sm:$0xff] }
 0x175   :  { %v427_v36 = vmax.f32 %v308_v23, 0.0  ;;  %v836_v37 = vmax.f32 %v717_v28, 0.0 }
 0x176   :  { %v312_v40 = vpop.f32.mrb[64].mxu0  ;;  %v721_v41 = vpop.f32.mrb[64].mxu1 }
 0x177   :  { %v4239_v42 = vmax.f32 %v427_v36, %v836_v37  ;;  %v313_v47 = vadd.f32 %v3781_v5, %v312_v40  ;;  %v2410_v48 = vpop.f32.mrb[65].mxu0  ;;  %v722_v49 = vadd.f32 %v3781_v5, %v721_v41  ;;  %2779 = vmatmul.mubr.f32.gmra.mrb[170].mxu0 %v1958_v33  ;;  %v2589_v53 = vpop.f32.mrb[65].mxu1  ;;  %2958 = vmatmul.mubr.f32.gmra.mrb[170].mxu1 %v2007_v35  ;;  %v1961_v36 = vld [vmem:[%s4734_s0 + $0x448] sm:$0xff]  ;;  %v2010_v37 = vld [vmem:[%s4734_s0 + $0x5d0] sm:$0xff] }
 0x178   :  { %2781 = vmatprep.mubr.msk.f32.mxu0 %vm3098_vm0, %v3099_v6  ;;  %2960 = vmatprep.mubr.msk.f32.mxu1 %vm3098_vm0, %v3099_v6 }
 0x179   :  { %v428_v57 = vmax.f32 %v313_v47, 0.0  ;;  %v837_v58 = vmax.f32 %v722_v49, 0.0 }
 0x17a   :  { %v317_v59 = vpop.f32.mrb[66].mxu0  ;;  %v726_v63 = vpop.f32.mrb[66].mxu1 }
 0x17b   :  { %v4253_v3 = vmax.f32 %v428_v57, %v837_v58  ;;  %v318_v4 = vadd.f32 %v3781_v5, %v317_v59  ;;  %v2413_v8 = vpop.f32.mrb[67].mxu0  ;;  %v727_v9 = vadd.f32 %v3781_v5, %v726_v63  ;;  %2782 = vmatmul.mubr.f32.gmra.mrb[172].mxu0 %v1959_v55  ;;  %v2592_v10 = vpop.f32.mrb[67].mxu1  ;;  %2961 = vmatmul.mubr.f32.gmra.mrb[172].mxu1 %v2008_v56  ;;  %v1962_v58 = vld [vmem:[%s4734_s0 + $0x450] sm:$0xff]  ;;  %v2011_v59 = vld [vmem:[%s4734_s0 + $0x5d8] sm:$0xff] }
 0x17c   :  { %2784 = vmatprep.mubr.msk.f32.mxu0 %vm3098_vm0, %v3099_v6  ;;  %2963 = vmatprep.mubr.msk.f32.mxu1 %vm3098_vm0, %v3099_v6 }
 0x17d   :  { %v429_v18 = vmax.f32 %v318_v4, 0.0  ;;  %v838_v19 = vmax.f32 %v727_v9, 0.0 }
 0x17e   :  { %v322_v5 = vpop.f32.mrb[68].mxu0  ;;  %v731_v20 = vpop.f32.mrb[68].mxu1 }
 0x17f   :  { %v4267_v23 = vmax.f32 %v429_v18, %v838_v19  ;;  %v323_v28 = vadd.f32 %v4272_v27, %v322_v5  ;;  %v2416_v30 = vpop.f32.mrb[69].mxu0  ;;  %v732_v33 = vadd.f32 %v4272_v27, %v731_v20  ;;  %2785 = vmatmul.mubr.f32.gmra.mrb[174].mxu0 %v1960_v11  ;;  %v2595_v35 = vpop.f32.mrb[69].mxu1  ;;  %2964 = vmatmul.mubr.f32.gmra.mrb[174].mxu1 %v2009_v15  ;;  %v1963_v5 = vld [vmem:[%s4734_s0 + $0x458] sm:$0xff]  ;;  %v2012_v20 = vld [vmem:[%s4734_s0 + $0x5e0] sm:$0xff] }
 0x180   :  { %2787 = vmatprep.mubr.msk.f32.mxu0 %vm3098_vm0, %v3099_v6  ;;  %2966 = vmatprep.mubr.msk.f32.mxu1 %vm3098_vm0, %v3099_v6 }
 0x181   :  { %v430_v40 = vmax.f32 %v323_v28, 0.0  ;;  %v839_v41 = vmax.f32 %v732_v33, 0.0 }
 0x182   :  { %v327_v47 = vpop.f32.mrb[70].mxu0  ;;  %v736_v48 = vpop.f32.mrb[70].mxu1 }
 0x183   :  { %v4286_v49 = vmax.f32 %v430_v40, %v839_v41  ;;  %v328_v53 = vadd.f32 %v4272_v27, %v327_v47  ;;  %v2419_v55 = vpop.f32.mrb[71].mxu0  ;;  %v737_v56 = vadd.f32 %v4272_v27, %v736_v48  ;;  %2788 = vmatmul.mubr.f32.gmra.mrb[176].mxu0 %v1961_v36  ;;  %v2598_v57 = vpop.f32.mrb[71].mxu1  ;;  %2967 = vmatmul.mubr.f32.gmra.mrb[176].mxu1 %v2010_v37  ;;  %v1964_v48 = vld [vmem:[%s4734_s0 + $0x460] sm:$0xff] }
 0x184   :  { %2790 = vmatprep.mubr.msk.f32.mxu0 %vm3098_vm0, %v3099_v6  ;;  %2969 = vmatprep.mubr.msk.f32.mxu1 %vm3098_vm0, %v3099_v6 }
 0x185   :  { %v431_v63 = vmax.f32 %v328_v53, 0.0  ;;  %v840_v4 = vmax.f32 %v737_v56, 0.0  ;;  %v2013_v53 = vld [vmem:[%s4734_s0 + $0x5e8] sm:$0xff] }
 0x186   :  { %v332_v8 = vpop.f32.mrb[72].mxu0  ;;  %v741_v9 = vpop.f32.mrb[72].mxu1 }
 0x187   :  { %v4300_v10 = vmax.f32 %v431_v63, %v840_v4  ;;  %v333_v11 = vadd.f32 %v4272_v27, %v332_v8  ;;  %v2422_v15 = vpop.f32.mrb[73].mxu0  ;;  %v742_v18 = vadd.f32 %v4272_v27, %v741_v9  ;;  %2791 = vmatmul.mubr.f32.gmra.mrb[178].mxu0 %v1962_v58  ;;  %v2601_v19 = vpop.f32.mrb[73].mxu1  ;;  %2970 = vmatmul.mubr.f32.gmra.mrb[178].mxu1 %v2011_v59 }
 0x188   :  { %2793 = vmatprep.mubr.msk.f32.mxu0 %vm3098_vm0, %v3099_v6  ;;  %2972 = vmatprep.mubr.msk.f32.mxu1 %vm3098_vm0, %v3099_v6  ;;  %v2014_v15 = vld [vmem:[%s4734_s0 + $0x5f0] sm:$0xff] }
 0x189   :  { %v432_v28 = vmax.f32 %v333_v11, 0.0  ;;  %v841_v30 = vmax.f32 %v742_v18, 0.0  ;;  %v1965_v11 = vld [vmem:[%s4734_s0 + $0x468] sm:$0xff] }
 0x18a   :  { %v337_v33 = vpop.f32.mrb[74].mxu0  ;;  %v746_v35 = vpop.f32.mrb[74].mxu1 }
 0x18b   :  { %v4314_v36 = vmax.f32 %v432_v28, %v841_v30  ;;  %v338_v37 = vadd.f32 %v4272_v27, %v337_v33  ;;  %v2425_v40 = vpop.f32.mrb[75].mxu0  ;;  %v747_v41 = vadd.f32 %v4272_v27, %v746_v35  ;;  %2794 = vmatmul.mubr.f32.gmra.mrb[180].mxu0 %v1963_v5  ;;  %v2604_v47 = vpop.f32.mrb[75].mxu1  ;;  %2973 = vmatmul.mubr.f32.gmra.mrb[180].mxu1 %v2012_v20 }
 0x18c   :  { %2796 = vmatprep.mubr.msk.f32.mxu0 %vm3098_vm0, %v3099_v6  ;;  %2975 = vmatprep.mubr.msk.f32.mxu1 %vm3098_vm0, %v3099_v6  ;;  %v1966_v40 = vld [vmem:[%s4734_s0 + $0x470] sm:$0xff] }
 0x18d   :  { %v433_v55 = vmax.f32 %v338_v37, 0.0  ;;  %v842_v56 = vmax.f32 %v747_v41, 0.0  ;;  %v2015_v41 = vld [vmem:[%s4734_s0 + $0x5f8] sm:$0xff] }
 0x18e   :  { %v342_v57 = vpop.f32.mrb[76].mxu0  ;;  %v751_v58 = vpop.f32.mrb[76].mxu1 }
 0x18f   :  { %v4328_v59 = vmax.f32 %v433_v55, %v842_v56  ;;  %v343_v63 = vadd.f32 %v4272_v27, %v342_v57  ;;  %v2428_v4 = vpop.f32.mrb[77].mxu0  ;;  %v752_v8 = vadd.f32 %v4272_v27, %v751_v58  ;;  %2797 = vmatmul.mubr.f32.gmra.mrb[182].mxu0 %v1964_v48  ;;  %v2607_v9 = vpop.f32.mrb[77].mxu1  ;;  %2976 = vmatmul.mubr.f32.gmra.mrb[182].mxu1 %v2013_v53 }
 0x190   :  { %2799 = vmatprep.mubr.msk.f32.mxu0 %vm3098_vm0, %v3099_v6  ;;  %2978 = vmatprep.mubr.msk.f32.mxu1 %vm3098_vm0, %v3099_v6  ;;  %v2016_v9 = vld [vmem:[%s4734_s0 + $0x600] sm:$0xff] }
 0x191   :  { %v434_v18 = vmax.f32 %v343_v63, 0.0  ;;  %v843_v19 = vmax.f32 %v752_v8, 0.0  ;;  %v1967_v8 = vld [vmem:[%s4734_s0 + $0x478] sm:$0xff] }
 0x192   :  { %v347_v5 = vpop.f32.mrb[78].mxu0  ;;  %v756_v20 = vpop.f32.mrb[78].mxu1 }
 0x193   :  { %v4342_v28 = vmax.f32 %v434_v18, %v843_v19  ;;  %v348_v30 = vadd.f32 %v4272_v27, %v347_v5  ;;  %v2431_v33 = vpop.f32.mrb[79].mxu0  ;;  %v757_v35 = vadd.f32 %v4272_v27, %v756_v20  ;;  %2800 = vmatmul.mubr.f32.gmra.mrb[184].mxu0 %v1965_v11  ;;  %v2610_v37 = vpop.f32.mrb[79].mxu1  ;;  %2979 = vmatmul.mubr.f32.gmra.mrb[184].mxu1 %v2014_v15 }
 0x194   :  { %2802 = vmatprep.mubr.msk.f32.mxu0 %vm3098_vm0, %v3099_v6  ;;  %2981 = vmatprep.mubr.msk.f32.mxu1 %vm3098_vm0, %v3099_v6  ;;  %v1968_v37 = vld [vmem:[%s4734_s0 + $0x480] sm:$0xff] }
 0x195   :  { %v435_v47 = vmax.f32 %v348_v30, 0.0  ;;  %v844_v48 = vmax.f32 %v757_v35, 0.0 }
 0x196   :  { %v352_v53 = vpop.f32.mrb[80].mxu0  ;;  %v761_v55 = vpop.f32.mrb[80].mxu1 }
 0x197   :  { %v4356_v56 = vmax.f32 %v435_v47, %v844_v48  ;;  %v353_v57 = vadd.f32 %v4272_v27, %v352_v53  ;;  %v2434_v58 = vpop.f32.mrb[81].mxu0  ;;  %v762_v63 = vadd.f32 %v4272_v27, %v761_v55  ;;  %2803 = vmatmul.mubr.f32.gmra.mrb[186].mxu0 %v1966_v40  ;;  %v2613_v4 = vpop.f32.mrb[81].mxu1  ;;  %2982 = vmatmul.mubr.f32.gmra.mrb[186].mxu1 %v2015_v41  ;;  %v2017_v40 = vld [vmem:[%s4734_s0 + $0x608] sm:$0xff] }
 0x198   :  { %2805 = vmatprep.mubr.msk.f32.mxu0 %vm3098_vm0, %v3099_v6  ;;  %2984 = vmatprep.mubr.msk.f32.mxu1 %vm3098_vm0, %v3099_v6 }
 0x199   :  { %v436_v11 = vmax.f32 %v353_v57, 0.0  ;;  %v845_v15 = vmax.f32 %v762_v63, 0.0 }
 0x19a   :  { %v357_v18 = vpop.f32.mrb[82].mxu0  ;;  %v766_v19 = vpop.f32.mrb[82].mxu1 }
 0x19b   :  { %v4370_v5 = vmax.f32 %v436_v11, %v845_v15  ;;  %v358_v20 = vadd.f32 %v4272_v27, %v357_v18  ;;  %v2437_v30 = vpop.f32.mrb[83].mxu0  ;;  %v767_v33 = vadd.f32 %v4272_v27, %v766_v19  ;;  %2806 = vmatmul.mubr.f32.gmra.mrb[188].mxu0 %v1967_v8  ;;  %v2616_v35 = vpop.f32.mrb[83].mxu1  ;;  %2985 = vmatmul.mubr.f32.gmra.mrb[188].mxu1 %v2016_v9  ;;  %v1969_v8 = vld [vmem:[%s4734_s0 + $0x488] sm:$0xff]  ;;  %v2018_v9 = vld [vmem:[%s4734_s0 + $0x610] sm:$0xff] }
 0x19c   :  { %2808 = vmatprep.mubr.msk.f32.mxu0 %vm3098_vm0, %v3099_v6  ;;  %2987 = vmatprep.mubr.msk.f32.mxu1 %vm3098_vm0, %v3099_v6 }
 0x19d   :  { %v437_v41 = vmax.f32 %v358_v20, 0.0  ;;  %v846_v47 = vmax.f32 %v767_v33, 0.0 }
 0x19e   :  { %v362_v48 = vpop.f32.mrb[84].mxu0  ;;  %v771_v53 = vpop.f32.mrb[84].mxu1 }
 0x19f   :  { %v4384_v55 = vmax.f32 %v437_v41, %v846_v47  ;;  %v363_v57 = vadd.f32 %v4272_v27, %v362_v48  ;;  %v2440_v58 = vpop.f32.mrb[85].mxu0  ;;  %v772_v63 = vadd.f32 %v4272_v27, %v771_v53  ;;  %2809 = vmatmul.mubr.f32.gmra.mrb[190].mxu0 %v1968_v37  ;;  %v2619_v4 = vpop.f32.mrb[85].mxu1  ;;  %2988 = vmatmul.mubr.f32.gmra.mrb[190].mxu1 %v2017_v40  ;;  %v1970_v40 = vld [vmem:[%s4734_s0 + $0x490] sm:$0xff]  ;;  %v2019_v41 = vld [vmem:[%s4734_s0 + $0x618] sm:$0xff] }
 0x1a0   :  { %2811 = vmatprep.mubr.msk.f32.mxu0 %vm3098_vm0, %v3099_v6  ;;  %2990 = vmatprep.mubr.msk.f32.mxu1 %vm3098_vm0, %v3099_v6 }
 0x1a1   :  { %v438_v11 = vmax.f32 %v363_v57, 0.0  ;;  %v847_v15 = vmax.f32 %v772_v63, 0.0 }
 0x1a2   :  { %v367_v18 = vpop.f32.mrb[86].mxu0  ;;  %v776_v19 = vpop.f32.mrb[86].mxu1 }
 0x1a3   :  { %v4398_v20 = vmax.f32 %v438_v11, %v847_v15  ;;  %v368_v30 = vadd.f32 %v4272_v27, %v367_v18  ;;  %v2443_v33 = vpop.f32.mrb[87].mxu0  ;;  %v777_v35 = vadd.f32 %v4272_v27, %v776_v19  ;;  %2812 = vmatmul.mubr.f32.gmra.mrb[192].mxu0 %v1969_v8  ;;  %v2622_v37 = vpop.f32.mrb[87].mxu1  ;;  %2991 = vmatmul.mubr.f32.gmra.mrb[192].mxu1 %v2018_v9 }
 0x1a4   :  { %2814 = vmatprep.mubr.msk.f32.mxu0 %vm3098_vm0, %v3099_v6  ;;  %2993 = vmatprep.mubr.msk.f32.mxu1 %vm3098_vm0, %v3099_v6 }
 0x1a5   :  { %v439_v47 = vmax.f32 %v368_v30, 0.0  ;;  %v848_v48 = vmax.f32 %v777_v35, 0.0 }
 0x1a6   :  { %v372_v53 = vpop.f32.mrb[88].mxu0  ;;  %v781_v57 = vpop.f32.mrb[88].mxu1 }
 0x1a7   :  { %v4412_v58 = vmax.f32 %v439_v47, %v848_v48  ;;  %v373_v63 = vadd.f32 %v4272_v27, %v372_v53  ;;  %v2446_v4 = vpop.f32.mrb[89].mxu0  ;;  %v782_v8 = vadd.f32 %v4272_v27, %v781_v57  ;;  %2815 = vmatmul.mubr.f32.gmra.mrb[194].mxu0 %v1970_v40  ;;  %v2625_v9 = vpop.f32.mrb[89].mxu1  ;;  %2994 = vmatmul.mubr.f32.gmra.mrb[194].mxu1 %v2019_v41 }
 0x1a9   :  { %v440_v11 = vmax.f32 %v373_v63, 0.0  ;;  %v849_v6 = vmax.f32 %v782_v8, 0.0 }
 0x1aa   :  { %v377_v15 = vpop.f32.mrb[90].mxu0  ;;  %v786_v18 = vpop.f32.mrb[90].mxu1 }
 0x1ab   :  { %v4416_v19 = vmax.f32 %v440_v11, %v849_v6  ;;  %v378_v30 = vadd.f32 %v4272_v27, %v377_v15  ;;  %v2449_v33 = vpop.f32.mrb[91].mxu0  ;;  %v787_v35 = vadd.f32 %v4272_v27, %v786_v18  ;;  %v2628_v37 = vpop.f32.mrb[91].mxu1 }
 0x1ad   :  { %v441_v47 = vmax.f32 %v378_v30, 0.0  ;;  %v850_v48 = vmax.f32 %v787_v35, 0.0 }
 0x1ae   :  { %v382_v53 = vpop.f32.mrb[92].mxu0  ;;  %v791_v4 = vpop.f32.mrb[92].mxu1 }
 0x1af   :  { %v4420_v57 = vmax.f32 %v441_v47, %v850_v48  ;;  %v383_v40 = vadd.f32 %v4272_v27, %v382_v53  ;;  %v2452_v41 = vpop.f32.mrb[93].mxu0  ;;  %v792_v63 = vadd.f32 %v4272_v27, %v791_v4  ;;  %v2631_v8 = vpop.f32.mrb[93].mxu1 }
 0x1b1   :  { %4737 = vst [vmem:[#allocation2_spill] sm:$0xff] %v4420_v57  ;;  %v442_v9 = vmax.f32 %v383_v40, 0.0  ;;  %v851_v11 = vmax.f32 %v792_v63, 0.0 }
 0x1b2   :  { %v387_v6 = vpop.f32.mrb[94].mxu0  ;;  %v796_v15 = vpop.f32.mrb[94].mxu1 }
 0x1b3   :  { %v4424_v33 = vmax.f32 %v442_v9, %v851_v11  ;;  %v388_v18 = vadd.f32 %v4272_v27, %v387_v6  ;;  %v2455_v30 = vpop.f32.mrb[95].mxu0  ;;  %v797_v35 = vadd.f32 %v4272_v27, %v796_v15  ;;  %v2634_v37 = vpop.f32.mrb[95].mxu1 }
 0x1b5   :  { %4738 = vst [vmem:[#allocation3_spill] sm:$0xff] %v4424_v33  ;;  %v443_v47 = vmax.f32 %v388_v18, 0.0  ;;  %v852_v48 = vmax.f32 %v797_v35, 0.0 }
 0x1b6   :  { %v392_v57 = vpop.f32.mrb[96].mxu0  ;;  %v801_v53 = vpop.f32.mrb[96].mxu1 }
 0x1b7   :  { %v4428_v41 = vmax.f32 %v443_v47, %v852_v48  ;;  %v393_v4 = vadd.f32 %v4272_v27, %v392_v57  ;;  %v2458_v40 = vpop.f32.mrb[97].mxu0  ;;  %v802_v63 = vadd.f32 %v4272_v27, %v801_v53  ;;  %v2637_v8 = vpop.f32.mrb[97].mxu1 }
 0x1b9   :  { %4739 = vst [vmem:[#allocation4_spill] sm:$0xff] %v4428_v41  ;;  %v444_v9 = vmax.f32 %v393_v4, 0.0  ;;  %v853_v11 = vmax.f32 %v802_v63, 0.0 }
 0x1ba   :  { %v1019_v33 = vpop.f32.mrb[98].mxu0  ;;  %v1477_v6 = vpop.f32.mrb[98].mxu1 }
 0x1bb   :  { %v4432_v30 = vmax.f32 %v444_v9, %v853_v11  ;;  %v1020_v15 = vadd.f32 %v4272_v27, %v1019_v33  ;;  %v2672_v18 = vpop.f32.mrb[99].mxu0  ;;  %v1478_v35 = vadd.f32 %v4272_v27, %v1477_v6  ;;  %v2851_v37 = vpop.f32.mrb[99].mxu1 }
 0x1bd   :  { %4740 = vst [vmem:[#allocation5_spill] sm:$0xff] %v4432_v30  ;;  %v1263_v47 = vmax.f32 %v1020_v15, 0.0  ;;  %v1721_v48 = vmax.f32 %v1478_v35, 0.0 }
 0x1be   :  { %v1024_v41 = vpop.f32.mrb[100].mxu0  ;;  %v1482_v57 = vpop.f32.mrb[100].mxu1 }
 0x1bf   :  { %v1312_v40 = vmax.f32 %v3805_v21, %v1263_v47  ;;  %v1025_v53 = vadd.f32 %v4272_v27, %v1024_v41  ;;  %v2675_v4 = vpop.f32.mrb[101].mxu0  ;;  %v1483_v63 = vadd.f32 %v4272_v27, %v1482_v57  ;;  %v2854_v8 = vpop.f32.mrb[101].mxu1 }
 0x1c1   :  { %v1770_v9 = vmax.f32 %v1312_v40, %v1721_v48  ;;  %v1264_v11 = vmax.f32 %v1025_v53, 0.0  ;;  %v1722_v30 = vmax.f32 %v1483_v63, 0.0 }
 0x1c2   :  { %v1029_v33 = vpop.f32.mrb[102].mxu0  ;;  %v1487_v18 = vpop.f32.mrb[102].mxu1 }
 0x1c3   :  { %1819 = vst [vmem:[%s4736_s3] sm:$0xff] %v1770_v9  ;;  %v1313_v6 = vmax.f32 %v3819_v32, %v1264_v11  ;;  %v1030_v15 = vadd.f32 %v4272_v27, %v1029_v33  ;;  %v2678_v21 = vpop.f32.mrb[103].mxu0  ;;  %v1488_v41 = vadd.f32 %v4272_v27, %v1487_v18  ;;  %v2857_v35 = vpop.f32.mrb[103].mxu1 }
 0x1c5   :  { %v1771_v37 = vmax.f32 %v1313_v6, %v1722_v30  ;;  %v1265_v47 = vmax.f32 %v1030_v15, 0.0  ;;  %v1723_v57 = vmax.f32 %v1488_v41, 0.0 }
 0x1c6   :  { %v1034_v48 = vpop.f32.mrb[104].mxu0  ;;  %v1492_v40 = vpop.f32.mrb[104].mxu1 }
 0x1c7   :  { %1820 = vst [vmem:[%s4736_s3 + $0x8] sm:$0xff] %v1771_v37  ;;  %v1314_v53 = vmax.f32 %v3833_v43, %v1265_v47  ;;  %v1035_v4 = vadd.f32 %v4272_v27, %v1034_v48  ;;  %v2681_v32 = vpop.f32.mrb[105].mxu0  ;;  %v1493_v63 = vadd.f32 %v4272_v27, %v1492_v40  ;;  %v2860_v8 = vpop.f32.mrb[105].mxu1 }
 0x1c9   :  { %v1772_v9 = vmax.f32 %v1314_v53, %v1723_v57  ;;  %v1266_v11 = vmax.f32 %v1035_v4, 0.0  ;;  %v1724_v33 = vmax.f32 %v1493_v63, 0.0 }
 0x1ca   :  { %v1039_v30 = vpop.f32.mrb[106].mxu0  ;;  %v1497_v18 = vpop.f32.mrb[106].mxu1 }
 0x1cb   :  { %1821 = vst [vmem:[%s4736_s3 + $0x10] sm:$0xff] %v1772_v9  ;;  %v1315_v6 = vmax.f32 %v3847_v54, %v1266_v11  ;;  %v1040_v15 = vadd.f32 %v4272_v27, %v1039_v30  ;;  %v2684_v43 = vpop.f32.mrb[107].mxu0  ;;  %v1498_v21 = vadd.f32 %v4272_v27, %v1497_v18  ;;  %v2863_v41 = vpop.f32.mrb[107].mxu1 }
 0x1cd   :  { %v1773_v35 = vmax.f32 %v1315_v6, %v1724_v33  ;;  %v1267_v37 = vmax.f32 %v1040_v15, 0.0  ;;  %v1725_v47 = vmax.f32 %v1498_v21, 0.0 }
 0x1ce   :  { %v1044_v57 = vpop.f32.mrb[108].mxu0  ;;  %v1502_v48 = vpop.f32.mrb[108].mxu1 }
 0x1cf   :  { %1822 = vst [vmem:[%s4736_s3 + $0x18] sm:$0xff] %v1773_v35  ;;  %v1316_v40 = vmax.f32 %v3861_v1, %v1267_v37  ;;  %v1045_v53 = vadd.f32 %v4272_v27, %v1044_v57  ;;  %v2687_v54 = vpop.f32.mrb[109].mxu0  ;;  %v1503_v4 = vadd.f32 %v4272_v27, %v1502_v48  ;;  %v2866_v32 = vpop.f32.mrb[109].mxu1 }
 0x1d1   :  { %v1774_v63 = vmax.f32 %v1316_v40, %v1725_v47  ;;  %v1268_v8 = vmax.f32 %v1045_v53, 0.0  ;;  %v1726_v9 = vmax.f32 %v1503_v4, 0.0 }
 0x1d2   :  { %v1049_v11 = vpop.f32.mrb[110].mxu0  ;;  %v1507_v33 = vpop.f32.mrb[110].mxu1 }
 0x1d3   :  { %1823 = vst [vmem:[%s4736_s3 + $0x20] sm:$0xff] %v1774_v63  ;;  %v1317_v30 = vmax.f32 %v3875_v14, %v1268_v8  ;;  %v1050_v18 = vadd.f32 %v4272_v27, %v1049_v11  ;;  %v2690_v1 = vpop.f32.mrb[111].mxu0  ;;  %v1508_v6 = vadd.f32 %v4272_v27, %v1507_v33  ;;  %v2869_v15 = vpop.f32.mrb[111].mxu1 }
 0x1d5   :  { %v1775_v43 = vmax.f32 %v1317_v30, %v1726_v9  ;;  %v1269_v21 = vmax.f32 %v1050_v18, 0.0  ;;  %v1727_v41 = vmax.f32 %v1508_v6, 0.0 }
 0x1d6   :  { %v1054_v35 = vpop.f32.mrb[112].mxu0  ;;  %v1512_v37 = vpop.f32.mrb[112].mxu1 }
 0x1d7   :  { %1824 = vst [vmem:[%s4736_s3 + $0x28] sm:$0xff] %v1775_v43  ;;  %v1318_v47 = vmax.f32 %v3889_v26, %v1269_v21  ;;  %v1055_v57 = vadd.f32 %v4272_v27, %v1054_v35  ;;  %v2693_v14 = vpop.f32.mrb[113].mxu0  ;;  %v1513_v48 = vadd.f32 %v4272_v27, %v1512_v37  ;;  %v2872_v40 = vpop.f32.mrb[113].mxu1 }
 0x1d9   :  { %v1776_v53 = vmax.f32 %v1318_v47, %v1727_v41  ;;  %v1270_v54 = vmax.f32 %v1055_v57, 0.0  ;;  %v1728_v4 = vmax.f32 %v1513_v48, 0.0 }
 0x1da   :  { %v1059_v32 = vpop.f32.mrb[114].mxu0  ;;  %v1517_v63 = vpop.f32.mrb[114].mxu1 }
 0x1db   :  { %1825 = vst [vmem:[%s4736_s3 + $0x30] sm:$0xff] %v1776_v53  ;;  %v1319_v8 = vmax.f32 %v3903_v38, %v1270_v54  ;;  %v1060_v9 = vadd.f32 %v4272_v27, %v1059_v32  ;;  %v2696_v26 = vpop.f32.mrb[115].mxu0  ;;  %v1518_v11 = vadd.f32 %v4272_v27, %v1517_v63  ;;  %v2875_v33 = vpop.f32.mrb[115].mxu1 }
 0x1dd   :  { %v1777_v30 = vmax.f32 %v1319_v8, %v1728_v4  ;;  %v1271_v18 = vmax.f32 %v1060_v9, 0.0  ;;  %v1729_v1 = vmax.f32 %v1518_v11, 0.0 }
 0x1de   :  { %v1064_v6 = vpop.f32.mrb[116].mxu0  ;;  %v1522_v15 = vpop.f32.mrb[116].mxu1 }
 0x1df   :  { %1826 = vst [vmem:[%s4736_s3 + $0x38] sm:$0xff] %v1777_v30  ;;  %v1320_v43 = vmax.f32 %v3917_v50, %v1271_v18  ;;  %v1065_v21 = vadd.f32 %v4272_v27, %v1064_v6  ;;  %v2699_v38 = vpop.f32.mrb[117].mxu0  ;;  %v1523_v41 = vadd.f32 %v4272_v27, %v1522_v15  ;;  %v2878_v35 = vpop.f32.mrb[117].mxu1 }
 0x1e1   :  { %v1778_v37 = vmax.f32 %v1320_v43, %v1729_v1  ;;  %v1272_v47 = vmax.f32 %v1065_v21, 0.0  ;;  %v1730_v57 = vmax.f32 %v1523_v41, 0.0 }
 0x1e2   :  { %v1069_v14 = vpop.f32.mrb[118].mxu0  ;;  %v1527_v48 = vpop.f32.mrb[118].mxu1 }
 0x1e3   :  { %1827 = vst [vmem:[%s4736_s3 + $0x40] sm:$0xff] %v1778_v37  ;;  %v1321_v40 = vmax.f32 %v3931_v62, %v1272_v47  ;;  %v1070_v53 = vadd.f32 %v4272_v27, %v1069_v14  ;;  %v2702_v50 = vpop.f32.mrb[119].mxu0  ;;  %v1528_v54 = vadd.f32 %v4272_v27, %v1527_v48  ;;  %v2881_v4 = vpop.f32.mrb[119].mxu1 }
 0x1e5   :  { %v1779_v32 = vmax.f32 %v1321_v40, %v1730_v57  ;;  %v1273_v63 = vmax.f32 %v1070_v53, 0.0  ;;  %v1731_v8 = vmax.f32 %v1528_v54, 0.0 }
 0x1e6   :  { %v1074_v9 = vpop.f32.mrb[120].mxu0  ;;  %v1532_v26 = vpop.f32.mrb[120].mxu1 }
 0x1e7   :  { %1828 = vst [vmem:[%s4736_s3 + $0x48] sm:$0xff] %v1779_v32  ;;  %v1322_v11 = vmax.f32 %v3945_v12, %v1273_v63  ;;  %v1075_v33 = vadd.f32 %v4272_v27, %v1074_v9  ;;  %v2705_v62 = vpop.f32.mrb[121].mxu0  ;;  %v1533_v30 = vadd.f32 %v4272_v27, %v1532_v26  ;;  %v2884_v18 = vpop.f32.mrb[121].mxu1 }
 0x1e9   :  { %v1780_v1 = vmax.f32 %v1322_v11, %v1731_v8  ;;  %v1274_v6 = vmax.f32 %v1075_v33, 0.0  ;;  %v1732_v15 = vmax.f32 %v1533_v30, 0.0 }
 0x1ea   :  { %v1079_v43 = vpop.f32.mrb[122].mxu0  ;;  %v1537_v21 = vpop.f32.mrb[122].mxu1 }
 0x1eb   :  { %1829 = vst [vmem:[%s4736_s3 + $0x50] sm:$0xff] %v1780_v1  ;;  %v1323_v38 = vmax.f32 %v3959_v25, %v1274_v6  ;;  %v1080_v41 = vadd.f32 %v4272_v27, %v1079_v43  ;;  %v2708_v12 = vpop.f32.mrb[123].mxu0  ;;  %v1538_v35 = vadd.f32 %v4272_v27, %v1537_v21  ;;  %v2887_v37 = vpop.f32.mrb[123].mxu1 }
 0x1ed   :  { %v1781_v47 = vmax.f32 %v1323_v38, %v1732_v15  ;;  %v1275_v57 = vmax.f32 %v1080_v41, 0.0  ;;  %v1733_v14 = vmax.f32 %v1538_v35, 0.0 }
 0x1ee   :  { %v1084_v48 = vpop.f32.mrb[124].mxu0  ;;  %v1542_v40 = vpop.f32.mrb[124].mxu1 }
 0x1ef   :  { %1830 = vst [vmem:[%s4736_s3 + $0x58] sm:$0xff] %v1781_v47  ;;  %v1324_v53 = vmax.f32 %v3973_v39, %v1275_v57  ;;  %v1085_v50 = vadd.f32 %v4272_v27, %v1084_v48  ;;  %v2711_v25 = vpop.f32.mrb[125].mxu0  ;;  %v1543_v54 = vadd.f32 %v4272_v27, %v1542_v40  ;;  %v2890_v4 = vpop.f32.mrb[125].mxu1 }
 0x1f1   :  { %v1782_v32 = vmax.f32 %v1324_v53, %v1733_v14  ;;  %v1276_v63 = vmax.f32 %v1085_v50, 0.0  ;;  %v1734_v8 = vmax.f32 %v1543_v54, 0.0 }
 0x1f2   :  { %v1089_v9 = vpop.f32.mrb[126].mxu0  ;;  %v1547_v26 = vpop.f32.mrb[126].mxu1 }
 0x1f3   :  { %1831 = vst [vmem:[%s4736_s3 + $0x60] sm:$0xff] %v1782_v32  ;;  %v1325_v11 = vmax.f32 %v3987_v52, %v1276_v63  ;;  %v1090_v33 = vadd.f32 %v4272_v27, %v1089_v9  ;;  %v2714_v39 = vpop.f32.mrb[127].mxu0  ;;  %v1548_v62 = vadd.f32 %v4272_v27, %v1547_v26  ;;  %v2893_v30 = vpop.f32.mrb[127].mxu1 }
 0x1f5   :  { %v1783_v18 = vmax.f32 %v1325_v11, %v1734_v8  ;;  %v1277_v1 = vmax.f32 %v1090_v33, 0.0  ;;  %v1735_v6 = vmax.f32 %v1548_v62, 0.0 }
 0x1f6   :  { %v1094_v15 = vpop.f32.mrb[128].mxu0  ;;  %v1552_v43 = vpop.f32.mrb[128].mxu1 }
 0x1f7   :  { %1832 = vst [vmem:[%s4736_s3 + $0x68] sm:$0xff] %v1783_v18  ;;  %v1326_v21 = vmax.f32 %v4001_v2, %v1277_v1  ;;  %v1095_v38 = vadd.f32 %v4272_v27, %v1094_v15  ;;  %v2717_v52 = vpop.f32.mrb[129].mxu0  ;;  %v1553_v41 = vadd.f32 %v4272_v27, %v1552_v43  ;;  %v2896_v12 = vpop.f32.mrb[129].mxu1 }
 0x1f9   :  { %v1784_v35 = vmax.f32 %v1326_v21, %v1735_v6  ;;  %v1278_v37 = vmax.f32 %v1095_v38, 0.0  ;;  %v1736_v47 = vmax.f32 %v1553_v41, 0.0 }
 0x1fa   :  { %v1099_v57 = vpop.f32.mrb[130].mxu0  ;;  %v1557_v14 = vpop.f32.mrb[130].mxu1 }
 0x1fb   :  { %1833 = vst [vmem:[%s4736_s3 + $0x70] sm:$0xff] %v1784_v35  ;;  %v1327_v48 = vmax.f32 %v4015_v17, %v1278_v37  ;;  %v1100_v40 = vadd.f32 %v4272_v27, %v1099_v57  ;;  %v2720_v2 = vpop.f32.mrb[131].mxu0  ;;  %v1558_v53 = vadd.f32 %v4272_v27, %v1557_v14  ;;  %v2899_v50 = vpop.f32.mrb[131].mxu1 }
 0x1fd   :  { %v1785_v25 = vmax.f32 %v1327_v48, %v1736_v47  ;;  %v1279_v54 = vmax.f32 %v1100_v40, 0.0  ;;  %v1737_v4 = vmax.f32 %v1558_v53, 0.0 }
 0x1fe   :  { %v1104_v32 = vpop.f32.mrb[132].mxu0  ;;  %v1562_v63 = vpop.f32.mrb[132].mxu1 }
 0x1ff   :  { %1834 = vst [vmem:[%s4736_s3 + $0x78] sm:$0xff] %v1785_v25  ;;  %v1328_v8 = vmax.f32 %v4029_v31, %v1279_v54  ;;  %v1105_v9 = vadd.f32 %v4272_v27, %v1104_v32  ;;  %v2723_v17 = vpop.f32.mrb[133].mxu0  ;;  %v1563_v26 = vadd.f32 %v4272_v27, %v1562_v63  ;;  %v2902_v11 = vpop.f32.mrb[133].mxu1 }
 0x201   :  { %v1786_v33 = vmax.f32 %v1328_v8, %v1737_v4  ;;  %v1280_v39 = vmax.f32 %v1105_v9, 0.0  ;;  %v1738_v62 = vmax.f32 %v1563_v26, 0.0 }
 0x202   :  { %v1109_v30 = vpop.f32.mrb[134].mxu0  ;;  %v1567_v18 = vpop.f32.mrb[134].mxu1 }
 0x203   :  { %1835 = vst [vmem:[%s4736_s3 + $0x80] sm:$0xff] %v1786_v33  ;;  %v1329_v1 = vmax.f32 %v4043_v46, %v1280_v39  ;;  %v1110_v6 = vadd.f32 %v4272_v27, %v1109_v30  ;;  %v2726_v31 = vpop.f32.mrb[135].mxu0  ;;  %v1568_v15 = vadd.f32 %v4272_v27, %v1567_v18  ;;  %v2905_v43 = vpop.f32.mrb[135].mxu1 }
 0x205   :  { %v1787_v21 = vmax.f32 %v1329_v1, %v1738_v62  ;;  %v1281_v38 = vmax.f32 %v1110_v6, 0.0  ;;  %v1739_v52 = vmax.f32 %v1568_v15, 0.0 }
 0x206   :  { %v1114_v41 = vpop.f32.mrb[136].mxu0  ;;  %v1572_v12 = vpop.f32.mrb[136].mxu1 }
 0x207   :  { %1836 = vst [vmem:[%s4736_s3 + $0x88] sm:$0xff] %v1787_v21  ;;  %v1330_v35 = vmax.f32 %v4057_v60, %v1281_v38  ;;  %v1115_v37 = vadd.f32 %v4272_v27, %v1114_v41  ;;  %v2729_v46 = vpop.f32.mrb[137].mxu0  ;;  %v1573_v47 = vadd.f32 %v4272_v27, %v1572_v12  ;;  %v2908_v57 = vpop.f32.mrb[137].mxu1 }
 0x209   :  { %v1788_v14 = vmax.f32 %v1330_v35, %v1739_v52  ;;  %v1282_v48 = vmax.f32 %v1115_v37, 0.0  ;;  %v1740_v40 = vmax.f32 %v1573_v47, 0.0 }
 0x20a   :  { %v1119_v2 = vpop.f32.mrb[138].mxu0  ;;  %v1577_v53 = vpop.f32.mrb[138].mxu1 }
 0x20b   :  { %1837 = vst [vmem:[%s4736_s3 + $0x90] sm:$0xff] %v1788_v14  ;;  %v1331_v50 = vmax.f32 %v4071_v13, %v1282_v48  ;;  %v1120_v25 = vadd.f32 %v4272_v27, %v1119_v2  ;;  %v2732_v60 = vpop.f32.mrb[139].mxu0  ;;  %v1578_v54 = vadd.f32 %v4272_v27, %v1577_v53  ;;  %v2911_v4 = vpop.f32.mrb[139].mxu1 }
 0x20d   :  { %v1789_v32 = vmax.f32 %v1331_v50, %v1740_v40  ;;  %v1283_v63 = vmax.f32 %v1120_v25, 0.0  ;;  %v1741_v8 = vmax.f32 %v1578_v54, 0.0 }
 0x20e   :  { %v1124_v9 = vpop.f32.mrb[140].mxu0  ;;  %v1582_v17 = vpop.f32.mrb[140].mxu1 }
 0x20f   :  { %1838 = vst [vmem:[%s4736_s3 + $0x98] sm:$0xff] %v1789_v32  ;;  %v1332_v26 = vmax.f32 %v4085_v29, %v1283_v63  ;;  %v1125_v11 = vadd.f32 %v4272_v27, %v1124_v9  ;;  %v2735_v13 = vpop.f32.mrb[141].mxu0  ;;  %v1583_v33 = vadd.f32 %v4272_v27, %v1582_v17  ;;  %v2914_v39 = vpop.f32.mrb[141].mxu1 }
 0x211   :  { %v1790_v62 = vmax.f32 %v1332_v26, %v1741_v8  ;;  %v1284_v30 = vmax.f32 %v1125_v11, 0.0  ;;  %v1742_v18 = vmax.f32 %v1583_v33, 0.0 }
 0x212   :  { %v1129_v1 = vpop.f32.mrb[142].mxu0  ;;  %v1587_v6 = vpop.f32.mrb[142].mxu1 }
 0x213   :  { %1839 = vst [vmem:[%s4736_s3 + $0xa0] sm:$0xff] %v1790_v62  ;;  %v1333_v31 = vmax.f32 %v4099_v45, %v1284_v30  ;;  %v1130_v15 = vadd.f32 %v4272_v27, %v1129_v1  ;;  %v2738_v29 = vpop.f32.mrb[143].mxu0  ;;  %v1588_v43 = vadd.f32 %v4272_v27, %v1587_v6  ;;  %v2917_v21 = vpop.f32.mrb[143].mxu1 }
 0x215   :  { %v1791_v38 = vmax.f32 %v1333_v31, %v1742_v18  ;;  %v1285_v52 = vmax.f32 %v1130_v15, 0.0  ;;  %v1743_v41 = vmax.f32 %v1588_v43, 0.0 }
 0x216   :  { %v1134_v12 = vpop.f32.mrb[144].mxu0  ;;  %v1592_v35 = vpop.f32.mrb[144].mxu1 }
 0x217   :  { %1840 = vst [vmem:[%s4736_s3 + $0xa8] sm:$0xff] %v1791_v38  ;;  %v1334_v37 = vmax.f32 %v4113_v61, %v1285_v52  ;;  %v1135_v46 = vadd.f32 %v4272_v27, %v1134_v12  ;;  %v2741_v45 = vpop.f32.mrb[145].mxu0  ;;  %v1593_v47 = vadd.f32 %v4272_v27, %v1592_v35  ;;  %v2920_v57 = vpop.f32.mrb[145].mxu1 }
 0x219   :  { %v1792_v14 = vmax.f32 %v1334_v37, %v1743_v41  ;;  %v1286_v48 = vmax.f32 %v1135_v46, 0.0  ;;  %v1744_v40 = vmax.f32 %v1593_v47, 0.0 }
 0x21a   :  { %v1139_v2 = vpop.f32.mrb[146].mxu0  ;;  %v1597_v53 = vpop.f32.mrb[146].mxu1 }
 0x21b   :  { %1841 = vst [vmem:[%s4736_s3 + $0xb0] sm:$0xff] %v1792_v14  ;;  %v1335_v50 = vmax.f32 %v4127_v16, %v1286_v48  ;;  %v1140_v25 = vadd.f32 %v4272_v27, %v1139_v2  ;;  %v2744_v61 = vpop.f32.mrb[147].mxu0  ;;  %v1598_v60 = vadd.f32 %v4272_v27, %v1597_v53  ;;  %v2923_v54 = vpop.f32.mrb[147].mxu1 }
 0x21d   :  { %v1793_v4 = vmax.f32 %v1335_v50, %v1744_v40  ;;  %v1287_v32 = vmax.f32 %v1140_v25, 0.0  ;;  %v1745_v63 = vmax.f32 %v1598_v60, 0.0 }
 0x21e   :  { %v1144_v8 = vpop.f32.mrb[148].mxu0  ;;  %v1602_v9 = vpop.f32.mrb[148].mxu1 }
 0x21f   :  { %1842 = vst [vmem:[%s4736_s3 + $0xb8] sm:$0xff] %v1793_v4  ;;  %v1336_v17 = vmax.f32 %v4141_v34, %v1287_v32  ;;  %v1145_v26 = vadd.f32 %v4272_v27, %v1144_v8  ;;  %v2747_v16 = vpop.f32.mrb[149].mxu0  ;;  %v1603_v11 = vadd.f32 %v4272_v27, %v1602_v9  ;;  %v2926_v13 = vpop.f32.mrb[149].mxu1 }
 0x221   :  { %v1794_v33 = vmax.f32 %v1336_v17, %v1745_v63  ;;  %v1288_v39 = vmax.f32 %v1145_v26, 0.0  ;;  %v1746_v62 = vmax.f32 %v1603_v11, 0.0 }
 0x222   :  { %v1149_v30 = vpop.f32.mrb[150].mxu0  ;;  %v1607_v18 = vpop.f32.mrb[150].mxu1 }
 0x223   :  { %1843 = vst [vmem:[%s4736_s3 + $0xc0] sm:$0xff] %v1794_v33  ;;  %v1337_v1 = vmax.f32 %v4155_v51, %v1288_v39  ;;  %v1150_v6 = vadd.f32 %v4272_v27, %v1149_v30  ;;  %v2750_v34 = vpop.f32.mrb[151].mxu0  ;;  %v1608_v31 = vadd.f32 %v4272_v27, %v1607_v18  ;;  %v2929_v15 = vpop.f32.mrb[151].mxu1 }
 0x225   :  { %v1795_v29 = vmax.f32 %v1337_v1, %v1746_v62  ;;  %v1289_v43 = vmax.f32 %v1150_v6, 0.0  ;;  %v1747_v21 = vmax.f32 %v1608_v31, 0.0 }
 0x226   :  { %v1154_v38 = vpop.f32.mrb[152].mxu0  ;;  %v1612_v52 = vpop.f32.mrb[152].mxu1 }
 0x227   :  { %1844 = vst [vmem:[%s4736_s3 + $0xc8] sm:$0xff] %v1795_v29  ;;  %v1338_v41 = vmax.f32 %v4169_v7, %v1289_v43  ;;  %v1155_v12 = vadd.f32 %v4272_v27, %v1154_v38  ;;  %v2753_v51 = vpop.f32.mrb[153].mxu0  ;;  %v1613_v35 = vadd.f32 %v4272_v27, %v1612_v52  ;;  %v2932_v37 = vpop.f32.mrb[153].mxu1 }
 0x229   :  { %v1796_v46 = vmax.f32 %v1338_v41, %v1747_v21  ;;  %v1290_v45 = vmax.f32 %v1155_v12, 0.0  ;;  %v1748_v47 = vmax.f32 %v1613_v35, 0.0 }
 0x22a   :  { %v1159_v57 = vpop.f32.mrb[154].mxu0  ;;  %v1617_v14 = vpop.f32.mrb[154].mxu1 }
 0x22b   :  { %1845 = vst [vmem:[%s4736_s3 + $0xd0] sm:$0xff] %v1796_v46  ;;  %v1339_v48 = vmax.f32 %v4183_v24, %v1290_v45  ;;  %v1160_v40 = vadd.f32 %v4272_v27, %v1159_v57  ;;  %v2756_v7 = vpop.f32.mrb[155].mxu0  ;;  %v1618_v2 = vadd.f32 %v4272_v27, %v1617_v14  ;;  %v2935_v53 = vpop.f32.mrb[155].mxu1  ;;  %v4608_v24 = vld [vmem:[%s4735_s2] ss:$0 sm:$0xff] }
 0x22d   :  { %v1797_v50 = vmax.f32 %v1339_v48, %v1748_v47  ;;  %v1291_v25 = vmax.f32 %v1160_v40, 0.0  ;;  %v1749_v61 = vmax.f32 %v1618_v2, 0.0 }
 0x22e   :  { %v1164_v60 = vpop.f32.mrb[156].mxu0  ;;  %v1622_v54 = vpop.f32.mrb[156].mxu1 }
 0x22f   :  { %1846 = vst [vmem:[%s4736_s3 + $0xd8] sm:$0xff] %v1797_v50  ;;  %v1340_v4 = vmax.f32 %v4197_v44, %v1291_v25  ;;  %v1165_v32 = vadd.f32 %v4608_v24, %v1164_v60  ;;  %v2759_v27 = vpop.f32.mrb[157].mxu0  ;;  %v1623_v63 = vadd.f32 %v4608_v24, %v1622_v54  ;;  %v2938_v8 = vpop.f32.mrb[157].mxu1 }
 0x231   :  { %v1798_v9 = vmax.f32 %v1340_v4, %v1749_v61  ;;  %v1292_v17 = vmax.f32 %v1165_v32, 0.0  ;;  %v1750_v26 = vmax.f32 %v1623_v63, 0.0 }
 0x232   :  { %v1169_v16 = vpop.f32.mrb[158].mxu0  ;;  %v1627_v11 = vpop.f32.mrb[158].mxu1 }
 0x233   :  { %1847 = vst [vmem:[%s4736_s3 + $0xe0] sm:$0xff] %v1798_v9  ;;  %v1341_v44 = vmax.f32 %v4211_v0, %v1292_v17  ;;  %v1170_v13 = vadd.f32 %v4608_v24, %v1169_v16  ;;  %v2762_v33 = vpop.f32.mrb[159].mxu0  ;;  %v1628_v39 = vadd.f32 %v4608_v24, %v1627_v11  ;;  %v2941_v62 = vpop.f32.mrb[159].mxu1 }
 0x235   :  { %v1799_v30 = vmax.f32 %v1341_v44, %v1750_v26  ;;  %v1293_v18 = vmax.f32 %v1170_v13, 0.0  ;;  %v1751_v1 = vmax.f32 %v1628_v39, 0.0 }
 0x236   :  { %v1174_v6 = vpop.f32.mrb[160].mxu0  ;;  %v1632_v34 = vpop.f32.mrb[160].mxu1 }
 0x237   :  { %1848 = vst [vmem:[%s4736_s3 + $0xe8] sm:$0xff] %v1799_v30  ;;  %v1342_v31 = vmax.f32 %v4225_v22, %v1293_v18  ;;  %v1175_v15 = vadd.f32 %v4608_v24, %v1174_v6  ;;  %v2765_v0 = vpop.f32.mrb[161].mxu0  ;;  %v1633_v29 = vadd.f32 %v4608_v24, %v1632_v34  ;;  %v2944_v43 = vpop.f32.mrb[161].mxu1 }
 0x239   :  { %v1800_v21 = vmax.f32 %v1342_v31, %v1751_v1  ;;  %v1294_v38 = vmax.f32 %v1175_v15, 0.0  ;;  %v1752_v52 = vmax.f32 %v1633_v29, 0.0 }
 0x23a   :  { %v1179_v41 = vpop.f32.mrb[162].mxu0  ;;  %v1637_v12 = vpop.f32.mrb[162].mxu1 }
 0x23b   :  { %1849 = vst [vmem:[%s4736_s3 + $0xf0] sm:$0xff] %v1800_v21  ;;  %v1343_v51 = vmax.f32 %v4239_v42, %v1294_v38  ;;  %v1180_v35 = vadd.f32 %v4608_v24, %v1179_v41  ;;  %v2768_v22 = vpop.f32.mrb[163].mxu0  ;;  %v1638_v37 = vadd.f32 %v4608_v24, %v1637_v12  ;;  %v2947_v46 = vpop.f32.mrb[163].mxu1 }
 0x23d   :  { %v1801_v45 = vmax.f32 %v1343_v51, %v1752_v52  ;;  %v1295_v47 = vmax.f32 %v1180_v35, 0.0  ;;  %v1753_v57 = vmax.f32 %v1638_v37, 0.0 }
 0x23e   :  { %v1184_v14 = vpop.f32.mrb[164].mxu0  ;;  %v1642_v48 = vpop.f32.mrb[164].mxu1 }
 0x23f   :  { %1850 = vst [vmem:[%s4736_s3 + $0xf8] sm:$0xff] %v1801_v45  ;;  %v1344_v40 = vmax.f32 %v4253_v3, %v1295_v47  ;;  %v1185_v7 = vadd.f32 %v4608_v24, %v1184_v14  ;;  %v2771_v42 = vpop.f32.mrb[165].mxu0  ;;  %v1643_v2 = vadd.f32 %v4608_v24, %v1642_v48  ;;  %v2950_v53 = vpop.f32.mrb[165].mxu1 }
 0x241   :  { %v1802_v50 = vmax.f32 %v1344_v40, %v1753_v57  ;;  %v1296_v25 = vmax.f32 %v1185_v7, 0.0  ;;  %v1754_v61 = vmax.f32 %v1643_v2, 0.0 }
 0x242   :  { %v1189_v60 = vpop.f32.mrb[166].mxu0  ;;  %v1647_v54 = vpop.f32.mrb[166].mxu1 }
 0x243   :  { %1851 = vst [vmem:[%s4736_s3 + $0x100] sm:$0xff] %v1802_v50  ;;  %v1345_v4 = vmax.f32 %v4267_v23, %v1296_v25  ;;  %v1190_v32 = vadd.f32 %v4608_v24, %v1189_v60  ;;  %v2774_v3 = vpop.f32.mrb[167].mxu0  ;;  %v1648_v27 = vadd.f32 %v4608_v24, %v1647_v54  ;;  %v2953_v63 = vpop.f32.mrb[167].mxu1 }
 0x245   :  { %v1803_v8 = vmax.f32 %v1345_v4, %v1754_v61  ;;  %v1297_v9 = vmax.f32 %v1190_v32, 0.0  ;;  %v1755_v17 = vmax.f32 %v1648_v27, 0.0 }
 0x246   :  { %v1194_v26 = vpop.f32.mrb[168].mxu0  ;;  %v1652_v16 = vpop.f32.mrb[168].mxu1 }
 0x247   :  { %1852 = vst [vmem:[%s4736_s3 + $0x108] sm:$0xff] %v1803_v8  ;;  %v1346_v11 = vmax.f32 %v4286_v49, %v1297_v9  ;;  %v1195_v44 = vadd.f32 %v4608_v24, %v1194_v26  ;;  %v2777_v23 = vpop.f32.mrb[169].mxu0  ;;  %v1653_v13 = vadd.f32 %v4608_v24, %v1652_v16  ;;  %v2956_v33 = vpop.f32.mrb[169].mxu1 }
 0x249   :  { %v1804_v39 = vmax.f32 %v1346_v11, %v1755_v17  ;;  %v1298_v62 = vmax.f32 %v1195_v44, 0.0  ;;  %v1756_v30 = vmax.f32 %v1653_v13, 0.0 }
 0x24a   :  { %v1199_v18 = vpop.f32.mrb[170].mxu0  ;;  %v1657_v1 = vpop.f32.mrb[170].mxu1 }
 0x24b   :  { %1853 = vst [vmem:[%s4736_s3 + $0x110] sm:$0xff] %v1804_v39  ;;  %v1347_v6 = vmax.f32 %v4300_v10, %v1298_v62  ;;  %v1200_v34 = vadd.f32 %v4608_v24, %v1199_v18  ;;  %v2780_v49 = vpop.f32.mrb[171].mxu0  ;;  %v1658_v31 = vadd.f32 %v4608_v24, %v1657_v1  ;;  %v2959_v15 = vpop.f32.mrb[171].mxu1 }
 0x24d   :  { %v1805_v0 = vmax.f32 %v1347_v6, %v1756_v30  ;;  %v1299_v29 = vmax.f32 %v1200_v34, 0.0  ;;  %v1757_v43 = vmax.f32 %v1658_v31, 0.0 }
 0x24e   :  { %v1204_v21 = vpop.f32.mrb[172].mxu0  ;;  %v1662_v38 = vpop.f32.mrb[172].mxu1 }
 0x24f   :  { %1854 = vst [vmem:[%s4736_s3 + $0x118] sm:$0xff] %v1805_v0  ;;  %v1348_v52 = vmax.f32 %v4314_v36, %v1299_v29  ;;  %v1205_v41 = vadd.f32 %v4608_v24, %v1204_v21  ;;  %v2783_v10 = vpop.f32.mrb[173].mxu0  ;;  %v1663_v12 = vadd.f32 %v4608_v24, %v1662_v38  ;;  %v2962_v51 = vpop.f32.mrb[173].mxu1 }
 0x251   :  { %v1806_v35 = vmax.f32 %v1348_v52, %v1757_v43  ;;  %v1300_v22 = vmax.f32 %v1205_v41, 0.0  ;;  %v1758_v37 = vmax.f32 %v1663_v12, 0.0 }
 0x252   :  { %v1209_v46 = vpop.f32.mrb[174].mxu0  ;;  %v1667_v45 = vpop.f32.mrb[174].mxu1 }
 0x253   :  { %1855 = vst [vmem:[%s4736_s3 + $0x120] sm:$0xff] %v1806_v35  ;;  %v1349_v47 = vmax.f32 %v4328_v59, %v1300_v22  ;;  %v1210_v57 = vadd.f32 %v4608_v24, %v1209_v46  ;;  %v2786_v36 = vpop.f32.mrb[175].mxu0  ;;  %v1668_v14 = vadd.f32 %v4608_v24, %v1667_v45  ;;  %v2965_v48 = vpop.f32.mrb[175].mxu1 }
 0x255   :  { %v1807_v40 = vmax.f32 %v1349_v47, %v1758_v37  ;;  %v1301_v7 = vmax.f32 %v1210_v57, 0.0  ;;  %v1759_v42 = vmax.f32 %v1668_v14, 0.0 }
 0x256   :  { %v1214_v2 = vpop.f32.mrb[176].mxu0  ;;  %v1672_v53 = vpop.f32.mrb[176].mxu1 }
 0x257   :  { %1856 = vst [vmem:[%s4736_s3 + $0x128] sm:$0xff] %v1807_v40  ;;  %v1350_v50 = vmax.f32 %v4342_v28, %v1301_v7  ;;  %v1215_v25 = vadd.f32 %v4608_v24, %v1214_v2  ;;  %v2789_v59 = vpop.f32.mrb[177].mxu0  ;;  %v1673_v61 = vadd.f32 %v4608_v24, %v1672_v53  ;;  %v2968_v60 = vpop.f32.mrb[177].mxu1 }
 0x259   :  { %v1808_v54 = vmax.f32 %v1350_v50, %v1759_v42  ;;  %v1302_v4 = vmax.f32 %v1215_v25, 0.0  ;;  %v1760_v32 = vmax.f32 %v1673_v61, 0.0 }
 0x25a   :  { %v1219_v3 = vpop.f32.mrb[178].mxu0  ;;  %v1677_v27 = vpop.f32.mrb[178].mxu1 }
 0x25b   :  { %1857 = vst [vmem:[%s4736_s3 + $0x130] sm:$0xff] %v1808_v54  ;;  %v1351_v63 = vmax.f32 %v4356_v56, %v1302_v4  ;;  %v1220_v8 = vadd.f32 %v4608_v24, %v1219_v3  ;;  %v2792_v28 = vpop.f32.mrb[179].mxu0  ;;  %v1678_v9 = vadd.f32 %v4608_v24, %v1677_v27  ;;  %v2971_v17 = vpop.f32.mrb[179].mxu1  ;;  %v4741_v3 = vld [vmem:[#allocation2_spill] sm:$0xff] }
 0x25d   :  { %v1809_v26 = vmax.f32 %v1351_v63, %v1760_v32  ;;  %v1303_v16 = vmax.f32 %v1220_v8, 0.0  ;;  %v1761_v11 = vmax.f32 %v1678_v9, 0.0 }
 0x25e   :  { %v1224_v44 = vpop.f32.mrb[180].mxu0  ;;  %v1682_v23 = vpop.f32.mrb[180].mxu1 }
 0x25f   :  { %1858 = vst [vmem:[%s4736_s3 + $0x138] sm:$0xff] %v1809_v26  ;;  %v1352_v13 = vmax.f32 %v4370_v5, %v1303_v16  ;;  %v1225_v33 = vadd.f32 %v4608_v24, %v1224_v44  ;;  %v2795_v56 = vpop.f32.mrb[181].mxu0  ;;  %v1683_v39 = vadd.f32 %v4608_v24, %v1682_v23  ;;  %v2974_v62 = vpop.f32.mrb[181].mxu1  ;;  %v4742_v44 = vld [vmem:[#allocation3_spill] sm:$0xff] }
 0x261   :  { %v1810_v30 = vmax.f32 %v1352_v13, %v1761_v11  ;;  %v1304_v18 = vmax.f32 %v1225_v33, 0.0  ;;  %v1762_v1 = vmax.f32 %v1683_v39, 0.0 }
 0x262   :  { %v1229_v6 = vpop.f32.mrb[182].mxu0  ;;  %v1687_v34 = vpop.f32.mrb[182].mxu1 }
 0x263   :  { %1859 = vst [vmem:[%s4736_s3 + $0x140] sm:$0xff] %v1810_v30  ;;  %v1353_v49 = vmax.f32 %v4384_v55, %v1304_v18  ;;  %v1230_v31 = vadd.f32 %v4608_v24, %v1229_v6  ;;  %v2798_v5 = vpop.f32.mrb[183].mxu0  ;;  %v1688_v15 = vadd.f32 %v4608_v24, %v1687_v34  ;;  %v2977_v0 = vpop.f32.mrb[183].mxu1  ;;  %v4743_v34 = vld [vmem:[#allocation4_spill] sm:$0xff] }
 0x265   :  { %v1811_v29 = vmax.f32 %v1353_v49, %v1762_v1  ;;  %v1305_v43 = vmax.f32 %v1230_v31, 0.0  ;;  %v1763_v21 = vmax.f32 %v1688_v15, 0.0 }
 0x266   :  { %v1234_v38 = vpop.f32.mrb[184].mxu0  ;;  %v1692_v52 = vpop.f32.mrb[184].mxu1 }
 0x267   :  { %1860 = vst [vmem:[%s4736_s3 + $0x148] sm:$0xff] %v1811_v29  ;;  %v1354_v41 = vmax.f32 %v4398_v20, %v1305_v43  ;;  %v1235_v10 = vadd.f32 %v4608_v24, %v1234_v38  ;;  %v2801_v55 = vpop.f32.mrb[185].mxu0  ;;  %v1693_v12 = vadd.f32 %v4608_v24, %v1692_v52  ;;  %v2980_v51 = vpop.f32.mrb[185].mxu1  ;;  %v4744_v38 = vld [vmem:[#allocation5_spill] sm:$0xff] }
 0x269   :  { %v1812_v35 = vmax.f32 %v1354_v41, %v1763_v21  ;;  %v1306_v22 = vmax.f32 %v1235_v10, 0.0  ;;  %v1764_v37 = vmax.f32 %v1693_v12, 0.0 }
 0x26a   :  { %v1239_v46 = vpop.f32.mrb[186].mxu0  ;;  %v1697_v45 = vpop.f32.mrb[186].mxu1 }
 0x26b   :  { %1861 = vst [vmem:[%s4736_s3 + $0x150] sm:$0xff] %v1812_v35  ;;  %v1355_v47 = vmax.f32 %v4412_v58, %v1306_v22  ;;  %v1240_v57 = vadd.f32 %v4608_v24, %v1239_v46  ;;  %v2804_v20 = vpop.f32.mrb[187].mxu0  ;;  %v1698_v36 = vadd.f32 %v4608_v24, %v1697_v45  ;;  %v2983_v14 = vpop.f32.mrb[187].mxu1 }
 0x26d   :  { %v1813_v48 = vmax.f32 %v1355_v47, %v1764_v37  ;;  %v1307_v40 = vmax.f32 %v1240_v57, 0.0  ;;  %v1765_v7 = vmax.f32 %v1698_v36, 0.0 }
 0x26e   :  { %v1244_v42 = vpop.f32.mrb[188].mxu0  ;;  %v1702_v2 = vpop.f32.mrb[188].mxu1 }
 0x26f   :  { %1862 = vst [vmem:[%s4736_s3 + $0x158] sm:$0xff] %v1813_v48  ;;  %v1356_v53 = vmax.f32 %v4416_v19, %v1307_v40  ;;  %v1245_v50 = vadd.f32 %v4608_v24, %v1244_v42  ;;  %v2807_v58 = vpop.f32.mrb[189].mxu0  ;;  %v1703_v25 = vadd.f32 %v4608_v24, %v1702_v2  ;;  %v2986_v59 = vpop.f32.mrb[189].mxu1 }
 0x271   :  { %v1814_v61 = vmax.f32 %v1356_v53, %v1765_v7  ;;  %v1308_v60 = vmax.f32 %v1245_v50, 0.0  ;;  %v1766_v54 = vmax.f32 %v1703_v25, 0.0 }
 0x272   :  { %v1249_v4 = vpop.f32.mrb[190].mxu0  ;;  %v1707_v32 = vpop.f32.mrb[190].mxu1 }
 0x273   :  { %1863 = vst [vmem:[%s4736_s3 + $0x160] sm:$0xff] %v1814_v61  ;;  %v1357_v27 = vmax.f32 %v4741_v3, %v1308_v60  ;;  %v1250_v63 = vadd.f32 %v4608_v24, %v1249_v4  ;;  %v2810_v19 = vpop.f32.mrb[191].mxu0  ;;  %v1708_v8 = vadd.f32 %v4608_v24, %v1707_v32  ;;  %v2989_v28 = vpop.f32.mrb[191].mxu1 }
 0x275   :  { %v1815_v9 = vmax.f32 %v1357_v27, %v1766_v54  ;;  %v1309_v17 = vmax.f32 %v1250_v63, 0.0  ;;  %v1767_v26 = vmax.f32 %v1708_v8, 0.0 }
 0x276   :  { %v1254_v16 = vpop.f32.mrb[192].mxu0  ;;  %v1712_v11 = vpop.f32.mrb[192].mxu1 }
 0x277   :  { %1864 = vst [vmem:[%s4736_s3 + $0x168] sm:$0xff] %v1815_v9  ;;  %v1358_v23 = vmax.f32 %v4742_v44, %v1309_v17  ;;  %v1255_v13 = vadd.f32 %v4608_v24, %v1254_v16  ;;  %v2813_v33 = vpop.f32.mrb[193].mxu0  ;;  %v1713_v56 = vadd.f32 %v4608_v24, %v1712_v11  ;;  %v2992_v39 = vpop.f32.mrb[193].mxu1 }
 0x279   :  { %v1816_v62 = vmax.f32 %v1358_v23, %v1767_v26  ;;  %v1310_v30 = vmax.f32 %v1255_v13, 0.0  ;;  %v1768_v18 = vmax.f32 %v1713_v56, 0.0 }
 0x27a   :  { %v1259_v1 = vpop.f32.mrb[194].mxu0  ;;  %v1717_v6 = vpop.f32.mrb[194].mxu1 }
 0x27b   :  { %1865 = vst [vmem:[%s4736_s3 + $0x170] sm:$0xff] %v1816_v62  ;;  %v1359_v49 = vmax.f32 %v4743_v34, %v1310_v30  ;;  %v1260_v31 = vadd.f32 %v4608_v24, %v1259_v1  ;;  %v2816_v5 = vpop.f32.mrb[195].mxu0  ;;  %v1718_v15 = vadd.f32 %v4608_v24, %v1717_v6  ;;  %v2995_v0 = vpop.f32.mrb[195].mxu1 }
 0x27d   :  { %v1817_v29 = vmax.f32 %v1359_v49, %v1768_v18  ;;  %v1311_v43 = vmax.f32 %v1260_v31, 0.0  ;;  %v1769_v21 = vmax.f32 %v1718_v15, 0.0 }
 0x27f   :  { %1866 = vst [vmem:[%s4736_s3 + $0x178] sm:$0xff] %v1817_v29  ;;  %v1360_v52 = vmax.f32 %v4744_v38, %v1311_v43 }
 0x281   :  { %v1818_v41 = vmax.f32 %v1360_v52, %v1769_v21 }
 0x283   :  { %1867 = vst [vmem:[%s4736_s3 + $0x180] sm:$0xff] %v1818_v41 }

// kernel: net_forward.4
= control target key start
LH: loop header
LB: loop body
LE: loop exit
PB: predicated region body
PF: predicated region fallthrough
CT: control target
= control target key end

     0   :  { %s1410_s1 = inlined_call_operand.vmem [shape: f32[256,128], index: 1, kind: input, shape index: {}]   ;;  %s1411_s0 = inlined_call_operand.vmem [shape: f32[4,56,256], index: 0, kind: input, shape index: {}]   ;;  %s1412_s2 = inlined_call_operand.vmem [shape: f32[1,128], index: 2, kind: input, shape index: {}]   ;;  %s1413_s3 = inlined_call_operand.vmem [shape: f32[56,128], index: 3, kind: output, shape index: {}]  }
   0x1   :  { %v30_v0 = vld [vmem:[%s1410_s1 + $0x80] sm:$0xff]  ;;  %v31_v1 = vld [vmem:[%s1410_s1 + $0x88] sm:$0xff]  ;;  %v32_v5 = vld [vmem:[%s1410_s1 + $0x90] sm:$0xff] }
   0x2   :  { %v14_v2 = vld [vmem:[%s1410_s1] sm:$0xff]  ;;  %v984_v3 = vpack.c.bf16 %v31_v1, %v30_v0  ;;  %v15_v4 = vld [vmem:[%s1410_s1 + $0x8] sm:$0xff]  ;;  %v33_v6 = vld [vmem:[%s1410_s1 + $0x98] sm:$0xff] }
   0x3   :  { %v995_v7 = vpack.c.bf16 %v15_v4, %v14_v2  ;;  %v997_v8 = vpack.c.bf16 %v33_v6, %v32_v5  ;;  %v16_v9 = vld [vmem:[%s1410_s1 + $0x10] sm:$0xff]  ;;  %v17_v10 = vld [vmem:[%s1410_s1 + $0x18] sm:$0xff]  ;;  %v34_v11 = vld [vmem:[%s1410_s1 + $0xa0] sm:$0xff] }
   0x4   :  { %828 = vmatprep.subr.bf16.mxu0 %v984_v3  ;;  %860 = vmatprep.subr.bf16.mxu1 %v984_v3  ;;  %v35_v12 = vld [vmem:[%s1410_s1 + $0xa8] sm:$0xff]  ;;  %v1015_v13 = vpack.c.bf16 %v17_v10, %v16_v9  ;;  %v18_v15 = vld [vmem:[%s1410_s1 + $0x20] sm:$0xff]  ;;  %v36_v17 = vld [vmem:[%s1410_s1 + $0xb0] sm:$0xff] }
   0x5   :  { %830 = vmatpush3.bf16.msra.mxu0 %v995_v7  ;;  %862 = vmatpush3.bf16.msra.mxu1 %v995_v7  ;;  %v1019_v14 = vpack.c.bf16 %v35_v12, %v34_v11  ;;  %v19_v16 = vld [vmem:[%s1410_s1 + $0x28] sm:$0xff]  ;;  %v37_v18 = vld [vmem:[%s1410_s1 + $0xb8] sm:$0xff]  ;;  %v20_v21 = vld [vmem:[%s1410_s1 + $0x30] sm:$0xff] }
   0x6   :  { %832 = vmatprep.subr.bf16.mxu0 %v997_v8  ;;  %864 = vmatprep.subr.bf16.mxu1 %v997_v8  ;;  %v1035_v19 = vpack.c.bf16 %v19_v16, %v18_v15  ;;  %v1039_v20 = vpack.c.bf16 %v37_v18, %v36_v17  ;;  %v21_v22 = vld [vmem:[%s1410_s1 + $0x38] sm:$0xff]  ;;  %v38_v23 = vld [vmem:[%s1410_s1 + $0xc0] sm:$0xff]  ;;  %v39_v24 = vld [vmem:[%s1410_s1 + $0xc8] sm:$0xff] }
   0x7   :  { %v48_v25 = vld [vmem:[%s1411_s0 + $0x8] sm:$0xff]  ;;  %v574_v26 = vld [vmem:[%s1411_s0 + $0x78] sm:$0xff]  ;;  %v1061_v27 = vpack.c.bf16 %v21_v22, %v20_v21  ;;  %v1065_v28 = vpack.c.bf16 %v39_v24, %v38_v23  ;;  %v22_v29 = vld [vmem:[%s1410_s1 + $0x40] sm:$0xff] }
   0x8   :  { %131 = vmatprep.mubr.f32.mxu0 %v48_v25  ;;  %v23_v30 = vld [vmem:[%s1410_s1 + $0x48] sm:$0xff]  ;;  %v40_v31 = vld [vmem:[%s1410_s1 + $0xd0] sm:$0xff]  ;;  %v41_v32 = vld [vmem:[%s1410_s1 + $0xd8] sm:$0xff]  ;;  %253 = vmatprep.mubr.f32.mxu1 %v574_v26 }
   0x9   :  { %834 = vmatpush3.bf16.msra.mxu0 %v1015_v13  ;;  %866 = vmatpush3.bf16.msra.mxu1 %v1015_v13  ;;  %v1081_v33 = vpack.c.bf16 %v23_v30, %v22_v29  ;;  %v1085_v34 = vpack.c.bf16 %v41_v32, %v40_v31  ;;  %v24_v35 = vld [vmem:[%s1410_s1 + $0x50] sm:$0xff]  ;;  %v25_v36 = vld [vmem:[%s1410_s1 + $0x58] sm:$0xff]  ;;  %v42_v37 = vld [vmem:[%s1410_s1 + $0xe0] sm:$0xff] }
   0xa   :  { %836 = vmatprep.subr.bf16.mxu0 %v1019_v14  ;;  %868 = vmatprep.subr.bf16.mxu1 %v1019_v14  ;;  %v43_v38 = vld [vmem:[%s1410_s1 + $0xe8] sm:$0xff]  ;;  %v1101_v39 = vpack.c.bf16 %v25_v36, %v24_v35  ;;  %v26_v41 = vld [vmem:[%s1410_s1 + $0x60] sm:$0xff]  ;;  %v44_v43 = vld [vmem:[%s1410_s1 + $0xf0] sm:$0xff] }
   0xb   :  { %v1105_v40 = vpack.c.bf16 %v43_v38, %v42_v37  ;;  %v27_v42 = vld [vmem:[%s1410_s1 + $0x68] sm:$0xff]  ;;  %v45_v44 = vld [vmem:[%s1410_s1 + $0xf8] sm:$0xff]  ;;  %v28_v47 = vld [vmem:[%s1410_s1 + $0x70] sm:$0xff] }
   0xc   :  { %v1121_v45 = vpack.c.bf16 %v27_v42, %v26_v41  ;;  %v1125_v46 = vpack.c.bf16 %v45_v44, %v44_v43  ;;  %v29_v48 = vld [vmem:[%s1410_s1 + $0x78] sm:$0xff]  ;;  %v47_v50 = vld [vmem:[%s1411_s0] sm:$0xff]  ;;  %v573_v51 = vld [vmem:[%s1411_s0 + $0x70] sm:$0xff] }
   0xd   :  { %838 = vmatpush3.bf16.msra.mxu0 %v1035_v19  ;;  %870 = vmatpush3.bf16.msra.mxu1 %v1035_v19  ;;  %v1135_v49 = vpack.c.bf16 %v29_v48, %v28_v47  ;;  %v50_v52 = vld [vmem:[%s1411_s0 + $0x18] sm:$0xff]  ;;  %v576_v53 = vld [vmem:[%s1411_s0 + $0x88] sm:$0xff]  ;;  %v49_v54 = vld [vmem:[%s1411_s0 + $0x10] sm:$0xff] }
   0xe   :  { %840 = vmatprep.subr.bf16.mxu0 %v1039_v20  ;;  %872 = vmatprep.subr.bf16.mxu1 %v1039_v20  ;;  %v575_v55 = vld [vmem:[%s1411_s0 + $0x80] sm:$0xff]  ;;  %v52_v56 = vld [vmem:[%s1411_s0 + $0x28] sm:$0xff]  ;;  %v578_v57 = vld [vmem:[%s1411_s0 + $0x98] sm:$0xff] }
   0xf   :  { %v51_v58 = vld [vmem:[%s1411_s0 + $0x20] sm:$0xff]  ;;  %v577_v59 = vld [vmem:[%s1411_s0 + $0x90] sm:$0xff]  ;;  %v54_v60 = vld [vmem:[%s1411_s0 + $0x38] sm:$0xff] }
  0x10   :  { %v580_v61 = vld [vmem:[%s1411_s0 + $0xa8] sm:$0xff]  ;;  %v53_v62 = vld [vmem:[%s1411_s0 + $0x30] sm:$0xff]  ;;  %v579_v63 = vld [vmem:[%s1411_s0 + $0xa0] sm:$0xff] }
  0x11   :  { %842 = vmatpush3.bf16.msra.mxu0 %v1061_v27  ;;  %874 = vmatpush3.bf16.msra.mxu1 %v1061_v27  ;;  %v56_v0 = vld [vmem:[%s1411_s0 + $0x48] sm:$0xff]  ;;  %v582_v1 = vld [vmem:[%s1411_s0 + $0xb8] sm:$0xff]  ;;  %v55_v2 = vld [vmem:[%s1411_s0 + $0x40] sm:$0xff] }
  0x12   :  { %844 = vmatprep.subr.bf16.mxu0 %v1065_v28  ;;  %876 = vmatprep.subr.bf16.mxu1 %v1065_v28  ;;  %v58_v4 = vld [vmem:[%s1411_s0 + $0x58] sm:$0xff]  ;;  %v584_v5 = vld [vmem:[%s1411_s0 + $0xc8] sm:$0xff]  ;;  %v57_v6 = vld [vmem:[%s1411_s0 + $0x50] sm:$0xff] }
  0x13   :  { %v586_v9 = vld [vmem:[%s1411_s0 + $0xd8] sm:$0xff]  ;;  %v59_v10 = vld [vmem:[%s1411_s0 + $0x60] sm:$0xff]  ;;  %v585_v11 = vld [vmem:[%s1411_s0 + $0xd0] sm:$0xff] }
  0x14   :  { %v588_v12 = vld [vmem:[%s1411_s0 + $0xe8] sm:$0xff]  ;;  %v601_v15 = vld [vmem:[%s1411_s0 + $0x150] sm:$0xff]  ;;  %v590_v16 = vld [vmem:[%s1411_s0 + $0xf8] sm:$0xff] }
  0x15   :  { %846 = vmatpush3.bf16.msra.mxu0 %v1081_v33  ;;  %878 = vmatpush3.bf16.msra.mxu1 %v1081_v33  ;;  %v604_v17 = vld [vmem:[%s1411_s0 + $0x168] sm:$0xff]  ;;  %v589_v18 = vld [vmem:[%s1411_s0 + $0xf0] sm:$0xff]  ;;  %v606_v21 = vld [vmem:[%s1411_s0 + $0x178] sm:$0xff] }
  0x16   :  { %848 = vmatprep.subr.bf16.mxu0 %v1085_v34  ;;  %880 = vmatprep.subr.bf16.mxu1 %v1085_v34  ;;  %v591_v22 = vld [vmem:[%s1411_s0 + $0x100] sm:$0xff]  ;;  %v605_v23 = vld [vmem:[%s1411_s0 + $0x170] sm:$0xff]  ;;  %v594_v24 = vld [vmem:[%s1411_s0 + $0x118] sm:$0xff] }
  0x17   :  { %v608_v25 = vld [vmem:[%s1411_s0 + $0x188] sm:$0xff]  ;;  %v593_v26 = vld [vmem:[%s1411_s0 + $0x110] sm:$0xff]  ;;  %v610_v29 = vld [vmem:[%s1411_s0 + $0x198] sm:$0xff] }
  0x18   :  { %v595_v30 = vld [vmem:[%s1411_s0 + $0x120] sm:$0xff]  ;;  %v609_v31 = vld [vmem:[%s1411_s0 + $0x190] sm:$0xff]  ;;  %v598_v32 = vld [vmem:[%s1411_s0 + $0x138] sm:$0xff] }
  0x19   :  { %850 = vmatpush3.bf16.msra.mxu0 %v1101_v39  ;;  %882 = vmatpush3.bf16.msra.mxu1 %v1101_v39  ;;  %v611_v35 = vld [vmem:[%s1411_s0 + $0x1a0] sm:$0xff]  ;;  %v600_v36 = vld [vmem:[%s1411_s0 + $0x148] sm:$0xff]  ;;  %v614_v37 = vld [vmem:[%s1411_s0 + $0x1b8] sm:$0xff] }
  0x1a   :  { %852 = vmatprep.subr.bf16.mxu0 %v1105_v40  ;;  %884 = vmatprep.subr.bf16.mxu1 %v1105_v40  ;;  %v599_v38 = vld [vmem:[%s1411_s0 + $0x140] sm:$0xff] }
  0x1b   :  { %v1338_v42 = vld [vmem:[%s1412_s2] ss:$0 sm:$0xff] }
  0x1d   :  { %854 = vmatpush3.bf16.msra.mxu0 %v1121_v45  ;;  %886 = vmatpush3.bf16.msra.mxu1 %v1121_v45 }
  0x1e   :  { %856 = vmatprep.subr.bf16.mxu0 %v1125_v46  ;;  %888 = vmatprep.subr.bf16.mxu1 %v1125_v46 }
  0x21   :  { %858 = vmatpush3.bf16.msra.mxu0 %v1135_v49  ;;  %890 = vmatpush3.bf16.msra.mxu1 %v1135_v49 }
  0x22   :  { %892 = vmatprep.subr.bf16.mxu0 %v984_v3  ;;  %924 = vmatprep.subr.bf16.mxu1 %v984_v3  ;;  %v581_v3 = vld [vmem:[%s1411_s0 + $0xb0] sm:$0xff] }
  0x24   :  { %132 = vmatmul.mubr.f32.vlgmr.msra.gmra.mrb[0].mxu0 %v47_v50  ;;  %254 = vmatmul.mubr.f32.vlgmr.msra.gmra.mrb[0].mxu1 %v573_v51 }
  0x25   :  { %894 = vmatpush3.bf16.msra.mxu0 %v995_v7  ;;  %926 = vmatpush3.bf16.msra.mxu1 %v995_v7  ;;  %v583_v7 = vld [vmem:[%s1411_s0 + $0xc0] sm:$0xff] }
  0x26   :  { %896 = vmatprep.subr.bf16.mxu0 %v997_v8  ;;  %928 = vmatprep.subr.bf16.mxu1 %v997_v8  ;;  %v60_v8 = vld [vmem:[%s1411_s0 + $0x68] sm:$0xff] }
  0x27   :  { %136 = vmatprep.mubr.f32.mxu0 %v50_v52  ;;  %258 = vmatprep.mubr.f32.mxu1 %v576_v53 }
  0x28   :  { %137 = vmatmul.mubr.f32.gmra.mrb[2].mxu0 %v49_v54  ;;  %259 = vmatmul.mubr.f32.gmra.mrb[2].mxu1 %v575_v55 }
  0x29   :  { %898 = vmatpush3.bf16.msra.mxu0 %v1015_v13  ;;  %930 = vmatpush3.bf16.msra.mxu1 %v1015_v13  ;;  %v602_v13 = vld [vmem:[%s1411_s0 + $0x158] sm:$0xff] }
  0x2a   :  { %900 = vmatprep.subr.bf16.mxu0 %v1019_v14  ;;  %932 = vmatprep.subr.bf16.mxu1 %v1019_v14  ;;  %v587_v14 = vld [vmem:[%s1411_s0 + $0xe0] sm:$0xff] }
  0x2b   :  { %141 = vmatprep.mubr.f32.mxu0 %v52_v56  ;;  %263 = vmatprep.mubr.f32.mxu1 %v578_v57 }
  0x2c   :  { %142 = vmatmul.mubr.f32.gmra.mrb[4].mxu0 %v51_v58  ;;  %264 = vmatmul.mubr.f32.gmra.mrb[4].mxu1 %v577_v59 }
  0x2d   :  { %902 = vmatpush3.bf16.msra.mxu0 %v1035_v19  ;;  %934 = vmatpush3.bf16.msra.mxu1 %v1035_v19  ;;  %v603_v19 = vld [vmem:[%s1411_s0 + $0x160] sm:$0xff] }
  0x2e   :  { %904 = vmatprep.subr.bf16.mxu0 %v1039_v20  ;;  %936 = vmatprep.subr.bf16.mxu1 %v1039_v20  ;;  %v592_v20 = vld [vmem:[%s1411_s0 + $0x108] sm:$0xff] }
  0x2f   :  { %146 = vmatprep.mubr.f32.mxu0 %v54_v60  ;;  %268 = vmatprep.mubr.f32.mxu1 %v580_v61 }
  0x30   :  { %147 = vmatmul.mubr.f32.gmra.mrb[6].mxu0 %v53_v62  ;;  %269 = vmatmul.mubr.f32.gmra.mrb[6].mxu1 %v579_v63 }
  0x31   :  { %906 = vmatpush3.bf16.msra.mxu0 %v1061_v27  ;;  %938 = vmatpush3.bf16.msra.mxu1 %v1061_v27  ;;  %v607_v27 = vld [vmem:[%s1411_s0 + $0x180] sm:$0xff] }
  0x32   :  { %908 = vmatprep.subr.bf16.mxu0 %v1065_v28  ;;  %940 = vmatprep.subr.bf16.mxu1 %v1065_v28  ;;  %v596_v28 = vld [vmem:[%s1411_s0 + $0x128] sm:$0xff] }
  0x33   :  { %151 = vmatprep.mubr.f32.mxu0 %v56_v0  ;;  %273 = vmatprep.mubr.f32.mxu1 %v582_v1 }
  0x34   :  { %152 = vmatmul.mubr.f32.gmra.mrb[8].mxu0 %v55_v2  ;;  %274 = vmatmul.mubr.f32.gmra.mrb[8].mxu1 %v581_v3 }
  0x35   :  { %910 = vmatpush3.bf16.msra.mxu0 %v1081_v33  ;;  %942 = vmatpush3.bf16.msra.mxu1 %v1081_v33  ;;  %v612_v33 = vld [vmem:[%s1411_s0 + $0x1a8] sm:$0xff] }
  0x36   :  { %912 = vmatprep.subr.bf16.mxu0 %v1085_v34  ;;  %944 = vmatprep.subr.bf16.mxu1 %v1085_v34  ;;  %v597_v34 = vld [vmem:[%s1411_s0 + $0x130] sm:$0xff] }
  0x37   :  { %156 = vmatprep.mubr.f32.mxu0 %v58_v4  ;;  %278 = vmatprep.mubr.f32.mxu1 %v584_v5 }
  0x38   :  { %157 = vmatmul.mubr.f32.gmra.mrb[10].mxu0 %v57_v6  ;;  %279 = vmatmul.mubr.f32.gmra.mrb[10].mxu1 %v583_v7 }
  0x39   :  { %914 = vmatpush3.bf16.msra.mxu0 %v1101_v39  ;;  %946 = vmatpush3.bf16.msra.mxu1 %v1101_v39  ;;  %v613_v39 = vld [vmem:[%s1411_s0 + $0x1b0] sm:$0xff] }
  0x3a   :  { %916 = vmatprep.subr.bf16.mxu0 %v1105_v40  ;;  %948 = vmatprep.subr.bf16.mxu1 %v1105_v40 }
  0x3b   :  { %161 = vmatprep.mubr.f32.mxu0 %v60_v8  ;;  %283 = vmatprep.mubr.f32.mxu1 %v586_v9 }
  0x3c   :  { %162 = vmatmul.mubr.f32.gmra.mrb[12].mxu0 %v59_v10  ;;  %284 = vmatmul.mubr.f32.gmra.mrb[12].mxu1 %v585_v11 }
  0x3d   :  { %918 = vmatpush3.bf16.msra.mxu0 %v1121_v45  ;;  %950 = vmatpush3.bf16.msra.mxu1 %v1121_v45 }
  0x3e   :  { %920 = vmatprep.subr.bf16.mxu0 %v1125_v46  ;;  %952 = vmatprep.subr.bf16.mxu1 %v1125_v46 }
  0x3f   :  { %382 = vmatprep.mubr.f32.mxu0 %v588_v12  ;;  %511 = vmatprep.mubr.f32.mxu1 %v602_v13 }
  0x41   :  { %922 = vmatpush3.bf16.msra.mxu0 %v1135_v49  ;;  %954 = vmatpush3.bf16.msra.mxu1 %v1135_v49 }
  0x44   :  { %383 = vmatmul.mubr.f32.vlgmr.msra.gmra.mrb[14].mxu0 %v587_v14  ;;  %512 = vmatmul.mubr.f32.vlgmr.msra.gmra.mrb[14].mxu1 %v601_v15 }
  0x45   :  { %387 = vmatprep.mubr.f32.mxu0 %v590_v16  ;;  %516 = vmatprep.mubr.f32.mxu1 %v604_v17 }
  0x48   :  { %388 = vmatmul.mubr.f32.gmra.mrb[16].mxu0 %v589_v18  ;;  %517 = vmatmul.mubr.f32.gmra.mrb[16].mxu1 %v603_v19 }
  0x49   :  { %392 = vmatprep.mubr.f32.mxu0 %v592_v20  ;;  %521 = vmatprep.mubr.f32.mxu1 %v606_v21 }
  0x4c   :  { %393 = vmatmul.mubr.f32.gmra.mrb[18].mxu0 %v591_v22  ;;  %522 = vmatmul.mubr.f32.gmra.mrb[18].mxu1 %v605_v23 }
  0x4d   :  { %397 = vmatprep.mubr.f32.mxu0 %v594_v24  ;;  %526 = vmatprep.mubr.f32.mxu1 %v608_v25 }
  0x50   :  { %398 = vmatmul.mubr.f32.gmra.mrb[20].mxu0 %v593_v26  ;;  %527 = vmatmul.mubr.f32.gmra.mrb[20].mxu1 %v607_v27 }
  0x51   :  { %402 = vmatprep.mubr.f32.mxu0 %v596_v28  ;;  %531 = vmatprep.mubr.f32.mxu1 %v610_v29 }
  0x54   :  { %403 = vmatmul.mubr.f32.gmra.mrb[22].mxu0 %v595_v30  ;;  %532 = vmatmul.mubr.f32.gmra.mrb[22].mxu1 %v609_v31 }
  0x55   :  { %407 = vmatprep.mubr.f32.mxu0 %v598_v32  ;;  %536 = vmatprep.mubr.f32.mxu1 %v612_v33 }
  0x58   :  { %408 = vmatmul.mubr.f32.gmra.mrb[24].mxu0 %v597_v34  ;;  %537 = vmatmul.mubr.f32.gmra.mrb[24].mxu1 %v611_v35 }
  0x59   :  { %412 = vmatprep.mubr.f32.mxu0 %v600_v36  ;;  %541 = vmatprep.mubr.f32.mxu1 %v614_v37 }
  0x5c   :  { %413 = vmatmul.mubr.f32.gmra.mrb[26].mxu0 %v599_v38  ;;  %542 = vmatmul.mubr.f32.gmra.mrb[26].mxu1 %v613_v39 }
  0xf7   :  { %v647_v40 = vpop.f32.mrb[0].mxu0  ;;  %v700_v41 = vpop.f32.mrb[0].mxu1 }
  0xf8   :  { %v648_v43 = vpop.f32.mrb[1].mxu0  ;;  %v701_v44 = vpop.f32.mrb[1].mxu1 }
  0xf9   :  { %v649_v45 = vadd.f32 %v648_v43, %v647_v40  ;;  %v702_v46 = vadd.f32 %v701_v44, %v700_v41 }
  0xfb   :  { %v134_v47 = vadd.f32 %v649_v45, %v1338_v42  ;;  %v256_v48 = vadd.f32 %v702_v46, %v1338_v42  ;;  %v650_v49 = vpop.f32.mrb[2].mxu0  ;;  %v703_v50 = vpop.f32.mrb[2].mxu1 }
  0xfc   :  { %v651_v51 = vpop.f32.mrb[3].mxu0  ;;  %v704_v52 = vpop.f32.mrb[3].mxu1 }
  0xfd   :  { %v167_v53 = vmax.f32 %v134_v47, 0.0  ;;  %v289_v54 = vmax.f32 %v256_v48, 0.0  ;;  %v652_v55 = vadd.f32 %v651_v51, %v650_v49  ;;  %v705_v56 = vadd.f32 %v704_v52, %v703_v50 }
  0xff   :  { %v1342_v57 = vmax.f32 %v167_v53, %v289_v54  ;;  %v139_v58 = vadd.f32 %v652_v55, %v1338_v42  ;;  %v261_v59 = vadd.f32 %v705_v56, %v1338_v42  ;;  %v653_v60 = vpop.f32.mrb[4].mxu0  ;;  %v706_v61 = vpop.f32.mrb[4].mxu1 }
 0x100   :  { %v654_v62 = vpop.f32.mrb[5].mxu0  ;;  %v707_v63 = vpop.f32.mrb[5].mxu1 }
 0x101   :  { %v168_v0 = vmax.f32 %v139_v58, 0.0  ;;  %v290_v1 = vmax.f32 %v261_v59, 0.0  ;;  %v655_v2 = vadd.f32 %v654_v62, %v653_v60  ;;  %v708_v3 = vadd.f32 %v707_v63, %v706_v61 }
 0x103   :  { %v1346_v4 = vmax.f32 %v168_v0, %v290_v1  ;;  %v144_v5 = vadd.f32 %v655_v2, %v1338_v42  ;;  %v266_v6 = vadd.f32 %v708_v3, %v1338_v42  ;;  %v656_v7 = vpop.f32.mrb[6].mxu0  ;;  %v709_v8 = vpop.f32.mrb[6].mxu1 }
 0x104   :  { %v657_v9 = vpop.f32.mrb[7].mxu0  ;;  %v710_v10 = vpop.f32.mrb[7].mxu1 }
 0x105   :  { %v169_v11 = vmax.f32 %v144_v5, 0.0  ;;  %v291_v12 = vmax.f32 %v266_v6, 0.0  ;;  %v658_v13 = vadd.f32 %v657_v9, %v656_v7  ;;  %v711_v14 = vadd.f32 %v710_v10, %v709_v8 }
 0x107   :  { %v1350_v15 = vmax.f32 %v169_v11, %v291_v12  ;;  %v149_v16 = vadd.f32 %v658_v13, %v1338_v42  ;;  %v271_v17 = vadd.f32 %v711_v14, %v1338_v42  ;;  %v659_v18 = vpop.f32.mrb[8].mxu0  ;;  %v712_v19 = vpop.f32.mrb[8].mxu1 }
 0x108   :  { %v660_v20 = vpop.f32.mrb[9].mxu0  ;;  %v713_v21 = vpop.f32.mrb[9].mxu1 }
 0x109   :  { %v170_v22 = vmax.f32 %v149_v16, 0.0  ;;  %v292_v23 = vmax.f32 %v271_v17, 0.0  ;;  %v661_v24 = vadd.f32 %v660_v20, %v659_v18  ;;  %v714_v25 = vadd.f32 %v713_v21, %v712_v19 }
 0x10b   :  { %v1354_v26 = vmax.f32 %v170_v22, %v292_v23  ;;  %v154_v27 = vadd.f32 %v661_v24, %v1338_v42  ;;  %v276_v28 = vadd.f32 %v714_v25, %v1338_v42  ;;  %v662_v29 = vpop.f32.mrb[10].mxu0  ;;  %v715_v30 = vpop.f32.mrb[10].mxu1 }
 0x10c   :  { %v663_v31 = vpop.f32.mrb[11].mxu0  ;;  %v716_v32 = vpop.f32.mrb[11].mxu1 }
 0x10d   :  { %v171_v33 = vmax.f32 %v154_v27, 0.0  ;;  %v293_v34 = vmax.f32 %v276_v28, 0.0  ;;  %v664_v35 = vadd.f32 %v663_v31, %v662_v29  ;;  %v717_v36 = vadd.f32 %v716_v32, %v715_v30 }
 0x10f   :  { %v1358_v37 = vmax.f32 %v171_v33, %v293_v34  ;;  %v159_v38 = vadd.f32 %v664_v35, %v1338_v42  ;;  %v281_v39 = vadd.f32 %v717_v36, %v1338_v42  ;;  %v665_v40 = vpop.f32.mrb[12].mxu0  ;;  %v718_v41 = vpop.f32.mrb[12].mxu1 }
 0x110   :  { %v666_v43 = vpop.f32.mrb[13].mxu0  ;;  %v719_v44 = vpop.f32.mrb[13].mxu1 }
 0x111   :  { %v172_v45 = vmax.f32 %v159_v38, 0.0  ;;  %v294_v46 = vmax.f32 %v281_v39, 0.0  ;;  %v667_v47 = vadd.f32 %v666_v43, %v665_v40  ;;  %v720_v48 = vadd.f32 %v719_v44, %v718_v41 }
 0x113   :  { %v1362_v49 = vmax.f32 %v172_v45, %v294_v46  ;;  %v164_v50 = vadd.f32 %v667_v47, %v1338_v42  ;;  %v286_v51 = vadd.f32 %v720_v48, %v1338_v42 }
 0x115   :  { %v173_v52 = vmax.f32 %v164_v50, 0.0  ;;  %v295_v53 = vmax.f32 %v286_v51, 0.0 }
 0x117   :  { %v1366_v54 = vmax.f32 %v173_v52, %v295_v53  ;;  %v753_v55 = vpop.f32.mrb[14].mxu0  ;;  %v806_v56 = vpop.f32.mrb[14].mxu1 }
 0x118   :  { %v754_v58 = vpop.f32.mrb[15].mxu0  ;;  %v807_v59 = vpop.f32.mrb[15].mxu1 }
 0x119   :  { %v755_v60 = vadd.f32 %v754_v58, %v753_v55  ;;  %v808_v61 = vadd.f32 %v807_v59, %v806_v56 }
 0x11b   :  { %v385_v62 = vadd.f32 %v755_v60, %v1338_v42  ;;  %v514_v63 = vadd.f32 %v808_v61, %v1338_v42  ;;  %v756_v0 = vpop.f32.mrb[16].mxu0  ;;  %v809_v1 = vpop.f32.mrb[16].mxu1 }
 0x11c   :  { %v757_v2 = vpop.f32.mrb[17].mxu0  ;;  %v810_v3 = vpop.f32.mrb[17].mxu1 }
 0x11d   :  { %v418_v5 = vmax.f32 %v385_v62, 0.0  ;;  %v547_v6 = vmax.f32 %v514_v63, 0.0  ;;  %v758_v7 = vadd.f32 %v757_v2, %v756_v0  ;;  %v811_v8 = vadd.f32 %v810_v3, %v809_v1 }
 0x11f   :  { %v425_v9 = vmax.f32 %v1342_v57, %v418_v5  ;;  %v390_v10 = vadd.f32 %v758_v7, %v1338_v42  ;;  %v519_v11 = vadd.f32 %v811_v8, %v1338_v42  ;;  %v759_v12 = vpop.f32.mrb[18].mxu0  ;;  %v812_v13 = vpop.f32.mrb[18].mxu1 }
 0x120   :  { %v760_v14 = vpop.f32.mrb[19].mxu0  ;;  %v813_v16 = vpop.f32.mrb[19].mxu1 }
 0x121   :  { %v554_v17 = vmax.f32 %v425_v9, %v547_v6  ;;  %v419_v18 = vmax.f32 %v390_v10, 0.0  ;;  %v548_v19 = vmax.f32 %v519_v11, 0.0  ;;  %v761_v20 = vadd.f32 %v760_v14, %v759_v12 }
 0x122   :  { %v814_v21 = vadd.f32 %v813_v16, %v812_v13 }
 0x123   :  { %561 = vst [vmem:[%s1413_s3] sm:$0xff] %v554_v17  ;;  %v426_v22 = vmax.f32 %v1346_v4, %v419_v18  ;;  %v395_v57 = vadd.f32 %v761_v20, %v1338_v42  ;;  %v762_v23 = vpop.f32.mrb[20].mxu0  ;;  %v815_v24 = vpop.f32.mrb[20].mxu1 }
 0x124   :  { %v524_v25 = vadd.f32 %v814_v21, %v1338_v42  ;;  %v763_v27 = vpop.f32.mrb[21].mxu0  ;;  %v816_v28 = vpop.f32.mrb[21].mxu1 }
 0x125   :  { %v555_v29 = vmax.f32 %v426_v22, %v548_v19  ;;  %v420_v30 = vmax.f32 %v395_v57, 0.0  ;;  %v764_v31 = vadd.f32 %v763_v27, %v762_v23  ;;  %v817_v32 = vadd.f32 %v816_v28, %v815_v24 }
 0x126   :  { %v549_v33 = vmax.f32 %v524_v25, 0.0 }
 0x127   :  { %562 = vst [vmem:[%s1413_s3 + $0x8] sm:$0xff] %v555_v29  ;;  %v427_v34 = vmax.f32 %v1350_v15, %v420_v30  ;;  %v400_v4 = vadd.f32 %v764_v31, %v1338_v42  ;;  %v529_v35 = vadd.f32 %v817_v32, %v1338_v42  ;;  %v765_v36 = vpop.f32.mrb[22].mxu0  ;;  %v818_v38 = vpop.f32.mrb[22].mxu1 }
 0x128   :  { %v766_v39 = vpop.f32.mrb[23].mxu0  ;;  %v819_v40 = vpop.f32.mrb[23].mxu1 }
 0x129   :  { %v556_v41 = vmax.f32 %v427_v34, %v549_v33  ;;  %v421_v43 = vmax.f32 %v400_v4, 0.0  ;;  %v550_v44 = vmax.f32 %v529_v35, 0.0  ;;  %v767_v45 = vadd.f32 %v766_v39, %v765_v36 }
 0x12a   :  { %v820_v46 = vadd.f32 %v819_v40, %v818_v38 }
 0x12b   :  { %563 = vst [vmem:[%s1413_s3 + $0x10] sm:$0xff] %v556_v41  ;;  %v428_v47 = vmax.f32 %v1354_v26, %v421_v43  ;;  %v405_v15 = vadd.f32 %v767_v45, %v1338_v42  ;;  %v768_v48 = vpop.f32.mrb[24].mxu0  ;;  %v821_v50 = vpop.f32.mrb[24].mxu1 }
 0x12c   :  { %v534_v51 = vadd.f32 %v820_v46, %v1338_v42  ;;  %v769_v52 = vpop.f32.mrb[25].mxu0  ;;  %v822_v53 = vpop.f32.mrb[25].mxu1 }
 0x12d   :  { %v557_v55 = vmax.f32 %v428_v47, %v550_v44  ;;  %v422_v56 = vmax.f32 %v405_v15, 0.0  ;;  %v770_v58 = vadd.f32 %v769_v52, %v768_v48  ;;  %v823_v59 = vadd.f32 %v822_v53, %v821_v50 }
 0x12e   :  { %v551_v60 = vmax.f32 %v534_v51, 0.0 }
 0x12f   :  { %564 = vst [vmem:[%s1413_s3 + $0x18] sm:$0xff] %v557_v55  ;;  %v429_v61 = vmax.f32 %v1358_v37, %v422_v56  ;;  %v410_v26 = vadd.f32 %v770_v58, %v1338_v42  ;;  %v539_v62 = vadd.f32 %v823_v59, %v1338_v42  ;;  %v771_v63 = vpop.f32.mrb[26].mxu0  ;;  %v824_v0 = vpop.f32.mrb[26].mxu1 }
 0x130   :  { %v772_v1 = vpop.f32.mrb[27].mxu0  ;;  %v825_v2 = vpop.f32.mrb[27].mxu1 }
 0x131   :  { %v558_v3 = vmax.f32 %v429_v61, %v551_v60  ;;  %v423_v5 = vmax.f32 %v410_v26, 0.0  ;;  %v552_v6 = vmax.f32 %v539_v62, 0.0  ;;  %v773_v7 = vadd.f32 %v772_v1, %v771_v63 }
 0x132   :  { %v826_v8 = vadd.f32 %v825_v2, %v824_v0 }
 0x133   :  { %565 = vst [vmem:[%s1413_s3 + $0x20] sm:$0xff] %v558_v3  ;;  %v430_v9 = vmax.f32 %v1362_v49, %v423_v5  ;;  %v415_v37 = vadd.f32 %v773_v7, %v1338_v42 }
 0x134   :  { %v544_v10 = vadd.f32 %v826_v8, %v1338_v42 }
 0x135   :  { %v559_v11 = vmax.f32 %v430_v9, %v552_v6  ;;  %v424_v12 = vmax.f32 %v415_v37, 0.0 }
 0x136   :  { %v553_v13 = vmax.f32 %v544_v10, 0.0 }
 0x137   :  { %566 = vst [vmem:[%s1413_s3 + $0x28] sm:$0xff] %v559_v11  ;;  %v431_v14 = vmax.f32 %v1366_v54, %v424_v12 }
 0x139   :  { %v560_v16 = vmax.f32 %v431_v14, %v553_v13 }
 0x13b   :  { %567 = vst [vmem:[%s1413_s3 + $0x30] sm:$0xff] %v560_v16 }

// kernel: net_forward.5
= control target key start
LH: loop header
LB: loop body
LE: loop exit
PB: predicated region body
PF: predicated region fallthrough
CT: control target
= control target key end

     0   :  { %vm2600_vm0 = vmmov 0   ;;  %s4052_s1 = inlined_call_operand.vmem [shape: f32[3200,128], index: 1, kind: input, shape index: {}]   ;;  %s4053_s0 = inlined_call_operand.vmem [shape: f32[8,3200], index: 0, kind: input, shape index: {}]   ;;  %s4054_s2 = inlined_call_operand.vmem [shape: f32[1,128], index: 2, kind: input, shape index: {}]   ;;  %s4055_s3 = inlined_call_operand.vmem [shape: f32[128,128], index: 3, kind: input, shape index: {}]   ;;  %s4056_s5 = inlined_call_operand.vmem [shape: f32[128,128], index: 5, kind: input, shape index: {}]   ;;  %s4057_s4 = inlined_call_operand.vmem [shape: f32[1,128], index: 4, kind: input, shape index: {}]   ;;  %s4058_s6 = inlined_call_operand.vmem [shape: f32[1,128], index: 6, kind: input, shape index: {}]   ;;  %s4059_s7 = inlined_call_operand.vmem [shape: f32[8,128], index: 7, kind: output, shape index: {}]  }
   0x1   :  { %v67_v0 = vld [vmem:[%s4052_s1 + $0x80] sm:$0xff]  ;;  %v68_v1 = vld [vmem:[%s4052_s1 + $0x88] sm:$0xff]  ;;  %v69_v11 = vld [vmem:[%s4052_s1 + $0x90] sm:$0xff] }
   0x2   :  { %v51_v2 = vld [vmem:[%s4052_s1] sm:$0xff]  ;;  %v2140_v3 = vpack.c.bf16 %v68_v1, %v67_v0  ;;  %v52_v4 = vld [vmem:[%s4052_s1 + $0x8] sm:$0xff]  ;;  %v70_v13 = vld [vmem:[%s4052_s1 + $0x98] sm:$0xff] }
   0x3   :  { %v99_v5 = vld [vmem:[%s4052_s1 + $0x180] sm:$0xff]  ;;  %v100_v6 = vld [vmem:[%s4052_s1 + $0x188] sm:$0xff]  ;;  %v2142_v7 = vpack.c.bf16 %v52_v4, %v51_v2  ;;  %v53_v14 = vld [vmem:[%s4052_s1 + $0x10] sm:$0xff]  ;;  %v2144_v16 = vpack.c.bf16 %v70_v13, %v69_v11 }
   0x4   :  { %v2172_v8 = vpack.c.bf16 %v100_v6, %v99_v5  ;;  %v83_v9 = vld [vmem:[%s4052_s1 + $0x100] sm:$0xff]  ;;  %v84_v10 = vld [vmem:[%s4052_s1 + $0x108] sm:$0xff]  ;;  %2141 = vmatprep.subr.bf16.mxu0 %v2140_v3  ;;  %v54_v15 = vld [vmem:[%s4052_s1 + $0x18] sm:$0xff] }
   0x5   :  { %v2174_v12 = vpack.c.bf16 %v84_v10, %v83_v9  ;;  %2143 = vmatpush3.bf16.msra.mxu0 %v2142_v7  ;;  %v2146_v17 = vpack.c.bf16 %v54_v15, %v53_v14  ;;  %v101_v18 = vld [vmem:[%s4052_s1 + $0x190] sm:$0xff]  ;;  %v102_v19 = vld [vmem:[%s4052_s1 + $0x198] sm:$0xff]  ;;  %v71_v23 = vld [vmem:[%s4052_s1 + $0xa0] sm:$0xff] }
   0x6   :  { %2173 = vmatprep.subr.bf16.mxu1 %v2172_v8  ;;  %v85_v20 = vld [vmem:[%s4052_s1 + $0x110] sm:$0xff]  ;;  %v2176_v21 = vpack.c.bf16 %v102_v19, %v101_v18  ;;  %v86_v22 = vld [vmem:[%s4052_s1 + $0x118] sm:$0xff]  ;;  %v72_v24 = vld [vmem:[%s4052_s1 + $0xa8] sm:$0xff]  ;;  %2145 = vmatprep.subr.bf16.mxu0 %v2144_v16 }
   0x7   :  { %2175 = vmatpush3.bf16.msra.mxu1 %v2174_v12  ;;  %v2178_v25 = vpack.c.bf16 %v86_v22, %v85_v20  ;;  %v2148_v26 = vpack.c.bf16 %v72_v24, %v71_v23  ;;  %v55_v27 = vld [vmem:[%s4052_s1 + $0x20] sm:$0xff]  ;;  %v56_v28 = vld [vmem:[%s4052_s1 + $0x28] sm:$0xff]  ;;  %v73_v35 = vld [vmem:[%s4052_s1 + $0xb0] sm:$0xff] }
   0x8   :  { %v103_v29 = vld [vmem:[%s4052_s1 + $0x1a0] sm:$0xff]  ;;  %2177 = vmatprep.subr.bf16.mxu1 %v2176_v21  ;;  %v104_v30 = vld [vmem:[%s4052_s1 + $0x1a8] sm:$0xff]  ;;  %v2150_v33 = vpack.c.bf16 %v56_v28, %v55_v27  ;;  %v74_v36 = vld [vmem:[%s4052_s1 + $0xb8] sm:$0xff] }
   0x9   :  { %v87_v31 = vld [vmem:[%s4052_s1 + $0x120] sm:$0xff]  ;;  %v88_v32 = vld [vmem:[%s4052_s1 + $0x128] sm:$0xff]  ;;  %2147 = vmatpush3.bf16.msra.mxu0 %v2146_v17  ;;  %v2180_v34 = vpack.c.bf16 %v104_v30, %v103_v29  ;;  %v57_v37 = vld [vmem:[%s4052_s1 + $0x30] sm:$0xff]  ;;  %v2152_v39 = vpack.c.bf16 %v74_v36, %v73_v35 }
   0xa   :  { %2149 = vmatprep.subr.bf16.mxu0 %v2148_v26  ;;  %v2182_v38 = vpack.c.bf16 %v88_v32, %v87_v31  ;;  %v58_v40 = vld [vmem:[%s4052_s1 + $0x38] sm:$0xff]  ;;  %v105_v41 = vld [vmem:[%s4052_s1 + $0x1b0] sm:$0xff]  ;;  %v75_v46 = vld [vmem:[%s4052_s1 + $0xc0] sm:$0xff] }
   0xb   :  { %2179 = vmatpush3.bf16.msra.mxu1 %v2178_v25  ;;  %v106_v42 = vld [vmem:[%s4052_s1 + $0x1b8] sm:$0xff]  ;;  %v89_v44 = vld [vmem:[%s4052_s1 + $0x130] sm:$0xff]  ;;  %v76_v47 = vld [vmem:[%s4052_s1 + $0xc8] sm:$0xff]  ;;  %v2154_v48 = vpack.c.bf16 %v58_v40, %v57_v37 }
   0xc   :  { %2181 = vmatprep.subr.bf16.mxu1 %v2180_v34  ;;  %v2184_v43 = vpack.c.bf16 %v106_v42, %v105_v41  ;;  %v90_v45 = vld [vmem:[%s4052_s1 + $0x138] sm:$0xff]  ;;  %v107_v49 = vld [vmem:[%s4052_s1 + $0x1c0] sm:$0xff]  ;;  %v108_v50 = vld [vmem:[%s4052_s1 + $0x1c8] sm:$0xff]  ;;  %v2156_v52 = vpack.c.bf16 %v76_v47, %v75_v46 }
   0xd   :  { %2151 = vmatpush3.bf16.msra.mxu0 %v2150_v33  ;;  %v2186_v51 = vpack.c.bf16 %v90_v45, %v89_v44  ;;  %v59_v53 = vld [vmem:[%s4052_s1 + $0x40] sm:$0xff]  ;;  %v60_v54 = vld [vmem:[%s4052_s1 + $0x48] sm:$0xff]  ;;  %v2188_v56 = vpack.c.bf16 %v108_v50, %v107_v49  ;;  %v77_v58 = vld [vmem:[%s4052_s1 + $0xd0] sm:$0xff] }
   0xe   :  { %2153 = vmatprep.subr.bf16.mxu0 %v2152_v39  ;;  %v91_v55 = vld [vmem:[%s4052_s1 + $0x140] sm:$0xff]  ;;  %v92_v57 = vld [vmem:[%s4052_s1 + $0x148] sm:$0xff]  ;;  %v78_v59 = vld [vmem:[%s4052_s1 + $0xd8] sm:$0xff]  ;;  %v2158_v62 = vpack.c.bf16 %v60_v54, %v59_v53 }
   0xf   :  { %2183 = vmatpush3.bf16.msra.mxu1 %v2182_v38  ;;  %v109_v60 = vld [vmem:[%s4052_s1 + $0x1d0] sm:$0xff]  ;;  %v110_v61 = vld [vmem:[%s4052_s1 + $0x1d8] sm:$0xff]  ;;  %v2190_v63 = vpack.c.bf16 %v92_v57, %v91_v55  ;;  %v2160_v0 = vpack.c.bf16 %v78_v59, %v77_v58  ;;  %v79_v6 = vld [vmem:[%s4052_s1 + $0xe0] sm:$0xff] }
  0x10   :  { %2185 = vmatprep.subr.bf16.mxu1 %v2184_v43  ;;  %v61_v1 = vld [vmem:[%s4052_s1 + $0x50] sm:$0xff]  ;;  %v62_v2 = vld [vmem:[%s4052_s1 + $0x58] sm:$0xff]  ;;  %v2192_v4 = vpack.c.bf16 %v110_v61, %v109_v60  ;;  %v80_v7 = vld [vmem:[%s4052_s1 + $0xe8] sm:$0xff] }
  0x11   :  { %2155 = vmatpush3.bf16.msra.mxu0 %v2154_v48  ;;  %v93_v3 = vld [vmem:[%s4052_s1 + $0x150] sm:$0xff]  ;;  %v94_v5 = vld [vmem:[%s4052_s1 + $0x158] sm:$0xff]  ;;  %v111_v8 = vld [vmem:[%s4052_s1 + $0x1e0] sm:$0xff]  ;;  %v2162_v10 = vpack.c.bf16 %v62_v2, %v61_v1  ;;  %v2164_v14 = vpack.c.bf16 %v80_v7, %v79_v6 }
  0x12   :  { %2157 = vmatprep.subr.bf16.mxu0 %v2156_v52  ;;  %v112_v9 = vld [vmem:[%s4052_s1 + $0x1e8] sm:$0xff]  ;;  %v63_v11 = vld [vmem:[%s4052_s1 + $0x60] sm:$0xff]  ;;  %v2194_v13 = vpack.c.bf16 %v94_v5, %v93_v3  ;;  %v81_v19 = vld [vmem:[%s4052_s1 + $0xf0] sm:$0xff] }
  0x13   :  { %2187 = vmatpush3.bf16.msra.mxu1 %v2186_v51  ;;  %v27_v12 = vld [vmem:[%s4053_s0 + $0x8] sm:$0xff]  ;;  %v95_v16 = vld [vmem:[%s4052_s1 + $0x160] sm:$0xff]  ;;  %v2196_v18 = vpack.c.bf16 %v112_v9, %v111_v8  ;;  %v82_v20 = vld [vmem:[%s4052_s1 + $0xf8] sm:$0xff] }
  0x14   :  { %2189 = vmatprep.subr.bf16.mxu1 %v2188_v56  ;;  %v64_v15 = vld [vmem:[%s4052_s1 + $0x68] sm:$0xff]  ;;  %522 = vmatprep.mubr.f32.mxu0 %v27_v12  ;;  %v29_v21 = vld [vmem:[%s4053_s0 + $0x18] sm:$0xff]  ;;  %v113_v22 = vld [vmem:[%s4052_s1 + $0x1f0] sm:$0xff]  ;;  %v2168_v26 = vpack.c.bf16 %v82_v20, %v81_v19 }
  0x15   :  { %2159 = vmatpush3.bf16.msra.mxu0 %v2158_v62  ;;  %v96_v17 = vld [vmem:[%s4052_s1 + $0x168] sm:$0xff]  ;;  %v114_v23 = vld [vmem:[%s4052_s1 + $0x1f8] sm:$0xff]  ;;  %592 = vmatprep.mubr.f32.mxu1 %v29_v21  ;;  %v2166_v24 = vpack.c.bf16 %v64_v15, %v63_v11  ;;  %v65_v27 = vld [vmem:[%s4052_s1 + $0x70] sm:$0xff] }
  0x16   :  { %2161 = vmatprep.subr.bf16.mxu0 %v2160_v0  ;;  %v2198_v25 = vpack.c.bf16 %v96_v17, %v95_v16  ;;  %v66_v28 = vld [vmem:[%s4052_s1 + $0x78] sm:$0xff]  ;;  %v97_v29 = vld [vmem:[%s4052_s1 + $0x170] sm:$0xff]  ;;  %v2200_v30 = vpack.c.bf16 %v114_v23, %v113_v22  ;;  %v131_v32 = vld [vmem:[%s4052_s1 + $0x280] sm:$0xff] }
  0x17   :  { %2191 = vmatpush3.bf16.msra.mxu1 %v2190_v63  ;;  %v98_v31 = vld [vmem:[%s4052_s1 + $0x178] sm:$0xff]  ;;  %v132_v33 = vld [vmem:[%s4052_s1 + $0x288] sm:$0xff]  ;;  %v163_v34 = vld [vmem:[%s4052_s1 + $0x380] sm:$0xff]  ;;  %v2170_v36 = vpack.c.bf16 %v66_v28, %v65_v27 }
  0x18   :  { %2193 = vmatprep.subr.bf16.mxu1 %v2192_v4  ;;  %v164_v35 = vld [vmem:[%s4052_s1 + $0x388] sm:$0xff]  ;;  %v2202_v37 = vpack.c.bf16 %v98_v31, %v97_v29  ;;  %v2204_v38 = vpack.c.bf16 %v132_v33, %v131_v32  ;;  %v115_v39 = vld [vmem:[%s4052_s1 + $0x200] sm:$0xff]  ;;  %v133_v44 = vld [vmem:[%s4052_s1 + $0x290] sm:$0xff] }
  0x19   :  { %2163 = vmatpush3.bf16.msra.mxu0 %v2162_v10  ;;  %v116_v40 = vld [vmem:[%s4052_s1 + $0x208] sm:$0xff]  ;;  %v147_v41 = vld [vmem:[%s4052_s1 + $0x300] sm:$0xff]  ;;  %v2236_v42 = vpack.c.bf16 %v164_v35, %v163_v34  ;;  %v134_v45 = vld [vmem:[%s4052_s1 + $0x298] sm:$0xff] }
  0x1a   :  { %2165 = vmatprep.subr.bf16.mxu0 %v2164_v14  ;;  %v148_v43 = vld [vmem:[%s4052_s1 + $0x308] sm:$0xff]  ;;  %v165_v46 = vld [vmem:[%s4052_s1 + $0x390] sm:$0xff]  ;;  %v166_v47 = vld [vmem:[%s4052_s1 + $0x398] sm:$0xff]  ;;  %v2206_v49 = vpack.c.bf16 %v116_v40, %v115_v39  ;;  %v2208_v52 = vpack.c.bf16 %v134_v45, %v133_v44 }
  0x1b   :  { %2195 = vmatpush3.bf16.msra.mxu1 %v2194_v13  ;;  %v26_v48 = vld [vmem:[%s4053_s0] sm:$0xff]  ;;  %v28_v50 = vld [vmem:[%s4053_s0 + $0x10] sm:$0xff]  ;;  %v2238_v51 = vpack.c.bf16 %v148_v43, %v147_v41  ;;  %v118_v54 = vld [vmem:[%s4052_s1 + $0x218] sm:$0xff]  ;;  %v2240_v56 = vpack.c.bf16 %v166_v47, %v165_v46 }
  0x1c   :  { %2197 = vmatprep.subr.bf16.mxu1 %v2196_v18  ;;  %v117_v53 = vld [vmem:[%s4052_s1 + $0x210] sm:$0xff]  ;;  %v150_v57 = vld [vmem:[%s4052_s1 + $0x318] sm:$0xff]  ;;  %v135_v58 = vld [vmem:[%s4052_s1 + $0x2a0] sm:$0xff] }
  0x1d   :  { %2167 = vmatpush3.bf16.msra.mxu0 %v2166_v24  ;;  %v149_v55 = vld [vmem:[%s4052_s1 + $0x310] sm:$0xff]  ;;  %v136_v59 = vld [vmem:[%s4052_s1 + $0x2a8] sm:$0xff]  ;;  %v167_v60 = vld [vmem:[%s4052_s1 + $0x3a0] sm:$0xff]  ;;  %v2210_v62 = vpack.c.bf16 %v118_v54, %v117_v53 }
  0x1e   :  { %2169 = vmatprep.subr.bf16.mxu0 %v2168_v26  ;;  %v168_v61 = vld [vmem:[%s4052_s1 + $0x3a8] sm:$0xff]  ;;  %v2242_v63 = vpack.c.bf16 %v150_v57, %v149_v55  ;;  %v2212_v0 = vpack.c.bf16 %v136_v59, %v135_v58  ;;  %v119_v1 = vld [vmem:[%s4052_s1 + $0x220] sm:$0xff]  ;;  %v137_v6 = vld [vmem:[%s4052_s1 + $0x2b0] sm:$0xff] }
  0x1f   :  { %2199 = vmatpush3.bf16.msra.mxu1 %v2198_v25  ;;  %v120_v2 = vld [vmem:[%s4052_s1 + $0x228] sm:$0xff]  ;;  %v151_v3 = vld [vmem:[%s4052_s1 + $0x320] sm:$0xff]  ;;  %v2244_v4 = vpack.c.bf16 %v168_v61, %v167_v60  ;;  %v138_v7 = vld [vmem:[%s4052_s1 + $0x2b8] sm:$0xff] }
  0x20   :  { %2201 = vmatprep.subr.bf16.mxu1 %v2200_v30  ;;  %v152_v5 = vld [vmem:[%s4052_s1 + $0x328] sm:$0xff]  ;;  %v169_v8 = vld [vmem:[%s4052_s1 + $0x3b0] sm:$0xff]  ;;  %v170_v9 = vld [vmem:[%s4052_s1 + $0x3b8] sm:$0xff]  ;;  %v2214_v10 = vpack.c.bf16 %v120_v2, %v119_v1  ;;  %v2216_v12 = vpack.c.bf16 %v138_v7, %v137_v6 }
  0x21   :  { %2171 = vmatpush3.bf16.msra.mxu0 %v2170_v36  ;;  %v2246_v11 = vpack.c.bf16 %v152_v5, %v151_v3  ;;  %v121_v13 = vld [vmem:[%s4052_s1 + $0x230] sm:$0xff]  ;;  %v122_v14 = vld [vmem:[%s4052_s1 + $0x238] sm:$0xff]  ;;  %v2248_v16 = vpack.c.bf16 %v170_v9, %v169_v8  ;;  %v139_v18 = vld [vmem:[%s4052_s1 + $0x2c0] sm:$0xff] }
  0x22   :  { %2205 = vmatprep.subr.bf16.mxu0 %v2204_v38  ;;  %v153_v15 = vld [vmem:[%s4052_s1 + $0x330] sm:$0xff]  ;;  %v154_v17 = vld [vmem:[%s4052_s1 + $0x338] sm:$0xff]  ;;  %v140_v19 = vld [vmem:[%s4052_s1 + $0x2c8] sm:$0xff]  ;;  %v2218_v23 = vpack.c.bf16 %v122_v14, %v121_v13 }
  0x23   :  { %2203 = vmatpush3.bf16.msra.mxu1 %v2202_v37  ;;  %v171_v20 = vld [vmem:[%s4052_s1 + $0x3c0] sm:$0xff]  ;;  %v172_v21 = vld [vmem:[%s4052_s1 + $0x3c8] sm:$0xff]  ;;  %v2250_v25 = vpack.c.bf16 %v154_v17, %v153_v15  ;;  %v2220_v26 = vpack.c.bf16 %v140_v19, %v139_v18  ;;  %v33_v29 = vld [vmem:[%s4053_s0 + $0x38] sm:$0xff] }
  0x24   :  { %2237 = vmatprep.subr.bf16.mxu1 %v2236_v42  ;;  %523 = vmatmul.mubr.f32.vlgmr.msra.gmra.mrb[0].mxu0 %v26_v48  ;;  %v31_v22 = vld [vmem:[%s4053_s0 + $0x28] sm:$0xff]  ;;  %v123_v24 = vld [vmem:[%s4052_s1 + $0x240] sm:$0xff]  ;;  %v2252_v30 = vpack.c.bf16 %v172_v21, %v171_v20  ;;  %v141_v32 = vld [vmem:[%s4052_s1 + $0x2d0] sm:$0xff] }
  0x25   :  { %2207 = vmatpush3.bf16.msra.mxu0 %v2206_v49  ;;  %662 = vmatprep.mubr.f32.mxu0 %v31_v22  ;;  %v124_v27 = vld [vmem:[%s4052_s1 + $0x248] sm:$0xff]  ;;  %v155_v28 = vld [vmem:[%s4052_s1 + $0x340] sm:$0xff]  ;;  %v142_v33 = vld [vmem:[%s4052_s1 + $0x2d8] sm:$0xff] }
  0x26   :  { %593 = vmatmul.mubr.f32.vlgmr.msra.gmra.mrb[0].mxu1 %v28_v50  ;;  %2209 = vmatprep.subr.bf16.mxu0 %v2208_v52  ;;  %v156_v31 = vld [vmem:[%s4052_s1 + $0x348] sm:$0xff]  ;;  %v173_v34 = vld [vmem:[%s4052_s1 + $0x3d0] sm:$0xff]  ;;  %v174_v35 = vld [vmem:[%s4052_s1 + $0x3d8] sm:$0xff]  ;;  %v2222_v36 = vpack.c.bf16 %v124_v27, %v123_v24  ;;  %v2224_v38 = vpack.c.bf16 %v142_v33, %v141_v32 }
  0x27   :  { %2239 = vmatpush3.bf16.msra.mxu1 %v2238_v51  ;;  %732 = vmatprep.mubr.f32.mxu1 %v33_v29  ;;  %v2254_v37 = vpack.c.bf16 %v156_v31, %v155_v28  ;;  %v125_v39 = vld [vmem:[%s4052_s1 + $0x250] sm:$0xff]  ;;  %v126_v40 = vld [vmem:[%s4052_s1 + $0x258] sm:$0xff]  ;;  %v2256_v42 = vpack.c.bf16 %v174_v35, %v173_v34  ;;  %v143_v44 = vld [vmem:[%s4052_s1 + $0x2e0] sm:$0xff] }
  0x28   :  { %2241 = vmatprep.subr.bf16.mxu1 %v2240_v56  ;;  %v157_v41 = vld [vmem:[%s4052_s1 + $0x350] sm:$0xff]  ;;  %v158_v43 = vld [vmem:[%s4052_s1 + $0x358] sm:$0xff]  ;;  %v144_v45 = vld [vmem:[%s4052_s1 + $0x2e8] sm:$0xff]  ;;  %v2226_v48 = vpack.c.bf16 %v126_v40, %v125_v39 }
  0x29   :  { %2211 = vmatpush3.bf16.msra.mxu0 %v2210_v62  ;;  %v175_v46 = vld [vmem:[%s4052_s1 + $0x3e0] sm:$0xff]  ;;  %v176_v47 = vld [vmem:[%s4052_s1 + $0x3e8] sm:$0xff]  ;;  %v2258_v49 = vpack.c.bf16 %v158_v43, %v157_v41  ;;  %v2228_v50 = vpack.c.bf16 %v144_v45, %v143_v44  ;;  %v145_v56 = vld [vmem:[%s4052_s1 + $0x2f0] sm:$0xff] }
  0x2a   :  { %2213 = vmatprep.subr.bf16.mxu0 %v2212_v0  ;;  %v127_v51 = vld [vmem:[%s4052_s1 + $0x260] sm:$0xff]  ;;  %v128_v52 = vld [vmem:[%s4052_s1 + $0x268] sm:$0xff]  ;;  %v2260_v54 = vpack.c.bf16 %v176_v47, %v175_v46  ;;  %v146_v57 = vld [vmem:[%s4052_s1 + $0x2f8] sm:$0xff] }
  0x2b   :  { %2243 = vmatpush3.bf16.msra.mxu1 %v2242_v63  ;;  %v159_v53 = vld [vmem:[%s4052_s1 + $0x360] sm:$0xff]  ;;  %v160_v55 = vld [vmem:[%s4052_s1 + $0x368] sm:$0xff]  ;;  %v177_v58 = vld [vmem:[%s4052_s1 + $0x3f0] sm:$0xff]  ;;  %v2230_v60 = vpack.c.bf16 %v128_v52, %v127_v51  ;;  %v2232_v62 = vpack.c.bf16 %v146_v57, %v145_v56 }
  0x2c   :  { %2245 = vmatprep.subr.bf16.mxu1 %v2244_v4  ;;  %v178_v59 = vld [vmem:[%s4052_s1 + $0x3f8] sm:$0xff]  ;;  %v2262_v61 = vpack.c.bf16 %v160_v55, %v159_v53  ;;  %v129_v63 = vld [vmem:[%s4052_s1 + $0x270] sm:$0xff]  ;;  %v195_v4 = vld [vmem:[%s4052_s1 + $0x480] sm:$0xff] }
  0x2d   :  { %2215 = vmatpush3.bf16.msra.mxu0 %v2214_v10  ;;  %v130_v0 = vld [vmem:[%s4052_s1 + $0x278] sm:$0xff]  ;;  %v161_v1 = vld [vmem:[%s4052_s1 + $0x370] sm:$0xff]  ;;  %v2264_v2 = vpack.c.bf16 %v178_v59, %v177_v58  ;;  %v196_v5 = vld [vmem:[%s4052_s1 + $0x488] sm:$0xff] }
  0x2e   :  { %2217 = vmatprep.subr.bf16.mxu0 %v2216_v12  ;;  %v162_v3 = vld [vmem:[%s4052_s1 + $0x378] sm:$0xff]  ;;  %v227_v6 = vld [vmem:[%s4052_s1 + $0x580] sm:$0xff]  ;;  %v228_v7 = vld [vmem:[%s4052_s1 + $0x588] sm:$0xff]  ;;  %v2234_v8 = vpack.c.bf16 %v130_v0, %v129_v63  ;;  %v2268_v10 = vpack.c.bf16 %v196_v5, %v195_v4 }
  0x2f   :  { %2247 = vmatpush3.bf16.msra.mxu1 %v2246_v11  ;;  %v2266_v9 = vpack.c.bf16 %v162_v3, %v161_v1  ;;  %v179_v11 = vld [vmem:[%s4052_s1 + $0x400] sm:$0xff]  ;;  %v180_v12 = vld [vmem:[%s4052_s1 + $0x408] sm:$0xff]  ;;  %v2300_v14 = vpack.c.bf16 %v228_v7, %v227_v6  ;;  %v198_v17 = vld [vmem:[%s4052_s1 + $0x498] sm:$0xff] }
  0x30   :  { %2249 = vmatprep.subr.bf16.mxu1 %v2248_v16  ;;  %v211_v13 = vld [vmem:[%s4052_s1 + $0x500] sm:$0xff]  ;;  %v212_v15 = vld [vmem:[%s4052_s1 + $0x508] sm:$0xff]  ;;  %v197_v16 = vld [vmem:[%s4052_s1 + $0x490] sm:$0xff]  ;;  %v2270_v21 = vpack.c.bf16 %v180_v12, %v179_v11 }
  0x31   :  { %2219 = vmatpush3.bf16.msra.mxu0 %v2218_v23  ;;  %v229_v18 = vld [vmem:[%s4052_s1 + $0x590] sm:$0xff]  ;;  %v230_v19 = vld [vmem:[%s4052_s1 + $0x598] sm:$0xff]  ;;  %v30_v20 = vld [vmem:[%s4053_s0 + $0x20] sm:$0xff]  ;;  %v2302_v23 = vpack.c.bf16 %v212_v15, %v211_v13  ;;  %v2272_v24 = vpack.c.bf16 %v198_v17, %v197_v16 }
  0x32   :  { %2221 = vmatprep.subr.bf16.mxu0 %v2220_v26  ;;  %v32_v22 = vld [vmem:[%s4053_s0 + $0x30] sm:$0xff]  ;;  %v182_v26 = vld [vmem:[%s4052_s1 + $0x418] sm:$0xff]  ;;  %v2304_v28 = vpack.c.bf16 %v230_v19, %v229_v18  ;;  %v200_v31 = vld [vmem:[%s4052_s1 + $0x4a8] sm:$0xff] }
  0x33   :  { %2251 = vmatpush3.bf16.msra.mxu1 %v2250_v25  ;;  %v181_v25 = vld [vmem:[%s4052_s1 + $0x410] sm:$0xff]  ;;  %v214_v29 = vld [vmem:[%s4052_s1 + $0x518] sm:$0xff]  ;;  %v231_v32 = vld [vmem:[%s4052_s1 + $0x5a0] sm:$0xff] }
  0x34   :  { %2253 = vmatprep.subr.bf16.mxu1 %v2252_v30  ;;  %v213_v27 = vld [vmem:[%s4052_s1 + $0x510] sm:$0xff]  ;;  %v199_v30 = vld [vmem:[%s4052_s1 + $0x4a0] sm:$0xff]  ;;  %v232_v33 = vld [vmem:[%s4052_s1 + $0x5a8] sm:$0xff]  ;;  %v2274_v35 = vpack.c.bf16 %v182_v26, %v181_v25 }
  0x35   :  { %2223 = vmatpush3.bf16.msra.mxu0 %v2222_v36  ;;  %v35_v34 = vld [vmem:[%s4053_s0 + $0x48] sm:$0xff]  ;;  %v37_v36 = vld [vmem:[%s4053_s0 + $0x58] sm:$0xff]  ;;  %v183_v39 = vld [vmem:[%s4052_s1 + $0x420] sm:$0xff] }
  0x36   :  { %2225 = vmatprep.subr.bf16.mxu0 %v2224_v38  ;;  %v2276_v38 = vpack.c.bf16 %v200_v31, %v199_v30  ;;  %v184_v40 = vld [vmem:[%s4052_s1 + $0x428] sm:$0xff]  ;;  %v215_v41 = vld [vmem:[%s4052_s1 + $0x520] sm:$0xff]  ;;  %v201_v44 = vld [vmem:[%s4052_s1 + $0x4b0] sm:$0xff] }
  0x37   :  { %2255 = vmatpush3.bf16.msra.mxu1 %v2254_v37  ;;  %v2306_v37 = vpack.c.bf16 %v214_v29, %v213_v27  ;;  %v216_v43 = vld [vmem:[%s4052_s1 + $0x528] sm:$0xff]  ;;  %v202_v45 = vld [vmem:[%s4052_s1 + $0x4b8] sm:$0xff]  ;;  %v233_v46 = vld [vmem:[%s4052_s1 + $0x5b0] sm:$0xff] }
  0x38   :  { %2257 = vmatprep.subr.bf16.mxu1 %v2256_v42  ;;  %v2308_v42 = vpack.c.bf16 %v232_v33, %v231_v32  ;;  %v234_v47 = vld [vmem:[%s4052_s1 + $0x5b8] sm:$0xff]  ;;  %v185_v51 = vld [vmem:[%s4052_s1 + $0x430] sm:$0xff]  ;;  %v203_v56 = vld [vmem:[%s4052_s1 + $0x4c0] sm:$0xff] }
  0x39   :  { %2227 = vmatpush3.bf16.msra.mxu0 %v2226_v48  ;;  %v2278_v48 = vpack.c.bf16 %v184_v40, %v183_v39  ;;  %v186_v52 = vld [vmem:[%s4052_s1 + $0x438] sm:$0xff]  ;;  %v217_v53 = vld [vmem:[%s4052_s1 + $0x530] sm:$0xff]  ;;  %v204_v57 = vld [vmem:[%s4052_s1 + $0x4c8] sm:$0xff] }
  0x3a   :  { %2229 = vmatprep.subr.bf16.mxu0 %v2228_v50  ;;  %v2280_v50 = vpack.c.bf16 %v202_v45, %v201_v44  ;;  %v218_v55 = vld [vmem:[%s4052_s1 + $0x538] sm:$0xff]  ;;  %v235_v58 = vld [vmem:[%s4052_s1 + $0x5c0] sm:$0xff]  ;;  %v236_v59 = vld [vmem:[%s4052_s1 + $0x5c8] sm:$0xff] }
  0x3b   :  { %2259 = vmatpush3.bf16.msra.mxu1 %v2258_v49  ;;  %v2310_v49 = vpack.c.bf16 %v216_v43, %v215_v41  ;;  %v187_v63 = vld [vmem:[%s4052_s1 + $0x440] sm:$0xff]  ;;  %v188_v0 = vld [vmem:[%s4052_s1 + $0x448] sm:$0xff]  ;;  %v205_v4 = vld [vmem:[%s4052_s1 + $0x4d0] sm:$0xff] }
  0x3c   :  { %2261 = vmatprep.subr.bf16.mxu1 %v2260_v54  ;;  %v2312_v54 = vpack.c.bf16 %v234_v47, %v233_v46  ;;  %v219_v1 = vld [vmem:[%s4052_s1 + $0x540] sm:$0xff]  ;;  %v220_v3 = vld [vmem:[%s4052_s1 + $0x548] sm:$0xff]  ;;  %v206_v5 = vld [vmem:[%s4052_s1 + $0x4d8] sm:$0xff] }
  0x3d   :  { %2231 = vmatpush3.bf16.msra.mxu0 %v2230_v60  ;;  %v2282_v60 = vpack.c.bf16 %v186_v52, %v185_v51  ;;  %v237_v6 = vld [vmem:[%s4052_s1 + $0x5d0] sm:$0xff]  ;;  %v238_v7 = vld [vmem:[%s4052_s1 + $0x5d8] sm:$0xff]  ;;  %v207_v16 = vld [vmem:[%s4052_s1 + $0x4e0] sm:$0xff] }
  0x3e   :  { %2233 = vmatprep.subr.bf16.mxu0 %v2232_v62  ;;  %v2284_v62 = vpack.c.bf16 %v204_v57, %v203_v56  ;;  %v189_v11 = vld [vmem:[%s4052_s1 + $0x450] sm:$0xff]  ;;  %v190_v12 = vld [vmem:[%s4052_s1 + $0x458] sm:$0xff]  ;;  %v208_v17 = vld [vmem:[%s4052_s1 + $0x4e8] sm:$0xff] }
  0x3f   :  { %2263 = vmatpush3.bf16.msra.mxu1 %v2262_v61  ;;  %v2314_v61 = vpack.c.bf16 %v218_v55, %v217_v53  ;;  %v221_v13 = vld [vmem:[%s4052_s1 + $0x550] sm:$0xff]  ;;  %v222_v15 = vld [vmem:[%s4052_s1 + $0x558] sm:$0xff]  ;;  %v239_v18 = vld [vmem:[%s4052_s1 + $0x5e0] sm:$0xff] }
  0x40   :  { %2265 = vmatprep.subr.bf16.mxu1 %v2264_v2  ;;  %v2316_v2 = vpack.c.bf16 %v236_v59, %v235_v58  ;;  %v240_v19 = vld [vmem:[%s4052_s1 + $0x5e8] sm:$0xff]  ;;  %v223_v25 = vld [vmem:[%s4052_s1 + $0x560] sm:$0xff]  ;;  %v210_v29 = vld [vmem:[%s4052_s1 + $0x4f8] sm:$0xff] }
  0x41   :  { %2235 = vmatpush3.bf16.msra.mxu0 %v2234_v8  ;;  %v2286_v8 = vpack.c.bf16 %v188_v0, %v187_v63  ;;  %v2324_v26 = vpack.c.bf16 %v240_v19, %v239_v18  ;;  %v224_v27 = vld [vmem:[%s4052_s1 + $0x568] sm:$0xff]  ;;  %v241_v30 = vld [vmem:[%s4052_s1 + $0x5f0] sm:$0xff]  ;;  %v242_v31 = vld [vmem:[%s4052_s1 + $0x5f8] sm:$0xff] }
  0x42   :  { %2269 = vmatprep.subr.bf16.mxu0 %v2268_v10  ;;  %v2288_v10 = vpack.c.bf16 %v206_v5, %v205_v4  ;;  %v2326_v33 = vpack.c.bf16 %v224_v27, %v223_v25  ;;  %v226_v39 = vld [vmem:[%s4052_s1 + $0x578] sm:$0xff]  ;;  %v259_v40 = vld [vmem:[%s4052_s1 + $0x680] sm:$0xff]  ;;  %v260_v41 = vld [vmem:[%s4052_s1 + $0x688] sm:$0xff] }
  0x43   :  { %2267 = vmatpush3.bf16.msra.mxu1 %v2266_v9  ;;  %v2318_v9 = vpack.c.bf16 %v220_v3, %v219_v1  ;;  %v292_v43 = vld [vmem:[%s4052_s1 + $0x788] sm:$0xff]  ;;  %v2332_v46 = vpack.c.bf16 %v260_v41, %v259_v40  ;;  %v243_v47 = vld [vmem:[%s4052_s1 + $0x600] sm:$0xff]  ;;  %v261_v52 = vld [vmem:[%s4052_s1 + $0x690] sm:$0xff] }
  0x44   :  { %2301 = vmatprep.subr.bf16.mxu1 %v2300_v14  ;;  %663 = vmatmul.mubr.f32.vlgmr.msra.gmra.mrb[2].mxu0 %v30_v20  ;;  %v2320_v14 = vpack.c.bf16 %v238_v7, %v237_v6  ;;  %v2290_v20 = vpack.c.bf16 %v190_v12, %v189_v11  ;;  %v276_v51 = vld [vmem:[%s4052_s1 + $0x708] sm:$0xff]  ;;  %v262_v53 = vld [vmem:[%s4052_s1 + $0x698] sm:$0xff]  ;;  %v34_v56 = vld [vmem:[%s4053_s0 + $0x40] sm:$0xff] }
  0x45   :  { %2271 = vmatpush3.bf16.msra.mxu0 %v2270_v21  ;;  %802 = vmatprep.mubr.f32.mxu0 %v35_v34  ;;  %v2322_v21 = vpack.c.bf16 %v222_v15, %v221_v13  ;;  %v294_v55 = vld [vmem:[%s4052_s1 + $0x798] sm:$0xff]  ;;  %v36_v58 = vld [vmem:[%s4053_s0 + $0x50] sm:$0xff]  ;;  %v264_v3 = vld [vmem:[%s4052_s1 + $0x6a8] sm:$0xff] }
  0x46   :  { %733 = vmatmul.mubr.f32.vlgmr.msra.gmra.mrb[2].mxu1 %v32_v22  ;;  %2273 = vmatprep.subr.bf16.mxu0 %v2272_v24  ;;  %v2292_v22 = vpack.c.bf16 %v208_v17, %v207_v16  ;;  %v192_v24 = vld [vmem:[%s4052_s1 + $0x468] sm:$0xff]  ;;  %v277_v63 = vld [vmem:[%s4052_s1 + $0x710] sm:$0xff]  ;;  %v278_v1 = vld [vmem:[%s4052_s1 + $0x718] sm:$0xff] }
  0x47   :  { %2303 = vmatpush3.bf16.msra.mxu1 %v2302_v23  ;;  %872 = vmatprep.mubr.f32.mxu1 %v37_v36  ;;  %v191_v23 = vld [vmem:[%s4052_s1 + $0x460] sm:$0xff]  ;;  %v194_v36 = vld [vmem:[%s4052_s1 + $0x478] sm:$0xff]  ;;  %v296_v5 = vld [vmem:[%s4052_s1 + $0x7a8] sm:$0xff] }
  0x48   :  { %2305 = vmatprep.subr.bf16.mxu1 %v2304_v28  ;;  %v209_v28 = vld [vmem:[%s4052_s1 + $0x4f0] sm:$0xff]  ;;  %v2294_v32 = vpack.c.bf16 %v192_v24, %v191_v23  ;;  %v295_v4 = vld [vmem:[%s4052_s1 + $0x7a0] sm:$0xff]  ;;  %v39_v6 = vld [vmem:[%s4053_s0 + $0x68] sm:$0xff] }
  0x49   :  { %2275 = vmatpush3.bf16.msra.mxu0 %v2274_v35  ;;  %v2296_v34 = vpack.c.bf16 %v210_v29, %v209_v28  ;;  %v193_v35 = vld [vmem:[%s4052_s1 + $0x470] sm:$0xff]  ;;  %v247_v11 = vld [vmem:[%s4052_s1 + $0x620] sm:$0xff]  ;;  %v248_v12 = vld [vmem:[%s4052_s1 + $0x628] sm:$0xff] }
  0x4a   :  { %2277 = vmatprep.subr.bf16.mxu0 %v2276_v38  ;;  %v2328_v38 = vpack.c.bf16 %v242_v31, %v241_v30  ;;  %v2298_v44 = vpack.c.bf16 %v194_v36, %v193_v35  ;;  %v279_v13 = vld [vmem:[%s4052_s1 + $0x720] sm:$0xff]  ;;  %v280_v15 = vld [vmem:[%s4052_s1 + $0x728] sm:$0xff]  ;;  %v265_v16 = vld [vmem:[%s4052_s1 + $0x6b0] sm:$0xff] }
  0x4b   :  { %2307 = vmatpush3.bf16.msra.mxu1 %v2306_v37  ;;  %v225_v37 = vld [vmem:[%s4052_s1 + $0x570] sm:$0xff]  ;;  %v266_v17 = vld [vmem:[%s4052_s1 + $0x6b8] sm:$0xff]  ;;  %v267_v28 = vld [vmem:[%s4052_s1 + $0x6c0] sm:$0xff] }
  0x4c   :  { %2309 = vmatprep.subr.bf16.mxu1 %v2308_v42  ;;  %v291_v42 = vld [vmem:[%s4052_s1 + $0x780] sm:$0xff]  ;;  %v2330_v45 = vpack.c.bf16 %v226_v39, %v225_v37  ;;  %v297_v18 = vld [vmem:[%s4052_s1 + $0x7b0] sm:$0xff]  ;;  %v298_v19 = vld [vmem:[%s4052_s1 + $0x7b8] sm:$0xff] }
  0x4d   :  { %2279 = vmatpush3.bf16.msra.mxu0 %v2278_v48  ;;  %v244_v48 = vld [vmem:[%s4052_s1 + $0x608] sm:$0xff]  ;;  %v249_v23 = vld [vmem:[%s4052_s1 + $0x630] sm:$0xff]  ;;  %v250_v24 = vld [vmem:[%s4052_s1 + $0x638] sm:$0xff] }
  0x4e   :  { %2281 = vmatprep.subr.bf16.mxu0 %v2280_v50  ;;  %v2364_v50 = vpack.c.bf16 %v292_v43, %v291_v42  ;;  %v2334_v57 = vpack.c.bf16 %v244_v48, %v243_v47  ;;  %v281_v25 = vld [vmem:[%s4052_s1 + $0x730] sm:$0xff]  ;;  %v282_v27 = vld [vmem:[%s4052_s1 + $0x738] sm:$0xff]  ;;  %v268_v29 = vld [vmem:[%s4052_s1 + $0x6c8] sm:$0xff] }
  0x4f   :  { %2311 = vmatpush3.bf16.msra.mxu1 %v2310_v49  ;;  %v275_v49 = vld [vmem:[%s4052_s1 + $0x700] sm:$0xff]  ;;  %v300_v31 = vld [vmem:[%s4052_s1 + $0x7c8] sm:$0xff]  ;;  %v269_v40 = vld [vmem:[%s4052_s1 + $0x6d0] sm:$0xff] }
  0x50   :  { %2313 = vmatprep.subr.bf16.mxu1 %v2312_v54  ;;  %v293_v54 = vld [vmem:[%s4052_s1 + $0x790] sm:$0xff]  ;;  %v2366_v59 = vpack.c.bf16 %v276_v51, %v275_v49  ;;  %v299_v30 = vld [vmem:[%s4052_s1 + $0x7c0] sm:$0xff]  ;;  %v252_v36 = vld [vmem:[%s4052_s1 + $0x648] sm:$0xff] }
  0x51   :  { %2283 = vmatpush3.bf16.msra.mxu0 %v2282_v60  ;;  %v2336_v60 = vpack.c.bf16 %v262_v53, %v261_v52  ;;  %v2368_v0 = vpack.c.bf16 %v294_v55, %v293_v54  ;;  %v251_v35 = vld [vmem:[%s4052_s1 + $0x640] sm:$0xff]  ;;  %v284_v39 = vld [vmem:[%s4052_s1 + $0x748] sm:$0xff]  ;;  %v270_v41 = vld [vmem:[%s4052_s1 + $0x6d8] sm:$0xff] }
  0x52   :  { %2285 = vmatprep.subr.bf16.mxu0 %v2284_v62  ;;  %v246_v62 = vld [vmem:[%s4052_s1 + $0x618] sm:$0xff]  ;;  %v283_v37 = vld [vmem:[%s4052_s1 + $0x740] sm:$0xff]  ;;  %v301_v42 = vld [vmem:[%s4052_s1 + $0x7d0] sm:$0xff] }
  0x53   :  { %2315 = vmatpush3.bf16.msra.mxu1 %v2314_v61  ;;  %v245_v61 = vld [vmem:[%s4052_s1 + $0x610] sm:$0xff]  ;;  %v302_v43 = vld [vmem:[%s4052_s1 + $0x7d8] sm:$0xff]  ;;  %v271_v52 = vld [vmem:[%s4052_s1 + $0x6e0] sm:$0xff] }
  0x54   :  { %2317 = vmatprep.subr.bf16.mxu1 %v2316_v2  ;;  %v263_v2 = vld [vmem:[%s4052_s1 + $0x6a0] sm:$0xff]  ;;  %v2338_v7 = vpack.c.bf16 %v246_v62, %v245_v61  ;;  %v253_v47 = vld [vmem:[%s4052_s1 + $0x650] sm:$0xff]  ;;  %v254_v48 = vld [vmem:[%s4052_s1 + $0x658] sm:$0xff] }
  0x55   :  { %2287 = vmatpush3.bf16.msra.mxu0 %v2286_v8  ;;  %v41_v8 = vld [vmem:[%s4053_s0 + $0x78] sm:$0xff]  ;;  %v285_v49 = vld [vmem:[%s4052_s1 + $0x750] sm:$0xff]  ;;  %v272_v53 = vld [vmem:[%s4052_s1 + $0x6e8] sm:$0xff] }
  0x56   :  { %2289 = vmatprep.subr.bf16.mxu0 %v2288_v10  ;;  %v2340_v10 = vpack.c.bf16 %v264_v3, %v263_v2  ;;  %v286_v51 = vld [vmem:[%s4052_s1 + $0x758] sm:$0xff]  ;;  %v303_v54 = vld [vmem:[%s4052_s1 + $0x7e0] sm:$0xff]  ;;  %v304_v55 = vld [vmem:[%s4052_s1 + $0x7e8] sm:$0xff] }
  0x57   :  { %2319 = vmatpush3.bf16.msra.mxu1 %v2318_v9  ;;  %v2370_v9 = vpack.c.bf16 %v278_v1, %v277_v63  ;;  %v287_v61 = vld [vmem:[%s4052_s1 + $0x760] sm:$0xff]  ;;  %v2388_v62 = vpack.c.bf16 %v304_v55, %v303_v54  ;;  %v288_v63 = vld [vmem:[%s4052_s1 + $0x768] sm:$0xff]  ;;  %v274_v1 = vld [vmem:[%s4052_s1 + $0x6f8] sm:$0xff] }
  0x58   :  { %2321 = vmatprep.subr.bf16.mxu1 %v2320_v14  ;;  %v2372_v14 = vpack.c.bf16 %v296_v5, %v295_v4  ;;  %v305_v2 = vld [vmem:[%s4052_s1 + $0x7f0] sm:$0xff]  ;;  %v306_v3 = vld [vmem:[%s4052_s1 + $0x7f8] sm:$0xff]  ;;  %v2390_v5 = vpack.c.bf16 %v288_v63, %v287_v61 }
  0x59   :  { %2291 = vmatpush3.bf16.msra.mxu0 %v2290_v20  ;;  %v2342_v20 = vpack.c.bf16 %v248_v12, %v247_v11  ;;  %v290_v11 = vld [vmem:[%s4052_s1 + $0x778] sm:$0xff]  ;;  %v323_v12 = vld [vmem:[%s4052_s1 + $0x880] sm:$0xff]  ;;  %v361_v54 = vld [vmem:[%s4052_s1 + $0x9b0] sm:$0xff] }
  0x5a   :  { %2293 = vmatprep.subr.bf16.mxu0 %v2292_v22  ;;  %v2344_v22 = vpack.c.bf16 %v266_v17, %v265_v16  ;;  %v362_v55 = vld [vmem:[%s4052_s1 + $0x9b8] sm:$0xff]  ;;  %v345_v61 = vld [vmem:[%s4052_s1 + $0x930] sm:$0xff] }
  0x5b   :  { %2323 = vmatpush3.bf16.msra.mxu1 %v2322_v21  ;;  %v2374_v21 = vpack.c.bf16 %v280_v15, %v279_v13  ;;  %v324_v13 = vld [vmem:[%s4052_s1 + $0x888] sm:$0xff]  ;;  %v346_v63 = vld [vmem:[%s4052_s1 + $0x938] sm:$0xff] }
  0x5c   :  { %2325 = vmatprep.subr.bf16.mxu1 %v2324_v26  ;;  %v2376_v26 = vpack.c.bf16 %v298_v19, %v297_v18  ;;  %v356_v15 = vld [vmem:[%s4052_s1 + $0x988] sm:$0xff]  ;;  %v2396_v18 = vpack.c.bf16 %v324_v13, %v323_v12  ;;  %v307_v19 = vld [vmem:[%s4052_s1 + $0x800] sm:$0xff]  ;;  %v333_v12 = vld [vmem:[%s4052_s1 + $0x8d0] sm:$0xff] }
  0x5d   :  { %2295 = vmatpush3.bf16.msra.mxu0 %v2294_v32  ;;  %v2346_v32 = vpack.c.bf16 %v250_v24, %v249_v23  ;;  %v340_v23 = vld [vmem:[%s4052_s1 + $0x908] sm:$0xff]  ;;  %v325_v24 = vld [vmem:[%s4052_s1 + $0x890] sm:$0xff]  ;;  %v334_v13 = vld [vmem:[%s4052_s1 + $0x8d8] sm:$0xff] }
  0x5e   :  { %2297 = vmatprep.subr.bf16.mxu0 %v2296_v34  ;;  %v2348_v34 = vpack.c.bf16 %v268_v29, %v267_v28  ;;  %v38_v28 = vld [vmem:[%s4053_s0 + $0x60] sm:$0xff] }
  0x5f   :  { %2327 = vmatpush3.bf16.msra.mxu1 %v2326_v33  ;;  %v2378_v33 = vpack.c.bf16 %v282_v27, %v281_v25  ;;  %v326_v25 = vld [vmem:[%s4052_s1 + $0x898] sm:$0xff] }
  0x60   :  { %2329 = vmatprep.subr.bf16.mxu1 %v2328_v38  ;;  %v2380_v38 = vpack.c.bf16 %v300_v31, %v299_v30  ;;  %v358_v27 = vld [vmem:[%s4052_s1 + $0x998] sm:$0xff]  ;;  %v40_v30 = vld [vmem:[%s4053_s0 + $0x70] sm:$0xff] }
  0x61   :  { %2299 = vmatpush3.bf16.msra.mxu0 %v2298_v44  ;;  %v2350_v44 = vpack.c.bf16 %v252_v36, %v251_v35  ;;  %v341_v35 = vld [vmem:[%s4052_s1 + $0x910] sm:$0xff] }
  0x62   :  { %2333 = vmatprep.subr.bf16.mxu0 %v2332_v46  ;;  %v2352_v46 = vpack.c.bf16 %v270_v41, %v269_v40  ;;  %v359_v40 = vld [vmem:[%s4052_s1 + $0x9a0] sm:$0xff]  ;;  %v360_v41 = vld [vmem:[%s4052_s1 + $0x9a8] sm:$0xff] }
  0x63   :  { %2331 = vmatpush3.bf16.msra.mxu1 %v2330_v45  ;;  %v2382_v45 = vpack.c.bf16 %v284_v39, %v283_v37  ;;  %v342_v37 = vld [vmem:[%s4052_s1 + $0x918] sm:$0xff]  ;;  %v328_v39 = vld [vmem:[%s4052_s1 + $0x8a8] sm:$0xff] }
  0x64   :  { %2365 = vmatprep.subr.bf16.mxu1 %v2364_v50  ;;  %803 = vmatmul.mubr.f32.vlgmr.msra.gmra.mrb[4].mxu0 %v34_v56  ;;  %v2384_v50 = vpack.c.bf16 %v302_v43, %v301_v42  ;;  %v2354_v56 = vpack.c.bf16 %v254_v48, %v253_v47  ;;  %v43_v42 = vld [vmem:[%s4053_s0 + $0x88] sm:$0xff]  ;;  %v311_v47 = vld [vmem:[%s4052_s1 + $0x820] sm:$0xff] }
  0x65   :  { %2335 = vmatpush3.bf16.msra.mxu0 %v2334_v57  ;;  %942 = vmatprep.mubr.f32.mxu0 %v39_v6  ;;  %v2386_v57 = vpack.c.bf16 %v286_v51, %v285_v49  ;;  %v312_v48 = vld [vmem:[%s4052_s1 + $0x828] sm:$0xff]  ;;  %v343_v49 = vld [vmem:[%s4052_s1 + $0x920] sm:$0xff] }
  0x66   :  { %873 = vmatmul.mubr.f32.vlgmr.msra.gmra.mrb[4].mxu1 %v36_v58  ;;  %2337 = vmatprep.subr.bf16.mxu0 %v2336_v60  ;;  %v2356_v58 = vpack.c.bf16 %v272_v53, %v271_v52  ;;  %v256_v60 = vld [vmem:[%s4052_s1 + $0x668] sm:$0xff]  ;;  %v329_v52 = vld [vmem:[%s4052_s1 + $0x8b0] sm:$0xff]  ;;  %v330_v53 = vld [vmem:[%s4052_s1 + $0x8b8] sm:$0xff] }
  0x67   :  { %2367 = vmatpush3.bf16.msra.mxu1 %v2366_v59  ;;  %1012 = vmatprep.mubr.f32.mxu1 %v41_v8  ;;  %v255_v59 = vld [vmem:[%s4052_s1 + $0x660] sm:$0xff]  ;;  %v258_v8 = vld [vmem:[%s4052_s1 + $0x678] sm:$0xff]  ;;  %v344_v51 = vld [vmem:[%s4052_s1 + $0x928] sm:$0xff] }
  0x68   :  { %2369 = vmatprep.subr.bf16.mxu1 %v2368_v0  ;;  %v273_v0 = vld [vmem:[%s4052_s1 + $0x6f0] sm:$0xff]  ;;  %v2358_v4 = vpack.c.bf16 %v256_v60, %v255_v59  ;;  %v314_v60 = vld [vmem:[%s4052_s1 + $0x838] sm:$0xff] }
  0x69   :  { %2339 = vmatpush3.bf16.msra.mxu0 %v2338_v7  ;;  %v2360_v6 = vpack.c.bf16 %v274_v1, %v273_v0  ;;  %v257_v7 = vld [vmem:[%s4052_s1 + $0x670] sm:$0xff]  ;;  %v331_v0 = vld [vmem:[%s4052_s1 + $0x8c0] sm:$0xff]  ;;  %v332_v1 = vld [vmem:[%s4052_s1 + $0x8c8] sm:$0xff] }
  0x6a   :  { %2341 = vmatprep.subr.bf16.mxu0 %v2340_v10  ;;  %v2392_v10 = vpack.c.bf16 %v306_v3, %v305_v2  ;;  %v2362_v16 = vpack.c.bf16 %v258_v8, %v257_v7  ;;  %v313_v59 = vld [vmem:[%s4052_s1 + $0x830] sm:$0xff]  ;;  %v363_v2 = vld [vmem:[%s4052_s1 + $0x9c0] sm:$0xff]  ;;  %v364_v3 = vld [vmem:[%s4052_s1 + $0x9c8] sm:$0xff] }
  0x6b   :  { %2371 = vmatpush3.bf16.msra.mxu1 %v2370_v9  ;;  %v289_v9 = vld [vmem:[%s4052_s1 + $0x770] sm:$0xff]  ;;  %v315_v7 = vld [vmem:[%s4052_s1 + $0x840] sm:$0xff]  ;;  %v316_v8 = vld [vmem:[%s4052_s1 + $0x848] sm:$0xff] }
  0x6c   :  { %2373 = vmatprep.subr.bf16.mxu1 %v2372_v14  ;;  %v355_v14 = vld [vmem:[%s4052_s1 + $0x980] sm:$0xff]  ;;  %v2394_v17 = vpack.c.bf16 %v290_v11, %v289_v9  ;;  %v348_v11 = vld [vmem:[%s4052_s1 + $0x948] sm:$0xff] }
  0x6d   :  { %2343 = vmatpush3.bf16.msra.mxu0 %v2342_v20  ;;  %v308_v20 = vld [vmem:[%s4052_s1 + $0x808] sm:$0xff]  ;;  %v347_v9 = vld [vmem:[%s4052_s1 + $0x940] sm:$0xff] }
  0x6e   :  { %2345 = vmatprep.subr.bf16.mxu0 %v2344_v22  ;;  %v2428_v22 = vpack.c.bf16 %v356_v15, %v355_v14  ;;  %v2398_v29 = vpack.c.bf16 %v308_v20, %v307_v19  ;;  %v365_v14 = vld [vmem:[%s4052_s1 + $0x9d0] sm:$0xff]  ;;  %v366_v15 = vld [vmem:[%s4052_s1 + $0x9d8] sm:$0xff] }
  0x6f   :  { %2375 = vmatpush3.bf16.msra.mxu1 %v2374_v21  ;;  %v339_v21 = vld [vmem:[%s4052_s1 + $0x900] sm:$0xff]  ;;  %v317_v19 = vld [vmem:[%s4052_s1 + $0x850] sm:$0xff]  ;;  %v318_v20 = vld [vmem:[%s4052_s1 + $0x858] sm:$0xff] }
  0x70   :  { %2377 = vmatprep.subr.bf16.mxu1 %v2376_v26  ;;  %v357_v26 = vld [vmem:[%s4052_s1 + $0x990] sm:$0xff]  ;;  %v2430_v31 = vpack.c.bf16 %v340_v23, %v339_v21  ;;  %v350_v23 = vld [vmem:[%s4052_s1 + $0x958] sm:$0xff] }
  0x71   :  { %2347 = vmatpush3.bf16.msra.mxu0 %v2346_v32  ;;  %v2400_v32 = vpack.c.bf16 %v326_v25, %v325_v24  ;;  %v2432_v36 = vpack.c.bf16 %v358_v27, %v357_v26  ;;  %v349_v21 = vld [vmem:[%s4052_s1 + $0x950] sm:$0xff]  ;;  %v335_v24 = vld [vmem:[%s4052_s1 + $0x8e0] sm:$0xff]  ;;  %v336_v25 = vld [vmem:[%s4052_s1 + $0x8e8] sm:$0xff] }
  0x72   :  { %2349 = vmatprep.subr.bf16.mxu0 %v2348_v34  ;;  %v310_v34 = vld [vmem:[%s4052_s1 + $0x818] sm:$0xff]  ;;  %v367_v26 = vld [vmem:[%s4052_s1 + $0x9e0] sm:$0xff]  ;;  %v368_v27 = vld [vmem:[%s4052_s1 + $0x9e8] sm:$0xff] }
  0x73   :  { %2379 = vmatpush3.bf16.msra.mxu1 %v2378_v33  ;;  %v309_v33 = vld [vmem:[%s4052_s1 + $0x810] sm:$0xff] }
  0x74   :  { %2381 = vmatprep.subr.bf16.mxu1 %v2380_v38  ;;  %v327_v38 = vld [vmem:[%s4052_s1 + $0x8a0] sm:$0xff]  ;;  %v2402_v43 = vpack.c.bf16 %v310_v34, %v309_v33  ;;  %v2452_v34 = vpack.c.bf16 %v368_v27, %v367_v26  ;;  %v425_v26 = vld [vmem:[%s4052_s1 + $0xbb0] sm:$0xff]  ;;  %v426_v27 = vld [vmem:[%s4052_s1 + $0xbb8] sm:$0xff] }
  0x75   :  { %2351 = vmatpush3.bf16.msra.mxu0 %v2350_v44  ;;  %v45_v44 = vld [vmem:[%s4053_s0 + $0x98] sm:$0xff]  ;;  %v351_v33 = vld [vmem:[%s4052_s1 + $0x960] sm:$0xff] }
  0x76   :  { %2353 = vmatprep.subr.bf16.mxu0 %v2352_v46  ;;  %v2404_v46 = vpack.c.bf16 %v328_v39, %v327_v38  ;;  %v369_v38 = vld [vmem:[%s4052_s1 + $0x9f0] sm:$0xff]  ;;  %v370_v39 = vld [vmem:[%s4052_s1 + $0x9f8] sm:$0xff] }
  0x77   :  { %2383 = vmatpush3.bf16.msra.mxu1 %v2382_v45  ;;  %v2434_v45 = vpack.c.bf16 %v342_v37, %v341_v35  ;;  %v352_v35 = vld [vmem:[%s4052_s1 + $0x968] sm:$0xff]  ;;  %v338_v37 = vld [vmem:[%s4052_s1 + $0x8f8] sm:$0xff] }
  0x78   :  { %2385 = vmatprep.subr.bf16.mxu1 %v2384_v50  ;;  %v2436_v50 = vpack.c.bf16 %v360_v41, %v359_v40  ;;  %v2454_v41 = vpack.c.bf16 %v352_v35, %v351_v33  ;;  %v409_v33 = vld [vmem:[%s4052_s1 + $0xb30] sm:$0xff]  ;;  %v410_v35 = vld [vmem:[%s4052_s1 + $0xb38] sm:$0xff] }
  0x79   :  { %2355 = vmatpush3.bf16.msra.mxu0 %v2354_v56  ;;  %v2406_v56 = vpack.c.bf16 %v312_v48, %v311_v47  ;;  %v354_v47 = vld [vmem:[%s4052_s1 + $0x978] sm:$0xff]  ;;  %v387_v48 = vld [vmem:[%s4052_s1 + $0xa80] sm:$0xff] }
  0x7a   :  { %2357 = vmatprep.subr.bf16.mxu0 %v2356_v58  ;;  %v2408_v58 = vpack.c.bf16 %v330_v53, %v329_v52 }
  0x7b   :  { %2387 = vmatpush3.bf16.msra.mxu1 %v2386_v57  ;;  %v2438_v57 = vpack.c.bf16 %v344_v51, %v343_v49  ;;  %v388_v49 = vld [vmem:[%s4052_s1 + $0xa88] sm:$0xff] }
  0x7c   :  { %2389 = vmatprep.subr.bf16.mxu1 %v2388_v62  ;;  %v2440_v62 = vpack.c.bf16 %v362_v55, %v361_v54  ;;  %v420_v51 = vld [vmem:[%s4052_s1 + $0xb88] sm:$0xff]  ;;  %v2460_v54 = vpack.c.bf16 %v388_v49, %v387_v48  ;;  %v371_v55 = vld [vmem:[%s4052_s1 + $0xa00] sm:$0xff]  ;;  %v397_v48 = vld [vmem:[%s4052_s1 + $0xad0] sm:$0xff] }
  0x7d   :  { %2359 = vmatpush3.bf16.msra.mxu0 %v2358_v4  ;;  %v2410_v4 = vpack.c.bf16 %v314_v60, %v313_v59  ;;  %v404_v59 = vld [vmem:[%s4052_s1 + $0xb08] sm:$0xff]  ;;  %v389_v60 = vld [vmem:[%s4052_s1 + $0xa90] sm:$0xff]  ;;  %v398_v49 = vld [vmem:[%s4052_s1 + $0xad8] sm:$0xff] }
  0x7e   :  { %2361 = vmatprep.subr.bf16.mxu0 %v2360_v6  ;;  %v2412_v6 = vpack.c.bf16 %v332_v1, %v331_v0  ;;  %v42_v0 = vld [vmem:[%s4053_s0 + $0x80] sm:$0xff] }
  0x7f   :  { %2391 = vmatpush3.bf16.msra.mxu1 %v2390_v5  ;;  %v2442_v5 = vpack.c.bf16 %v346_v63, %v345_v61  ;;  %v390_v61 = vld [vmem:[%s4052_s1 + $0xa98] sm:$0xff] }
  0x80   :  { %2393 = vmatprep.subr.bf16.mxu1 %v2392_v10  ;;  %v2444_v10 = vpack.c.bf16 %v364_v3, %v363_v2  ;;  %v422_v63 = vld [vmem:[%s4052_s1 + $0xb98] sm:$0xff]  ;;  %v44_v2 = vld [vmem:[%s4053_s0 + $0x90] sm:$0xff] }
  0x81   :  { %2363 = vmatpush3.bf16.msra.mxu0 %v2362_v16  ;;  %v2414_v16 = vpack.c.bf16 %v316_v8, %v315_v7  ;;  %v405_v7 = vld [vmem:[%s4052_s1 + $0xb10] sm:$0xff] }
  0x82   :  { %2397 = vmatprep.subr.bf16.mxu0 %v2396_v18  ;;  %v2416_v18 = vpack.c.bf16 %v334_v13, %v333_v12  ;;  %v423_v12 = vld [vmem:[%s4052_s1 + $0xba0] sm:$0xff]  ;;  %v424_v13 = vld [vmem:[%s4052_s1 + $0xba8] sm:$0xff] }
  0x83   :  { %2395 = vmatpush3.bf16.msra.mxu1 %v2394_v17  ;;  %v2446_v17 = vpack.c.bf16 %v348_v11, %v347_v9  ;;  %v406_v9 = vld [vmem:[%s4052_s1 + $0xb18] sm:$0xff]  ;;  %v392_v11 = vld [vmem:[%s4052_s1 + $0xaa8] sm:$0xff] }
  0x84   :  { %2429 = vmatprep.subr.bf16.mxu1 %v2428_v22  ;;  %943 = vmatmul.mubr.f32.vlgmr.msra.gmra.mrb[6].mxu0 %v38_v28  ;;  %v2448_v22 = vpack.c.bf16 %v366_v15, %v365_v14  ;;  %v2418_v28 = vpack.c.bf16 %v318_v20, %v317_v19  ;;  %v47_v14 = vld [vmem:[%s4053_s0 + $0xa8] sm:$0xff]  ;;  %v375_v19 = vld [vmem:[%s4052_s1 + $0xa20] sm:$0xff] }
  0x85   :  { %2399 = vmatpush3.bf16.msra.mxu0 %v2398_v29  ;;  %1082 = vmatprep.mubr.f32.mxu0 %v43_v42  ;;  %v2450_v29 = vpack.c.bf16 %v350_v23, %v349_v21  ;;  %v376_v20 = vld [vmem:[%s4052_s1 + $0xa28] sm:$0xff]  ;;  %v407_v21 = vld [vmem:[%s4052_s1 + $0xb20] sm:$0xff] }
  0x86   :  { %1013 = vmatmul.mubr.f32.vlgmr.msra.gmra.mrb[6].mxu1 %v40_v30  ;;  %2401 = vmatprep.subr.bf16.mxu0 %v2400_v32  ;;  %v2420_v30 = vpack.c.bf16 %v336_v25, %v335_v24  ;;  %v320_v32 = vld [vmem:[%s4052_s1 + $0x868] sm:$0xff]  ;;  %v393_v24 = vld [vmem:[%s4052_s1 + $0xab0] sm:$0xff]  ;;  %v394_v25 = vld [vmem:[%s4052_s1 + $0xab8] sm:$0xff] }
  0x87   :  { %2431 = vmatpush3.bf16.msra.mxu1 %v2430_v31  ;;  %1152 = vmatprep.mubr.f32.mxu1 %v45_v44  ;;  %v319_v31 = vld [vmem:[%s4052_s1 + $0x860] sm:$0xff]  ;;  %v322_v44 = vld [vmem:[%s4052_s1 + $0x878] sm:$0xff]  ;;  %v408_v23 = vld [vmem:[%s4052_s1 + $0xb28] sm:$0xff] }
  0x88   :  { %2433 = vmatprep.subr.bf16.mxu1 %v2432_v36  ;;  %v337_v36 = vld [vmem:[%s4052_s1 + $0x8f0] sm:$0xff]  ;;  %v2422_v40 = vpack.c.bf16 %v320_v32, %v319_v31  ;;  %v378_v32 = vld [vmem:[%s4052_s1 + $0xa38] sm:$0xff] }
  0x89   :  { %2403 = vmatpush3.bf16.msra.mxu0 %v2402_v43  ;;  %v2424_v42 = vpack.c.bf16 %v338_v37, %v337_v36  ;;  %v321_v43 = vld [vmem:[%s4052_s1 + $0x870] sm:$0xff]  ;;  %v395_v36 = vld [vmem:[%s4052_s1 + $0xac0] sm:$0xff]  ;;  %v396_v37 = vld [vmem:[%s4052_s1 + $0xac8] sm:$0xff] }
  0x8a   :  { %2405 = vmatprep.subr.bf16.mxu0 %v2404_v46  ;;  %v2456_v46 = vpack.c.bf16 %v370_v39, %v369_v38  ;;  %v2426_v52 = vpack.c.bf16 %v322_v44, %v321_v43  ;;  %v377_v31 = vld [vmem:[%s4052_s1 + $0xa30] sm:$0xff]  ;;  %v427_v38 = vld [vmem:[%s4052_s1 + $0xbc0] sm:$0xff]  ;;  %v428_v39 = vld [vmem:[%s4052_s1 + $0xbc8] sm:$0xff] }
  0x8b   :  { %2435 = vmatpush3.bf16.msra.mxu1 %v2434_v45  ;;  %v353_v45 = vld [vmem:[%s4052_s1 + $0x970] sm:$0xff]  ;;  %v379_v43 = vld [vmem:[%s4052_s1 + $0xa40] sm:$0xff]  ;;  %v380_v44 = vld [vmem:[%s4052_s1 + $0xa48] sm:$0xff] }
  0x8c   :  { %2437 = vmatprep.subr.bf16.mxu1 %v2436_v50  ;;  %v419_v50 = vld [vmem:[%s4052_s1 + $0xb80] sm:$0xff]  ;;  %v2458_v53 = vpack.c.bf16 %v354_v47, %v353_v45  ;;  %v412_v47 = vld [vmem:[%s4052_s1 + $0xb48] sm:$0xff] }
  0x8d   :  { %2407 = vmatpush3.bf16.msra.mxu0 %v2406_v56  ;;  %v372_v56 = vld [vmem:[%s4052_s1 + $0xa08] sm:$0xff]  ;;  %v411_v45 = vld [vmem:[%s4052_s1 + $0xb40] sm:$0xff] }
  0x8e   :  { %2409 = vmatprep.subr.bf16.mxu0 %v2408_v58  ;;  %v2492_v58 = vpack.c.bf16 %v420_v51, %v419_v50  ;;  %v2462_v1 = vpack.c.bf16 %v372_v56, %v371_v55  ;;  %v429_v50 = vld [vmem:[%s4052_s1 + $0xbd0] sm:$0xff]  ;;  %v430_v51 = vld [vmem:[%s4052_s1 + $0xbd8] sm:$0xff] }
  0x8f   :  { %2439 = vmatpush3.bf16.msra.mxu1 %v2438_v57  ;;  %v403_v57 = vld [vmem:[%s4052_s1 + $0xb00] sm:$0xff]  ;;  %v381_v55 = vld [vmem:[%s4052_s1 + $0xa50] sm:$0xff]  ;;  %v382_v56 = vld [vmem:[%s4052_s1 + $0xa58] sm:$0xff] }
  0x90   :  { %2441 = vmatprep.subr.bf16.mxu1 %v2440_v62  ;;  %v421_v62 = vld [vmem:[%s4052_s1 + $0xb90] sm:$0xff]  ;;  %v2494_v3 = vpack.c.bf16 %v404_v59, %v403_v57  ;;  %v414_v59 = vld [vmem:[%s4052_s1 + $0xb58] sm:$0xff] }
  0x91   :  { %2411 = vmatpush3.bf16.msra.mxu0 %v2410_v4  ;;  %v2464_v4 = vpack.c.bf16 %v390_v61, %v389_v60  ;;  %v2496_v8 = vpack.c.bf16 %v422_v63, %v421_v62  ;;  %v413_v57 = vld [vmem:[%s4052_s1 + $0xb50] sm:$0xff]  ;;  %v399_v60 = vld [vmem:[%s4052_s1 + $0xae0] sm:$0xff]  ;;  %v400_v61 = vld [vmem:[%s4052_s1 + $0xae8] sm:$0xff] }
  0x92   :  { %2413 = vmatprep.subr.bf16.mxu0 %v2412_v6  ;;  %v374_v6 = vld [vmem:[%s4052_s1 + $0xa18] sm:$0xff]  ;;  %v431_v62 = vld [vmem:[%s4052_s1 + $0xbe0] sm:$0xff]  ;;  %v432_v63 = vld [vmem:[%s4052_s1 + $0xbe8] sm:$0xff] }
  0x93   :  { %2443 = vmatpush3.bf16.msra.mxu1 %v2442_v5  ;;  %v373_v5 = vld [vmem:[%s4052_s1 + $0xa10] sm:$0xff] }
  0x94   :  { %2445 = vmatprep.subr.bf16.mxu1 %v2444_v10  ;;  %v391_v10 = vld [vmem:[%s4052_s1 + $0xaa0] sm:$0xff]  ;;  %v2466_v15 = vpack.c.bf16 %v374_v6, %v373_v5  ;;  %v2516_v6 = vpack.c.bf16 %v432_v63, %v431_v62 }
  0x95   :  { %2415 = vmatpush3.bf16.msra.mxu0 %v2414_v16  ;;  %v49_v16 = vld [vmem:[%s4053_s0 + $0xb8] sm:$0xff]  ;;  %v415_v5 = vld [vmem:[%s4052_s1 + $0xb60] sm:$0xff] }
  0x96   :  { %2417 = vmatprep.subr.bf16.mxu0 %v2416_v18  ;;  %v2468_v18 = vpack.c.bf16 %v392_v11, %v391_v10  ;;  %v433_v10 = vld [vmem:[%s4052_s1 + $0xbf0] sm:$0xff]  ;;  %v434_v11 = vld [vmem:[%s4052_s1 + $0xbf8] sm:$0xff] }
  0x97   :  { %2447 = vmatpush3.bf16.msra.mxu1 %v2446_v17  ;;  %v2498_v17 = vpack.c.bf16 %v406_v9, %v405_v7  ;;  %v416_v7 = vld [vmem:[%s4052_s1 + $0xb68] sm:$0xff]  ;;  %v402_v9 = vld [vmem:[%s4052_s1 + $0xaf8] sm:$0xff] }
  0x98   :  { %2449 = vmatprep.subr.bf16.mxu1 %v2448_v22  ;;  %v2500_v22 = vpack.c.bf16 %v424_v13, %v423_v12  ;;  %v2518_v13 = vpack.c.bf16 %v416_v7, %v415_v5  ;;  %v1372_v7 = vld [vmem:[%s4055_s3 + $0x18] sm:$0xff] }
  0x99   :  { %2419 = vmatpush3.bf16.msra.mxu0 %v2418_v28  ;;  %v2470_v28 = vpack.c.bf16 %v376_v20, %v375_v19  ;;  %v418_v19 = vld [vmem:[%s4052_s1 + $0xb78] sm:$0xff] }
  0x9a   :  { %2421 = vmatprep.subr.bf16.mxu0 %v2420_v30  ;;  %v2472_v30 = vpack.c.bf16 %v394_v25, %v393_v24  ;;  %v46_v24 = vld [vmem:[%s4053_s0 + $0xa0] sm:$0xff] }
  0x9b   :  { %2451 = vmatpush3.bf16.msra.mxu1 %v2450_v29  ;;  %v2502_v29 = vpack.c.bf16 %v408_v23, %v407_v21  ;;  %v436_v23 = vld [vmem:[%s4052_s1 + $0xc08] sm:$0xff] }
  0x9c   :  { %2453 = vmatprep.subr.bf16.mxu1 %v2452_v34  ;;  %v2504_v34 = vpack.c.bf16 %v426_v27, %v425_v26  ;;  %v2599_v26 = vmov 0.0|0.0   ;;  %v48_v27 = vld [vmem:[%s4053_s0 + $0xb0] sm:$0xff] }
  0x9d   :  { %2423 = vmatpush3.bf16.msra.mxu0 %v2422_v40  ;;  %v2474_v40 = vpack.c.bf16 %v378_v32, %v377_v31  ;;  %v439_v31 = vld [vmem:[%s4052_s1 + $0xc20] sm:$0xff]  ;;  %v440_v32 = vld [vmem:[%s4052_s1 + $0xc28] sm:$0xff] }
  0x9e   :  { %2425 = vmatprep.subr.bf16.mxu0 %v2424_v42  ;;  %v2476_v42 = vpack.c.bf16 %v396_v37, %v395_v36  ;;  %v442_v36 = vld [vmem:[%s4052_s1 + $0xc38] sm:$0xff] }
  0x9f   :  { %2455 = vmatpush3.bf16.msra.mxu1 %v2454_v41  ;;  %v2506_v41 = vpack.c.bf16 %v410_v35, %v409_v33  ;;  %v2601_v33 = vmov 0.0   ;;  %v441_v35 = vld [vmem:[%s4052_s1 + $0xc30] sm:$0xff] }
  0xa0   :  { %2457 = vmatprep.subr.bf16.mxu1 %v2456_v46  ;;  %v2508_v46 = vpack.c.bf16 %v428_v39, %v427_v38  ;;  %v2534_v37 = vpack.c.bf16 %v442_v36, %v441_v35  ;;  %v443_v38 = vld [vmem:[%s4052_s1 + $0xc40] sm:$0xff]  ;;  %v444_v39 = vld [vmem:[%s4052_s1 + $0xc48] sm:$0xff] }
  0xa1   :  { %2427 = vmatpush3.bf16.msra.mxu0 %v2426_v52  ;;  %v2478_v52 = vpack.c.bf16 %v380_v44, %v379_v43  ;;  %v447_v44 = vld [vmem:[%s4052_s1 + $0xc60] sm:$0xff] }
  0xa2   :  { %2461 = vmatprep.subr.bf16.mxu0 %v2460_v54  ;;  %v2480_v54 = vpack.c.bf16 %v398_v49, %v397_v48  ;;  %v450_v48 = vld [vmem:[%s4052_s1 + $0xc78] sm:$0xff] }
  0xa3   :  { %2459 = vmatpush3.bf16.msra.mxu1 %v2458_v53  ;;  %v2510_v53 = vpack.c.bf16 %v412_v47, %v411_v45  ;;  %v448_v45 = vld [vmem:[%s4052_s1 + $0xc68] sm:$0xff]  ;;  %v449_v47 = vld [vmem:[%s4052_s1 + $0xc70] sm:$0xff] }
  0xa4   :  { %2493 = vmatprep.subr.bf16.mxu1 %v2492_v58  ;;  %1083 = vmatmul.mubr.f32.vlgmr.msra.gmra.mrb[8].mxu0 %v42_v0  ;;  %v2512_v58 = vpack.c.bf16 %v430_v51, %v429_v50  ;;  %v2482_v0 = vpack.c.bf16 %v382_v56, %v381_v55  ;;  %v2546_v49 = vpack.c.bf16 %v450_v48, %v449_v47  ;;  %v50_v50 = vld [vmem:[%s4053_s0 + $0xc0] sm:$0xff]  ;;  %v1470_v47 = vld [vmem:[%s4056_s5 + $0x38] sm:$0xff] }
  0xa5   :  { %2463 = vmatpush3.bf16.msra.mxu0 %v2462_v1  ;;  %1222 = vmatprep.mubr.f32.mxu0 %v47_v14  ;;  %v2514_v1 = vpack.c.bf16 %v414_v59, %v413_v57 }
  0xa6   :  { %1153 = vmatmul.mubr.f32.vlgmr.msra.gmra.mrb[8].mxu1 %v44_v2  ;;  %2465 = vmatprep.subr.bf16.mxu0 %v2464_v4  ;;  %v2484_v2 = vpack.c.bf16 %v400_v61, %v399_v60  ;;  %v384_v4 = vld [vmem:[%s4052_s1 + $0xa68] sm:$0xff] }
  0xa7   :  { %2495 = vmatpush3.bf16.msra.mxu1 %v2494_v3  ;;  %1292 = vmatprep.mubr.f32.mxu1 %v49_v16  ;;  %v383_v3 = vld [vmem:[%s4052_s1 + $0xa60] sm:$0xff]  ;;  %v386_v16 = vld [vmem:[%s4052_s1 + $0xa78] sm:$0xff] }
  0xa8   :  { %2497 = vmatprep.subr.bf16.mxu1 %v2496_v8  ;;  %v401_v8 = vld [vmem:[%s4052_s1 + $0xaf0] sm:$0xff]  ;;  %v2486_v12 = vpack.c.bf16 %v384_v4, %v383_v3  ;;  %v1370_v3 = vld [vmem:[%s4055_s3 + $0x8] sm:$0xff] }
  0xa9   :  { %2467 = vmatpush3.bf16.msra.mxu0 %v2466_v15  ;;  %v2488_v14 = vpack.c.bf16 %v402_v9, %v401_v8  ;;  %v385_v15 = vld [vmem:[%s4052_s1 + $0xa70] sm:$0xff] }
  0xaa   :  { %2469 = vmatprep.subr.bf16.mxu0 %v2468_v18  ;;  %v417_v18 = vld [vmem:[%s4052_s1 + $0xb70] sm:$0xff]  ;;  %v2490_v20 = vpack.c.bf16 %v386_v16, %v385_v15  ;;  %v1377_v16 = vld [vmem:[%s4055_s3 + $0x40] sm:$0xff] }
  0xab   :  { %2499 = vmatpush3.bf16.msra.mxu1 %v2498_v17  ;;  %v2520_v17 = vpack.c.bf16 %v434_v11, %v433_v10  ;;  %v2522_v21 = vpack.c.bf16 %v418_v19, %v417_v18  ;;  %v1373_v10 = vld [vmem:[%s4055_s3 + $0x20] sm:$0xff]  ;;  %v1374_v11 = vld [vmem:[%s4055_s3 + $0x28] sm:$0xff]  ;;  %v1379_v19 = vld [vmem:[%s4055_s3 + $0x50] sm:$0xff] }
  0xac   :  { %2501 = vmatprep.subr.bf16.mxu1 %v2500_v22  ;;  %v435_v22 = vld [vmem:[%s4052_s1 + $0xc00] sm:$0xff] }
  0xad   :  { %2471 = vmatpush3.bf16.msra.mxu0 %v2470_v28  ;;  %v2525_v25 = vpack.c.bf16 %v436_v23, %v435_v22  ;;  %v437_v28 = vld [vmem:[%s4052_s1 + $0xc10] sm:$0xff]  ;;  %v1381_v22 = vld [vmem:[%s4055_s3 + $0x60] sm:$0xff]  ;;  %v1382_v23 = vld [vmem:[%s4055_s3 + $0x68] sm:$0xff] }
  0xae   :  { %2473 = vmatprep.subr.bf16.mxu0 %v2472_v30 }
  0xaf   :  { %2503 = vmatpush3.bf16.msra.mxu1 %v2502_v29  ;;  %v438_v29 = vld [vmem:[%s4052_s1 + $0xc18] sm:$0xff] }
  0xb0   :  { %2505 = vmatprep.subr.bf16.mxu1 %v2504_v34  ;;  %v2528_v30 = vpack.c.bf16 %v438_v29, %v437_v28  ;;  %v2531_v34 = vpack.c.bf16 %v440_v32, %v439_v31 }
  0xb1   :  { %2475 = vmatpush3.bf16.msra.mxu0 %v2474_v40  ;;  %v2537_v40 = vpack.c.bf16 %v444_v39, %v443_v38  ;;  %v1464_v38 = vld [vmem:[%s4056_s5 + $0x8] sm:$0xff]  ;;  %v1465_v39 = vld [vmem:[%s4056_s5 + $0x10] sm:$0xff] }
  0xb2   :  { %2477 = vmatprep.subr.bf16.mxu0 %v2476_v42  ;;  %v446_v42 = vld [vmem:[%s4052_s1 + $0xc58] sm:$0xff] }
  0xb3   :  { %2507 = vmatpush3.bf16.msra.mxu1 %v2506_v41  ;;  %v445_v41 = vld [vmem:[%s4052_s1 + $0xc50] sm:$0xff] }
  0xb4   :  { %2509 = vmatprep.subr.bf16.mxu1 %v2508_v46  ;;  %v2540_v43 = vpack.c.bf16 %v446_v42, %v445_v41  ;;  %v2543_v46 = vpack.c.bf16 %v448_v45, %v447_v44  ;;  %v1466_v41 = vld [vmem:[%s4056_s5 + $0x18] sm:$0xff]  ;;  %v1468_v44 = vld [vmem:[%s4056_s5 + $0x28] sm:$0xff] }
  0xb5   :  { %2479 = vmatpush3.bf16.msra.mxu0 %v2478_v52  ;;  %v1561_v52 = vld [vmem:[%s4054_s2] ss:$0 sm:$0xff]  ;;  %v2576_v42 = vpack.c.bf16 %v1466_v41, %v1465_v39 }
  0xb6   :  { %2481 = vmatprep.subr.bf16.mxu0 %v2480_v54 }
  0xb7   :  { %2511 = vmatpush3.bf16.msra.mxu1 %v2510_v53 }
  0xb8   :  { %2513 = vmatprep.subr.bf16.mxu1 %v2512_v58 }
  0xb9   :  { %2483 = vmatpush3.bf16.msra.mxu0 %v2482_v0 }
  0xba   :  { %2485 = vmatprep.subr.bf16.mxu0 %v2484_v2  ;;  %v1369_v2 = vld [vmem:[%s4055_s3] sm:$0xff] }
  0xbb   :  { %2515 = vmatpush3.bf16.msra.mxu1 %v2514_v1  ;;  %v2549_v5 = vpack.c.bf16 %v1370_v3, %v1369_v2 }
  0xbc   :  { %2517 = vmatprep.subr.bf16.mxu1 %v2516_v6  ;;  %v1371_v6 = vld [vmem:[%s4055_s3 + $0x10] sm:$0xff] }
  0xbd   :  { %2487 = vmatpush3.bf16.msra.mxu0 %v2486_v12  ;;  %v2552_v9 = vpack.c.bf16 %v1372_v7, %v1371_v6  ;;  %v2555_v12 = vpack.c.bf16 %v1374_v11, %v1373_v10 }
  0xbe   :  { %2489 = vmatprep.subr.bf16.mxu0 %v2488_v14  ;;  %v1376_v14 = vld [vmem:[%s4055_s3 + $0x38] sm:$0xff] }
  0xbf   :  { %2519 = vmatpush3.bf16.msra.mxu1 %v2518_v13  ;;  %v1375_v13 = vld [vmem:[%s4055_s3 + $0x30] sm:$0xff] }
  0xc0   :  { %2521 = vmatprep.subr.bf16.mxu1 %v2520_v17  ;;  %v2558_v15 = vpack.c.bf16 %v1376_v14, %v1375_v13  ;;  %v1378_v17 = vld [vmem:[%s4055_s3 + $0x48] sm:$0xff] }
  0xc1   :  { %2491 = vmatpush3.bf16.msra.mxu0 %v2490_v20  ;;  %v2561_v18 = vpack.c.bf16 %v1378_v17, %v1377_v16  ;;  %v1380_v20 = vld [vmem:[%s4055_s3 + $0x58] sm:$0xff] }
  0xc2   :  { %2524 = vmatprep.subr.bf16.mxu0 %v2599_v26 }
  0xc3   :  { %2523 = vmatpush3.bf16.msra.mxu1 %v2522_v21  ;;  %v2564_v21 = vpack.c.bf16 %v1380_v20, %v1379_v19 }
  0xc4   :  { %2548 = vmatprep.subr.bf16.mxu1 %v2599_v26  ;;  %1223 = vmatmul.mubr.f32.vlgmr.msra.gmra.mrb[10].mxu0 %v46_v24  ;;  %v2567_v24 = vpack.c.bf16 %v1382_v23, %v1381_v22  ;;  %v1478_v22 = vld [vmem:[%s4056_s5 + $0x78] sm:$0xff] }
  0xc5   :  { %2526 = vmatpush3.bf16.msra.mxu0 %v2525_v25  ;;  %2067 = vmatprep.mubr.msk.f32.mxu0 %vm2600_vm0, %v2601_v33  ;;  %v1383_v25 = vld [vmem:[%s4055_s3 + $0x70] sm:$0xff] }
  0xc6   :  { %1293 = vmatmul.mubr.f32.vlgmr.msra.gmra.mrb[10].mxu1 %v48_v27  ;;  %2527 = vmatprep.subr.bf16.mxu0 %v2599_v26  ;;  %v1384_v27 = vld [vmem:[%s4055_s3 + $0x78] sm:$0xff] }
  0xc7   :  { %2102 = vmatprep.mubr.msk.f32.mxu1 %vm2600_vm0, %v2601_v33  ;;  %2550 = vmatpush3.bf16.msra.mxu1 %v2549_v5  ;;  %v2570_v29 = vpack.c.bf16 %v1384_v27, %v1383_v25 }
  0xc8   :  { %2551 = vmatprep.subr.bf16.mxu1 %v2599_v26 }
  0xc9   :  { %2529 = vmatpush3.bf16.msra.mxu0 %v2528_v30 }
  0xca   :  { %2530 = vmatprep.subr.bf16.mxu0 %v2599_v26 }
  0xcb   :  { %2553 = vmatpush3.bf16.msra.mxu1 %v2552_v9 }
  0xcc   :  { %2554 = vmatprep.subr.bf16.mxu1 %v2599_v26 }
  0xcd   :  { %2532 = vmatpush3.bf16.msra.mxu0 %v2531_v34 }
  0xce   :  { %2533 = vmatprep.subr.bf16.mxu0 %v2599_v26 }
  0xcf   :  { %2556 = vmatpush3.bf16.msra.mxu1 %v2555_v12 }
  0xd0   :  { %2557 = vmatprep.subr.bf16.mxu1 %v2599_v26 }
  0xd1   :  { %2535 = vmatpush3.bf16.msra.mxu0 %v2534_v37  ;;  %v1463_v37 = vld [vmem:[%s4056_s5] sm:$0xff] }
  0xd2   :  { %2536 = vmatprep.subr.bf16.mxu0 %v2599_v26 }
  0xd3   :  { %2559 = vmatpush3.bf16.msra.mxu1 %v2558_v15 }
  0xd4   :  { %2560 = vmatprep.subr.bf16.mxu1 %v2599_v26 }
  0xd5   :  { %2538 = vmatpush3.bf16.msra.mxu0 %v2537_v40  ;;  %v2573_v40 = vpack.c.bf16 %v1464_v38, %v1463_v37 }
  0xd6   :  { %2539 = vmatprep.subr.bf16.mxu0 %v2599_v26 }
  0xd7   :  { %2562 = vmatpush3.bf16.msra.mxu1 %v2561_v18 }
  0xd8   :  { %2563 = vmatprep.subr.bf16.mxu1 %v2599_v26 }
  0xd9   :  { %2541 = vmatpush3.bf16.msra.mxu0 %v2540_v43  ;;  %v1467_v43 = vld [vmem:[%s4056_s5 + $0x20] sm:$0xff] }
  0xda   :  { %2542 = vmatprep.subr.bf16.mxu0 %v2599_v26  ;;  %v2579_v45 = vpack.c.bf16 %v1468_v44, %v1467_v43 }
  0xdb   :  { %2565 = vmatpush3.bf16.msra.mxu1 %v2564_v21  ;;  %v1477_v21 = vld [vmem:[%s4056_s5 + $0x70] sm:$0xff] }
  0xdc   :  { %2566 = vmatprep.subr.bf16.mxu1 %v2599_v26  ;;  %v2594_v23 = vpack.c.bf16 %v1478_v22, %v1477_v21 }
  0xdd   :  { %2544 = vmatpush3.bf16.msra.mxu0 %v2543_v46  ;;  %v1469_v46 = vld [vmem:[%s4056_s5 + $0x30] sm:$0xff] }
  0xde   :  { %2545 = vmatprep.subr.bf16.mxu0 %v2599_v26  ;;  %v2582_v48 = vpack.c.bf16 %v1470_v47, %v1469_v46 }
  0xdf   :  { %2568 = vmatpush3.bf16.msra.mxu1 %v2567_v24  ;;  %v1562_v24 = vld [vmem:[%s4057_s4] ss:$0 sm:$0xff] }
  0xe0   :  { %2569 = vmatprep.subr.bf16.mxu1 %v2599_v26 }
  0xe1   :  { %2547 = vmatpush3.bf16.msra.mxu0 %v2546_v49  ;;  %v1471_v49 = vld [vmem:[%s4056_s5 + $0x40] sm:$0xff] }
  0xe2   :  { %2572 = vmatprep.subr.bf16.mxu0 %v2599_v26 }
  0xe3   :  { %2571 = vmatpush3.bf16.msra.mxu1 %v2570_v29 }
  0xe4   :  { %2068 = vmatmul.mubr.f32.vlgmr.msra.gmra.mrb[12].mxu0 %v50_v50  ;;  %v1472_v50 = vld [vmem:[%s4056_s5 + $0x48] sm:$0xff] }
  0xe5   :  { %2137 = vmatprep.mubr.msk.f32.mxu0 %vm2600_vm0, %v2601_v33  ;;  %2574 = vmatpush3.bf16.msra.mxu0 %v2573_v40 }
  0xe6   :  { %2575 = vmatprep.subr.bf16.mxu0 %v2599_v26 }
  0xe9   :  { %2577 = vmatpush3.bf16.msra.mxu0 %v2576_v42 }
  0xea   :  { %2578 = vmatprep.subr.bf16.mxu0 %v2599_v26 }
  0xed   :  { %2580 = vmatpush3.bf16.msra.mxu0 %v2579_v45 }
  0xee   :  { %2581 = vmatprep.subr.bf16.mxu0 %v2599_v26 }
  0xf1   :  { %2583 = vmatpush3.bf16.msra.mxu0 %v2582_v48 }
  0xf2   :  { %2584 = vmatprep.subr.bf16.mxu0 %v2599_v26 }
  0xf7   :  { %v1596_v51 = vpop.f32.mrb[0].mxu0 }
  0xf8   :  { %v1597_v53 = vpop.f32.mrb[1].mxu0 }
  0xf9   :  { %v1631_v54 = vpop.f32.mrb[0].mxu1  ;;  %v1598_v55 = vadd.f32 %v1597_v53, %v1596_v51  ;;  %v2585_v51 = vpack.c.bf16 %v1472_v50, %v1471_v49  ;;  %v1474_v53 = vld [vmem:[%s4056_s5 + $0x58] sm:$0xff] }
  0xfa   :  { %v1632_v56 = vpop.f32.mrb[1].mxu1 }
  0xfb   :  { %v1633_v57 = vadd.f32 %v1632_v56, %v1631_v54  ;;  %v525_v58 = vadd.f32 %v1598_v55, %v1561_v52  ;;  %v1473_v52 = vld [vmem:[%s4056_s5 + $0x50] sm:$0xff]  ;;  %2586 = vmatpush3.bf16.msra.mxu0 %v2585_v51  ;;  %v1475_v55 = vld [vmem:[%s4056_s5 + $0x60] sm:$0xff]  ;;  %v1476_v56 = vld [vmem:[%s4056_s5 + $0x68] sm:$0xff] }
  0xfc   :  { %v2588_v54 = vpack.c.bf16 %v1474_v53, %v1473_v52  ;;  %2587 = vmatprep.subr.bf16.mxu0 %v2599_v26 }
  0xfd   :  { %v595_v59 = vadd.f32 %v1633_v57, %v525_v58  ;;  %v2591_v57 = vpack.c.bf16 %v1476_v56, %v1475_v55 }
  0xff   :  { %2589 = vmatpush3.bf16.msra.mxu0 %v2588_v54 }
 0x100   :  { %2590 = vmatprep.subr.bf16.mxu0 %v2599_v26 }
 0x103   :  { %2592 = vmatpush3.bf16.msra.mxu0 %v2591_v57 }
 0x104   :  { %2593 = vmatprep.subr.bf16.mxu0 %v2599_v26 }
 0x107   :  { %2595 = vmatpush3.bf16.msra.mxu0 %v2594_v23 }
 0x117   :  { %v1666_v60 = vpop.f32.mrb[2].mxu0 }
 0x118   :  { %v1667_v61 = vpop.f32.mrb[3].mxu0 }
 0x119   :  { %v1701_v62 = vpop.f32.mrb[2].mxu1  ;;  %v1668_v63 = vadd.f32 %v1667_v61, %v1666_v60 }
 0x11a   :  { %v1702_v0 = vpop.f32.mrb[3].mxu1 }
 0x11b   :  { %v1703_v1 = vadd.f32 %v1702_v0, %v1701_v62  ;;  %v665_v4 = vadd.f32 %v1668_v63, %v595_v59 }
 0x11d   :  { %v735_v8 = vadd.f32 %v1703_v1, %v665_v4 }
 0x137   :  { %v1736_v28 = vpop.f32.mrb[4].mxu0 }
 0x138   :  { %v1737_v30 = vpop.f32.mrb[5].mxu0 }
 0x139   :  { %v1771_v31 = vpop.f32.mrb[4].mxu1  ;;  %v1738_v32 = vadd.f32 %v1737_v30, %v1736_v28  ;;  %v1563_v30 = vld [vmem:[%s4058_s6] ss:$0 sm:$0xff] }
 0x13a   :  { %v1772_v33 = vpop.f32.mrb[5].mxu1 }
 0x13b   :  { %v1773_v34 = vadd.f32 %v1772_v33, %v1771_v31  ;;  %v805_v35 = vadd.f32 %v1738_v32, %v735_v8 }
 0x13d   :  { %v875_v36 = vadd.f32 %v1773_v34, %v805_v35 }
 0x157   :  { %v1806_v58 = vpop.f32.mrb[6].mxu0 }
 0x158   :  { %v1807_v59 = vpop.f32.mrb[7].mxu0 }
 0x159   :  { %v1841_v60 = vpop.f32.mrb[6].mxu1  ;;  %v1808_v61 = vadd.f32 %v1807_v59, %v1806_v58 }
 0x15a   :  { %v1842_v62 = vpop.f32.mrb[7].mxu1 }
 0x15b   :  { %v1843_v63 = vadd.f32 %v1842_v62, %v1841_v60  ;;  %v945_v0 = vadd.f32 %v1808_v61, %v875_v36 }
 0x15d   :  { %v1015_v1 = vadd.f32 %v1843_v63, %v945_v0 }
 0x177   :  { %v1876_v2 = vpop.f32.mrb[8].mxu0 }
 0x178   :  { %v1877_v3 = vpop.f32.mrb[9].mxu0 }
 0x179   :  { %v1911_v4 = vpop.f32.mrb[8].mxu1  ;;  %v1878_v5 = vadd.f32 %v1877_v3, %v1876_v2 }
 0x17a   :  { %v1912_v6 = vpop.f32.mrb[9].mxu1 }
 0x17b   :  { %v1913_v7 = vadd.f32 %v1912_v6, %v1911_v4  ;;  %v1085_v8 = vadd.f32 %v1878_v5, %v1015_v1 }
 0x17d   :  { %v1155_v9 = vadd.f32 %v1913_v7, %v1085_v8 }
 0x197   :  { %v1946_v10 = vpop.f32.mrb[10].mxu0 }
 0x198   :  { %v1947_v11 = vpop.f32.mrb[11].mxu0 }
 0x199   :  { %v1981_v12 = vpop.f32.mrb[10].mxu1  ;;  %v1948_v13 = vadd.f32 %v1947_v11, %v1946_v10 }
 0x19a   :  { %v1982_v14 = vpop.f32.mrb[11].mxu1 }
 0x19b   :  { %v1983_v15 = vadd.f32 %v1982_v14, %v1981_v12  ;;  %v1225_v16 = vadd.f32 %v1948_v13, %v1155_v9 }
 0x19d   :  { %v1295_v17 = vadd.f32 %v1983_v15, %v1225_v16 }
 0x1b7   :  { %v1364_v26 = vpop.f32.mrb[12].mxu0 }
 0x1b8   :  { %v1365_v18 = vadd.f32 %v1364_v26, %v1295_v17  ;;  %v2069_v19 = vpop.f32.mrb[13].mxu0 }
 0x1ba   :  { %v1368_v20 = vmax.f32 %v1365_v18, 0.0 }
 0x1bc   :  { %2103 = vmatmul.mubr.f32.vlgmr.msra.gmra.mrb[12].mxu1 %v1368_v20 }
 0x28f   :  { %v1458_v25 = vpop.f32.mrb[12].mxu1 }
 0x290   :  { %v1459_v27 = vadd.f32 %v1562_v24, %v1458_v25  ;;  %v2104_v28 = vpop.f32.mrb[13].mxu1 }
 0x292   :  { %v1462_v29 = vmax.f32 %v1459_v27, 0.0 }
 0x294   :  { %2138 = vmatmul.mubr.f32.vlgmr.msra.gmra.mrb[14].mxu0 %v1462_v29 }
 0x367   :  { %v1552_v31 = vpop.f32.mrb[14].mxu0 }
 0x368   :  { %v1553_v32 = vadd.f32 %v1563_v30, %v1552_v31  ;;  %v2139_v33 = vpop.f32.mrb[15].mxu0 }
 0x36a   :  { %1556 = vst [vmem:[%s4059_s7] sm:$0xff] %v1553_v32 }

</bundles_post_ra>
